<compile_context>
chip_gen: v6e
topology: v6e:2x2x1
jax: 0.10.0
libtpu: 0.0.40
codegen_flags: <defaults>
</compile_context>

<pallas_src>
import math
import functools

import jax
import jax.numpy as jnp
from jax.experimental import pallas as pl
from jax.experimental.pallas import tpu as pltpu

NEG_INF = -1e30  # additive mask value (same softmax zeros as -inf, no NaN risk)

_VMEM_LIMIT = 32 * 1024 * 1024
_CP_1D = pltpu.CompilerParams(dimension_semantics=("parallel",),
                              vmem_limit_bytes=_VMEM_LIMIT)
_CP_2D = pltpu.CompilerParams(dimension_semantics=("parallel", "parallel"),
                              vmem_limit_bytes=_VMEM_LIMIT)


# ----------------------------------------------------------------------------
# tiling helpers
# ----------------------------------------------------------------------------
def _pick_m_tile(M, max_tile=256):
    """Largest sublane-friendly divisor of M that still yields >= 2 grid steps (v7x megacore)."""
    for t in (max_tile, 128, 64, 32, 16, 8):
        if t <= M and M % t == 0 and (M // t) >= 2:
            return t
    return M


def _pick_n_tile(N, max_tile=512):
    """Lane-dense N tile; full dim when small."""
    if N <= max_tile:
        return N
    for t in (512, 256, 128):
        if N % t == 0:
            return t
    return N  # TODO(synk): pad N to a multiple of 128 and mask the tail for real vocab sizes


# ----------------------------------------------------------------------------
# fused linear (encoder projection, vocab projection)
# ----------------------------------------------------------------------------
def _linear_kernel(x_ref, w_ref, b_ref, o_ref, *, activation):
    x = x_ref[...].astype(jnp.bfloat16)
    acc = jnp.dot(x, w_ref[...], preferred_element_type=jnp.float32) + b_ref[...]
    if activation == "relu":
        acc = jnp.maximum(acc, 0.0)
    o_ref[...] = acc.astype(o_ref.dtype)


def fused_linear(x2d, w, b, activation=None, out_dtype=jnp.float32):
    """(M,K) @ (K,N) + b, optional ReLU.  M and N tiled; K resident (K is small here)."""
    M, K = x2d.shape
    N = w.shape[1]
    tm = _pick_m_tile(M)
    tn = _pick_n_tile(N)
    return pl.pallas_call(
        functools.partial(_linear_kernel, activation=activation),
        out_shape=jax.ShapeDtypeStruct((M, N), out_dtype),
        grid=(M // tm, N // tn),
        in_specs=[
            pl.BlockSpec((tm, K), lambda i, j: (i, 0)),
            pl.BlockSpec((K, tn), lambda i, j: (0, j)),
            pl.BlockSpec((1, tn), lambda i, j: (0, j)),
        ],
        out_specs=pl.BlockSpec((tm, tn), lambda i, j: (i, j)),
        compiler_params=_CP_2D,
    )(x2d, w, b.reshape(1, N))


# ----------------------------------------------------------------------------
# fused self-attention block: QKV proj + masked MHA + out proj + residual + LN
# ----------------------------------------------------------------------------
def _self_attn_block_kernel(x_ref, pb_ref, wqkv_ref, bqkv_ref, wo_ref, bo_ref,
                            g_ref, be_ref, o_ref, *, nhead, dh, scale, eps):
    T, D = x_ref.shape
    x = x_ref[...]                                                   # (T, D) bf16
    qkv = (jnp.dot(x, wqkv_ref[...], preferred_element_type=jnp.float32)
           + bqkv_ref[...]).astype(jnp.bfloat16)                     # (T, 3D)

    # causal + key-padding mask generated in-kernel (no HBM (B,T,T) mask)
    row = jax.lax.broadcasted_iota(jnp.int32, (T, T), 0)
    col = jax.lax.broadcasted_iota(jnp.int32, (T, T), 1)
    mask = jnp.where(col <= row, 0.0, NEG_INF).astype(jnp.float32) + pb_ref[...]

    wo = wo_ref[...]                                                 # (D, D) bf16
    attn_proj = jnp.zeros((T, D), jnp.float32)
    for h in range(nhead):
        q = qkv[:, h * dh:(h + 1) * dh]
        k = qkv[:, D + h * dh:D + (h + 1) * dh]
        v = qkv[:, 2 * D + h * dh:2 * D + (h + 1) * dh]
        s = jax.lax.dot_general(q, k, (((1,), (1,)), ((), ())),
                                preferred_element_type=jnp.float32) * scale + mask
        s = s - jnp.max(s, axis=-1, keepdims=True)
        p = jnp.exp(s)
        p = p * pl.reciprocal(jnp.sum(p, axis=-1, keepdims=True), approx=True)
        pv = jnp.dot(p.astype(jnp.bfloat16), v, preferred_element_type=jnp.float32)
        # head merge folded into output projection (no concatenate / lane shuffles)
        attn_proj = attn_proj + jnp.dot(pv.astype(jnp.bfloat16),
                                        wo[h * dh:(h + 1) * dh, :],
                                        preferred_element_type=jnp.float32)

    z = attn_proj + bo_ref[...] + x.astype(jnp.float32)              # bias + residual
    mean = jnp.mean(z, axis=-1, keepdims=True)
    var = jnp.mean((z - mean) ** 2, axis=-1, keepdims=True)
    o_ref[...] = (((z - mean) * jax.lax.rsqrt(var + eps)) * g_ref[...]
                  + be_ref[...]).astype(o_ref.dtype)


def self_attn_block(x3d, pad_bias, wqkv, bqkv, wo, bo, gamma, beta, nhead, eps=1e-5):
    B, T, D = x3d.shape
    dh = D // nhead
    return pl.pallas_call(
        functools.partial(_self_attn_block_kernel, nhead=nhead, dh=dh,
                          scale=1.0 / math.sqrt(dh), eps=eps),
        out_shape=jax.ShapeDtypeStruct((B, T, D), jnp.bfloat16),
        grid=(B,),
        in_specs=[
            pl.BlockSpec((pl.Squeezed(), T, D), lambda b: (b, 0, 0)),
            pl.BlockSpec((pl.Squeezed(), 1, T), lambda b: (b, 0, 0)),
            pl.BlockSpec((D, 3 * D), lambda b: (0, 0)),
            pl.BlockSpec((1, 3 * D), lambda b: (0, 0)),
            pl.BlockSpec((D, D), lambda b: (0, 0)),
            pl.BlockSpec((1, D), lambda b: (0, 0)),
            pl.BlockSpec((1, D), lambda b: (0, 0)),
            pl.BlockSpec((1, D), lambda b: (0, 0)),
        ],
        out_specs=pl.BlockSpec((pl.Squeezed(), T, D), lambda b: (b, 0, 0)),
        compiler_params=_CP_1D,
    )(x3d, pad_bias, wqkv, bqkv.reshape(1, -1), wo, bo.reshape(1, -1),
      gamma.reshape(1, -1), beta.reshape(1, -1))


# ----------------------------------------------------------------------------
# fused cross-attention block: Q/KV proj + MHA + out proj + residual + LN
# ----------------------------------------------------------------------------
def _cross_attn_block_kernel(x_ref, m_ref, wq_ref, bq_ref, wkv_ref, bkv_ref,
                             wo_ref, bo_ref, g_ref, be_ref, o_ref,
                             *, nhead, dh, scale, eps):
    T, D = x_ref.shape
    x = x_ref[...]                                                   # (T, D) bf16
    mem = m_ref[...]                                                 # (S, D) bf16
    q_all = (jnp.dot(x, wq_ref[...], preferred_element_type=jnp.float32)
             + bq_ref[...]).astype(jnp.bfloat16)                     # (T, D)
    kv = (jnp.dot(mem, wkv_ref[...], preferred_element_type=jnp.float32)
          + bkv_ref[...]).astype(jnp.bfloat16)                       # (S, 2D)

    wo = wo_ref[...]
    attn_proj = jnp.zeros((T, D), jnp.float32)
    for h in range(nhead):
        q = q_all[:, h * dh:(h + 1) * dh]
        k = kv[:, h * dh:(h + 1) * dh]
        v = kv[:, D + h * dh:D + (h + 1) * dh]
        s = jax.lax.dot_general(q, k, (((1,), (1,)), ((), ())),
                                preferred_element_type=jnp.float32) * scale
        s = s - jnp.max(s, axis=-1, keepdims=True)
        p = jnp.exp(s)
        p = p * pl.reciprocal(jnp.sum(p, axis=-1, keepdims=True), approx=True)
        pv = jnp.dot(p.astype(jnp.bfloat16), v, preferred_element_type=jnp.float32)
        attn_proj = attn_proj + jnp.dot(pv.astype(jnp.bfloat16),
                                        wo[h * dh:(h + 1) * dh, :],
                                        preferred_element_type=jnp.float32)

    z = attn_proj + bo_ref[...] + x.astype(jnp.float32)
    mean = jnp.mean(z, axis=-1, keepdims=True)
    var = jnp.mean((z - mean) ** 2, axis=-1, keepdims=True)
    o_ref[...] = (((z - mean) * jax.lax.rsqrt(var + eps)) * g_ref[...]
                  + be_ref[...]).astype(o_ref.dtype)


def cross_attn_block(x3d, mem3d, wq, bq, wkv, bkv, wo, bo, gamma, beta, nhead, eps=1e-5):
    B, T, D = x3d.shape
    S = mem3d.shape[1]
    dh = D // nhead
    return pl.pallas_call(
        functools.partial(_cross_attn_block_kernel, nhead=nhead, dh=dh,
                          scale=1.0 / math.sqrt(dh), eps=eps),
        out_shape=jax.ShapeDtypeStruct((B, T, D), jnp.bfloat16),
        grid=(B,),
        in_specs=[
            pl.BlockSpec((pl.Squeezed(), T, D), lambda b: (b, 0, 0)),
            pl.BlockSpec((pl.Squeezed(), S, D), lambda b: (b, 0, 0)),
            pl.BlockSpec((D, D), lambda b: (0, 0)),
            pl.BlockSpec((1, D), lambda b: (0, 0)),
            pl.BlockSpec((D, 2 * D), lambda b: (0, 0)),
            pl.BlockSpec((1, 2 * D), lambda b: (0, 0)),
            pl.BlockSpec((D, D), lambda b: (0, 0)),
            pl.BlockSpec((1, D), lambda b: (0, 0)),
            pl.BlockSpec((1, D), lambda b: (0, 0)),
            pl.BlockSpec((1, D), lambda b: (0, 0)),
        ],
        out_specs=pl.BlockSpec((pl.Squeezed(), T, D), lambda b: (b, 0, 0)),
        compiler_params=_CP_1D,
    )(x3d, mem3d, wq, bq.reshape(1, -1), wkv, bkv.reshape(1, -1),
      wo, bo.reshape(1, -1), gamma.reshape(1, -1), beta.reshape(1, -1))


# ----------------------------------------------------------------------------
# fused feed-forward block: Linear+ReLU + Linear + residual + LN
# ----------------------------------------------------------------------------
def _ffn_block_kernel(x_ref, w1_ref, b1_ref, w2_ref, b2_ref, g_ref, be_ref, o_ref, *, eps):
    x = x_ref[...]                                                   # (tm, D) bf16
    h = jnp.maximum(jnp.dot(x, w1_ref[...], preferred_element_type=jnp.float32)
                    + b1_ref[...], 0.0).astype(jnp.bfloat16)         # (tm, FF)
    z = (jnp.dot(h, w2_ref[...], preferred_element_type=jnp.float32)
         + b2_ref[...] + x.astype(jnp.float32))                      # bias + residual
    mean = jnp.mean(z, axis=-1, keepdims=True)
    var = jnp.mean((z - mean) ** 2, axis=-1, keepdims=True)
    o_ref[...] = (((z - mean) * jax.lax.rsqrt(var + eps)) * g_ref[...]
                  + be_ref[...]).astype(o_ref.dtype)


def ffn_block(x2d, w1, b1, w2, b2, gamma, beta, eps=1e-5):
    M, D = x2d.shape
    FF = w1.shape[1]
    tm = _pick_m_tile(M)
    return pl.pallas_call(
        functools.partial(_ffn_block_kernel, eps=eps),
        out_shape=jax.ShapeDtypeStruct((M, D), jnp.bfloat16),
        grid=(M // tm,),
        in_specs=[
            pl.BlockSpec((tm, D), lambda i: (i, 0)),
            pl.BlockSpec((D, FF), lambda i: (0, 0)),
            pl.BlockSpec((1, FF), lambda i: (0, 0)),
            pl.BlockSpec((FF, D), lambda i: (0, 0)),
            pl.BlockSpec((1, D), lambda i: (0, 0)),
            pl.BlockSpec((1, D), lambda i: (0, 0)),
            pl.BlockSpec((1, D), lambda i: (0, 0)),
        ],
        out_specs=pl.BlockSpec((tm, D), lambda i: (i, 0)),
        compiler_params=_CP_1D,
    )(x2d, w1, b1.reshape(1, FF), w2, b2.reshape(1, D),
      gamma.reshape(1, D), beta.reshape(1, D))


# ----------------------------------------------------------------------------
# Model composition
# ----------------------------------------------------------------------------
def transformer_decoder_forward(params, encoder_out, tgt_captions, pad_idx):
    D = params["d_model"]
    H = params["nhead"]
    V = params["vocab_size"]
    B, S_enc, E = encoder_out.shape
    T = tgt_captions.shape[1]

    # encoder projection (encoder_feature_dim != d_model -> Linear); bf16 memory for K/V matmuls
    memory = fused_linear(encoder_out.reshape(B * S_enc, E),
                          params["enc_proj_w"], params["enc_proj_b"],
                          out_dtype=jnp.bfloat16).reshape(B, S_enc, D)

    # token embedding * sqrt(d_model) + positional encoding (dropout = identity)
    emb = jnp.take(params["embedding"], tgt_captions, axis=0) * math.sqrt(D)
    x = (emb + params["pe"][:T][None, :, :]).astype(jnp.bfloat16)    # (B, T, D)

    # key-padding additive bias (B, 1, T); causal part is generated in-kernel
    pad_bias = jnp.where(tgt_captions == pad_idx, NEG_INF, 0.0).astype(jnp.float32)
    pad_bias = pad_bias.reshape(B, 1, T)

    for lp in params["layers"]:
        x = self_attn_block(x, pad_bias,
                            lp["sa_w_qkv"], lp["sa_b_qkv"],
                            lp["sa_w_o"], lp["sa_b_o"],
                            lp["norm1_g"], lp["norm1_b"], H)
        x = cross_attn_block(x, memory,
                             lp["ca_w_q"], lp["ca_b_q"],
                             lp["ca_w_kv"], lp["ca_b_kv"],
                             lp["ca_w_o"], lp["ca_b_o"],
                             lp["norm2_g"], lp["norm2_b"], H)
        x = ffn_block(x.reshape(B * T, D),
                      lp["ff_w1"], lp["ff_b1"],
                      lp["ff_w2"], lp["ff_b2"],
                      lp["norm3_g"], lp["norm3_b"]).reshape(B, T, D)

    logits = fused_linear(x.reshape(B * T, D), params["fc_out_w"], params["fc_out_b"],
                          out_dtype=jnp.float32).reshape(B, T, V)
    return logits, None


# ----------------------------------------------------------------------------
# Deterministic parameter initialization
# ----------------------------------------------------------------------------
def make_positional_encoding(max_len, d_model):
    position = jnp.arange(max_len, dtype=jnp.float32)[:, None]
    div_term = jnp.exp(jnp.arange(0, d_model, 2, dtype=jnp.float32)
                       * (-math.log(10000.0) / d_model))
    pe = jnp.zeros((max_len, d_model), jnp.float32)
    pe = pe.at[:, 0::2].set(jnp.sin(position * div_term))
    pe = pe.at[:, 1::2].set(jnp.cos(position * div_term))
    return pe


def init_params(key, vocab_size, d_model, nhead, num_layers, dim_ff, enc_dim, max_len):
    def dense(k, fan_in, fan_out):
        # weights stored bf16 (native MXU dtype); biases / LN / embedding stay f32
        return (0.02 * jax.random.normal(k, (fan_in, fan_out), jnp.float32)).astype(jnp.bfloat16)

    def zeros(n):
        return jnp.zeros((n,), jnp.float32)

    keys = jax.random.split(key, 3 + num_layers)
    params = {
        "d_model": d_model,
        "nhead": nhead,
        "vocab_size": vocab_size,
        "embedding": 0.02 * jax.random.normal(keys[0], (vocab_size, d_model), jnp.float32),
        "enc_proj_w": dense(keys[1], enc_dim, d_model),
        "enc_proj_b": zeros(d_model),
        "fc_out_w": dense(keys[2], d_model, vocab_size),
        "fc_out_b": zeros(vocab_size),
        "pe": make_positional_encoding(max_len, d_model),
        "layers": [],
    }
    for l in range(num_layers):
        lk = jax.random.split(keys[3 + l], 7)
        layer = {
            # self-attention: Q|K|V fused
            "sa_w_qkv": dense(lk[0], d_model, 3 * d_model), "sa_b_qkv": zeros(3 * d_model),
            "sa_w_o": dense(lk[1], d_model, d_model),       "sa_b_o": zeros(d_model),
            # cross-attention: Q separate, K|V fused (memory side)
            "ca_w_q": dense(lk[2], d_model, d_model),       "ca_b_q": zeros(d_model),
            "ca_w_kv": dense(lk[3], d_model, 2 * d_model),  "ca_b_kv": zeros(2 * d_model),
            "ca_w_o": dense(lk[4], d_model, d_model),       "ca_b_o": zeros(d_model),
            # feed-forward
            "ff_w1": dense(lk[5], d_model, dim_ff),         "ff_b1": zeros(dim_ff),
            "ff_w2": dense(lk[6], dim_ff, d_model),         "ff_b2": zeros(d_model),
            # layer norms
            "norm1_g": jnp.ones((d_model,), jnp.float32), "norm1_b": zeros(d_model),
            "norm2_g": jnp.ones((d_model,), jnp.float32), "norm2_b": zeros(d_model),
            "norm3_g": jnp.ones((d_model,), jnp.float32), "norm3_b": zeros(d_model),
        }
        params["layers"].append(layer)
    return params


# ----------------------------------------------------------------------------
if __name__ == "__main__":
    # Small, lane-dense, TPU-friendly config consistent with the module's constructor.
    VOCAB = 256
    D_MODEL = 128          # lane-dense (multiple of 128)
    NHEAD = 4              # Dh = 32
    NUM_LAYERS = 2
    DIM_FF = 256
    ENC_DIM = 192          # != d_model -> encoder_projection is a Linear
    MAX_LEN = 64
    PAD_IDX = 0

    B = 2                  # batch (>= 2 parallel grid steps on the attention kernels)
    S_ENC = 16             # encoder (memory) sequence length
    T = 16                 # target caption length

    key = jax.random.PRNGKey(0)
    k_param, k_enc, k_tgt = jax.random.split(key, 3)

    params = init_params(k_param, VOCAB, D_MODEL, NHEAD, NUM_LAYERS, DIM_FF, ENC_DIM, MAX_LEN)

    encoder_out = jax.random.normal(k_enc, (B, S_ENC, ENC_DIM), jnp.float32)
    tgt_captions = jax.random.randint(k_tgt, (B, T), 1, VOCAB)   # position 0 never PAD
    tgt_captions = tgt_captions.at[1, 12:].set(PAD_IDX)          # some padding at the end

    fwd = jax.jit(functools.partial(transformer_decoder_forward, params))
    logits, _ = fwd(encoder_out, tgt_captions, PAD_IDX)
    logits = jax.block_until_ready(logits)

    assert logits.shape == (B, T, VOCAB)
    assert bool(jnp.all(jnp.isfinite(logits)))
    print("KERNEL_OK")
</pallas_src>

<mosaic_0001>
module attributes {stable_mosaic.version = 11 : i64} {
  func.func @_linear_kernel(%arg0: i32, %arg1: i32, %arg2: memref<16x192xf32, #tpu.memory_space<vmem>>, %arg3: memref<192x128xbf16, #tpu.memory_space<vmem>>, %arg4: memref<1x128xf32, #tpu.memory_space<vmem>>, %arg5: memref<16x128xbf16, #tpu.memory_space<vmem>>) attributes {dimension_semantics = [#tpu.dimension_semantics<parallel>, #tpu.dimension_semantics<parallel>], iteration_bounds = array<i64: 2, 1>, scalar_prefetch = 0 : i64, scratch_operands = 0 : i64, tpu.core_type = #tpu.core_type<tc>, window_params = [{transform_indices = @transform_0, window_bounds = array<i64: 16, 192>}, {transform_indices = @transform_1, window_bounds = array<i64: 192, 128>}, {transform_indices = @transform_2, window_bounds = array<i64: 1, 128>}, {transform_indices = @transform_3, window_bounds = array<i64: 16, 128>}]} {
    %c0 = arith.constant 0 : index
    %c0_0 = arith.constant 0 : index
    %0 = vector.load %arg2[%c0, %c0_0] : memref<16x192xf32, #tpu.memory_space<vmem>>, vector<16x192xf32>
    %1 = arith.truncf %0 : vector<16x192xf32> to vector<16x192xbf16>
    %c0_1 = arith.constant 0 : index
    %c0_2 = arith.constant 0 : index
    %2 = vector.load %arg3[%c0_1, %c0_2] : memref<192x128xbf16, #tpu.memory_space<vmem>>, vector<192x128xbf16>
    %cst = arith.constant dense<0.000000e+00> : vector<16x128xf32>
    %3 = tpu.matmul %1, %2, %cst {dimension_numbers = #tpu.dot_dimension_numbers<[1], [0], [0], [1], [0, 0, 1, 1], [], []>} : vector<16x192xbf16>, vector<192x128xbf16>, vector<16x128xf32> -> vector<16x128xf32>
    %c0_3 = arith.constant 0 : index
    %c0_4 = arith.constant 0 : index
    %4 = vector.load %arg4[%c0_3, %c0_4] : memref<1x128xf32, #tpu.memory_space<vmem>>, vector<1x128xf32>
    %5 = vector.broadcast %4 : vector<1x128xf32> to vector<16x128xf32>
    %6 = arith.addf %3, %5 : vector<16x128xf32>
    %7 = arith.truncf %6 : vector<16x128xf32> to vector<16x128xbf16>
    %c0_5 = arith.constant 0 : index
    %c0_6 = arith.constant 0 : index
    %8 = vector.load %arg5[%c0_5, %c0_6] : memref<16x128xbf16, #tpu.memory_space<vmem>>, vector<16x128xbf16>
    tpu.vector_store %arg5[%c0_5, %c0_6], %7 {strides = array<i32>} : memref<16x128xbf16, #tpu.memory_space<vmem>>, vector<16x128xbf16>,
    return
  }
  func.func @transform_0(%arg0: i32, %arg1: i32) -> (i32, i32) {
    %c0_i32 = arith.constant 0 : i32
    %c0_i32_0 = arith.constant 0 : i32
    return %arg0, %c0_i32 : i32, i32
  }
  func.func @transform_1(%arg0: i32, %arg1: i32) -> (i32, i32) {
    %c0_i32 = arith.constant 0 : i32
    %c0_i32_0 = arith.constant 0 : i32
    return %c0_i32, %arg1 : i32, i32
  }
  func.func @transform_2(%arg0: i32, %arg1: i32) -> (i32, i32) {
    %c0_i32 = arith.constant 0 : i32
    %c0_i32_0 = arith.constant 0 : i32
    return %c0_i32, %arg1 : i32, i32
  }
  func.func @transform_3(%arg0: i32, %arg1: i32) -> (i32, i32) {
    %c0_i32 = arith.constant 0 : i32
    return %arg0, %arg1 : i32, i32
  }
}

module attributes {stable_mosaic.version = 11 : i64} {
  func.func @_self_attn_block_kernel(%arg0: i32, %arg1: memref<1x16x128xbf16, #tpu.memory_space<vmem>>, %arg2: memref<1x1x16xf32, #tpu.memory_space<vmem>>, %arg3: memref<128x384xbf16, #tpu.memory_space<vmem>>, %arg4: memref<1x384xf32, #tpu.memory_space<vmem>>, %arg5: memref<128x128xbf16, #tpu.memory_space<vmem>>, %arg6: memref<1x128xf32, #tpu.memory_space<vmem>>, %arg7: memref<1x128xf32, #tpu.memory_space<vmem>>, %arg8: memref<1x128xf32, #tpu.memory_space<vmem>>, %arg9: memref<1x16x128xbf16, #tpu.memory_space<vmem>>) attributes {dimension_semantics = [#tpu.dimension_semantics<parallel>], iteration_bounds = array<i64: 2>, scalar_prefetch = 0 : i64, scratch_operands = 0 : i64, tpu.core_type = #tpu.core_type<tc>, window_params = [{transform_indices = @transform_0, window_bounds = array<i64: 1, 16, 128>}, {transform_indices = @transform_1, window_bounds = array<i64: 1, 1, 16>}, {pipeline_mode = #tpu.pipeline_mode<synchronous>, transform_indices = @transform_2, window_bounds = array<i64: 128, 384>}, {pipeline_mode = #tpu.pipeline_mode<synchronous>, transform_indices = @transform_3, window_bounds = array<i64: 1, 384>}, {pipeline_mode = #tpu.pipeline_mode<synchronous>, transform_indices = @transform_4, window_bounds = array<i64: 128, 128>}, {pipeline_mode = #tpu.pipeline_mode<synchronous>, transform_indices = @transform_5, window_bounds = array<i64: 1, 128>}, {pipeline_mode = #tpu.pipeline_mode<synchronous>, transform_indices = @transform_6, window_bounds = array<i64: 1, 128>}, {pipeline_mode = #tpu.pipeline_mode<synchronous>, transform_indices = @transform_7, window_bounds = array<i64: 1, 128>}, {transform_indices = @transform_8, window_bounds = array<i64: 1, 16, 128>}]} {
    %c0 = arith.constant 0 : index
    %c0_0 = arith.constant 0 : index
    %c0_1 = arith.constant 0 : index
    %0 = vector.load %arg1[%c0, %c0_0, %c0_1] : memref<1x16x128xbf16, #tpu.memory_space<vmem>>, vector<1x16x128xbf16>
    %1 = vector.shape_cast %0 : vector<1x16x128xbf16> to vector<16x128xbf16>
    %c0_2 = arith.constant 0 : index
    %c0_3 = arith.constant 0 : index
    %2 = vector.load %arg3[%c0_2, %c0_3] : memref<128x384xbf16, #tpu.memory_space<vmem>>, vector<128x384xbf16>
    %cst = arith.constant dense<0.000000e+00> : vector<16x384xf32>
    %3 = tpu.matmul %1, %2, %cst {dimension_numbers = #tpu.dot_dimension_numbers<[1], [0], [0], [1], [0, 0, 1, 1], [], []>} : vector<16x128xbf16>, vector<128x384xbf16>, vector<16x384xf32> -> vector<16x384xf32>
    %c0_4 = arith.constant 0 : index
    %c0_5 = arith.constant 0 : index
    %4 = vector.load %arg4[%c0_4, %c0_5] : memref<1x384xf32, #tpu.memory_space<vmem>>, vector<1x384xf32>
    %5 = vector.broadcast %4 : vector<1x384xf32> to vector<16x384xf32>
    %6 = arith.addf %3, %5 : vector<16x384xf32>
    %7 = arith.truncf %6 : vector<16x384xf32> to vector<16x384xbf16>
    %8 = tpu.iota {dimensions = array<i32: 0>} : vector<16x16xi32>
    %9 = tpu.iota {dimensions = array<i32: 1>} : vector<16x16xi32>
    %10 = arith.cmpi sle, %9, %8 : vector<16x16xi32>
    %cst_6 = arith.constant 0.000000e+00 : f32
    %cst_7 = arith.constant -1.000000e+30 : f32
    %11 = vector.broadcast %cst_6 : f32 to vector<16x16xf32>
    %12 = vector.broadcast %cst_7 : f32 to vector<16x16xf32>
    %13 = arith.select %10, %11, %12 : vector<16x16xi1>, vector<16x16xf32>
    %c0_8 = arith.constant 0 : index
    %c0_9 = arith.constant 0 : index
    %c0_10 = arith.constant 0 : index
    %14 = vector.load %arg2[%c0_8, %c0_9, %c0_10] : memref<1x1x16xf32, #tpu.memory_space<vmem>>, vector<1x1x16xf32>
    %15 = vector.shape_cast %14 : vector<1x1x16xf32> to vector<1x16xf32>
    %16 = vector.broadcast %15 : vector<1x16xf32> to vector<16x16xf32>
    %17 = arith.addf %13, %16 : vector<16x16xf32>
    %c0_11 = arith.constant 0 : index
    %c0_12 = arith.constant 0 : index
    %18 = vector.load %arg5[%c0_11, %c0_12] : memref<128x128xbf16, #tpu.memory_space<vmem>>, vector<128x128xbf16>
    %cst_13 = arith.constant 0.000000e+00 : f32
    %19 = vector.broadcast %cst_13 : f32 to vector<16x128xf32>
    %20 = vector.extract_strided_slice %7 {offsets = [0, 0], sizes = [16, 32], strides = [1, 1]} : vector<16x384xbf16> to vector<16x32xbf16>
    %21 = vector.extract_strided_slice %7 {offsets = [0, 128], sizes = [16, 32], strides = [1, 1]} : vector<16x384xbf16> to vector<16x32xbf16>
    %22 = vector.extract_strided_slice %7 {offsets = [0, 256], sizes = [16, 32], strides = [1, 1]} : vector<16x384xbf16> to vector<16x32xbf16>
    %cst_14 = arith.constant dense<0.000000e+00> : vector<16x16xf32>
    %23 = tpu.matmul %20, %21, %cst_14 {dimension_numbers = #tpu.dot_dimension_numbers<[1], [1], [0], [0], [0, 0, 1, 0], [], []>} : vector<16x32xbf16>, vector<16x32xbf16>, vector<16x16xf32> -> vector<16x16xf32>
    %cst_15 = arith.constant 0.176776692 : f32
    %24 = vector.broadcast %cst_15 : f32 to vector<16x16xf32>
    %25 = arith.mulf %23, %24 : vector<16x16xf32>
    %26 = arith.addf %25, %17 : vector<16x16xf32>
    %cst_16 = arith.constant dense<0xFF800000> : vector<16xf32>
    %27 = vector.multi_reduction <maximumf>, %26, %cst_16 [1] : vector<16x16xf32> to vector<16xf32>
    %28 = vector.shape_cast %27 : vector<16xf32> to vector<16x1xf32>
    %29 = vector.broadcast %28 : vector<16x1xf32> to vector<16x16xf32>
    %30 = arith.subf %26, %29 : vector<16x16xf32>
    %31 = math.exp %30 : vector<16x16xf32>
    %cst_17 = arith.constant dense<0.000000e+00> : vector<16xf32>
    %32 = vector.multi_reduction <add>, %31, %cst_17 [1] : vector<16x16xf32> to vector<16xf32>
    %33 = vector.shape_cast %32 : vector<16xf32> to vector<16x1xf32>
    %34 = tpu.reciprocal %33 {approx = true} : vector<16x1xf32> -> vector<16x1xf32>
    %35 = vector.broadcast %34 : vector<16x1xf32> to vector<16x16xf32>
    %36 = arith.mulf %31, %35 : vector<16x16xf32>
    %37 = arith.truncf %36 : vector<16x16xf32> to vector<16x16xbf16>
    %cst_18 = arith.constant dense<0.000000e+00> : vector<16x32xf32>
    %38 = tpu.matmul %37, %22, %cst_18 {dimension_numbers = #tpu.dot_dimension_numbers<[1], [0], [0], [1], [0, 0, 1, 1], [], []>} : vector<16x16xbf16>, vector<16x32xbf16>, vector<16x32xf32> -> vector<16x32xf32>
    %39 = arith.truncf %38 : vector<16x32xf32> to vector<16x32xbf16>
    %40 = vector.extract_strided_slice %18 {offsets = [0, 0], sizes = [32, 128], strides = [1, 1]} : vector<128x128xbf16> to vector<32x128xbf16>
    %cst_19 = arith.constant dense<0.000000e+00> : vector<16x128xf32>
    %41 = tpu.matmul %39, %40, %cst_19 {dimension_numbers = #tpu.dot_dimension_numbers<[1], [0], [0], [1], [0, 0, 1, 1], [], []>} : vector<16x32xbf16>, vector<32x128xbf16>, vector<16x128xf32> -> vector<16x128xf32>
    %42 = arith.addf %19, %41 : vector<16x128xf32>
    %43 = vector.extract_strided_slice %7 {offsets = [0, 32], sizes = [16, 32], strides = [1, 1]} : vector<16x384xbf16> to vector<16x32xbf16>
    %44 = vector.extract_strided_slice %7 {offsets = [0, 160], sizes = [16, 32], strides = [1, 1]} : vector<16x384xbf16> to vector<16x32xbf16>
    %45 = vector.extract_strided_slice %7 {offsets = [0, 288], sizes = [16, 32], strides = [1, 1]} : vector<16x384xbf16> to vector<16x32xbf16>
    %cst_20 = arith.constant dense<0.000000e+00> : vector<16x16xf32>
    %46 = tpu.matmul %43, %44, %cst_20 {dimension_numbers = #tpu.dot_dimension_numbers<[1], [1], [0], [0], [0, 0, 1, 0], [], []>} : vector<16x32xbf16>, vector<16x32xbf16>, vector<16x16xf32> -> vector<16x16xf32>
    %cst_21 = arith.constant 0.176776692 : f32
    %47 = vector.broadcast %cst_21 : f32 to vector<16x16xf32>
    %48 = arith.mulf %46, %47 : vector<16x16xf32>
    %49 = arith.addf %48, %17 : vector<16x16xf32>
    %cst_22 = arith.constant dense<0xFF800000> : vector<16xf32>
    %50 = vector.multi_reduction <maximumf>, %49, %cst_22 [1] : vector<16x16xf32> to vector<16xf32>
    %51 = vector.shape_cast %50 : vector<16xf32> to vector<16x1xf32>
    %52 = vector.broadcast %51 : vector<16x1xf32> to vector<16x16xf32>
    %53 = arith.subf %49, %52 : vector<16x16xf32>
    %54 = math.exp %53 : vector<16x16xf32>
    %cst_23 = arith.constant dense<0.000000e+00> : vector<16xf32>
    %55 = vector.multi_reduction <add>, %54, %cst_23 [1] : vector<16x16xf32> to vector<16xf32>
    %56 = vector.shape_cast %55 : vector<16xf32> to vector<16x1xf32>
    %57 = tpu.reciprocal %56 {approx = true} : vector<16x1xf32> -> vector<16x1xf32>
    %58 = vector.broadcast %57 : vector<16x1xf32> to vector<16x16xf32>
    %59 = arith.mulf %54, %58 : vector<16x16xf32>
    %60 = arith.truncf %59 : vector<16x16xf32> to vector<16x16xbf16>
    %cst_24 = arith.constant dense<0.000000e+00> : vector<16x32xf32>
    %61 = tpu.matmul %60, %45, %cst_24 {dimension_numbers = #tpu.dot_dimension_numbers<[1], [0], [0], [1], [0, 0, 1, 1], [], []>} : vector<16x16xbf16>, vector<16x32xbf16>, vector<16x32xf32> -> vector<16x32xf32>
    %62 = arith.truncf %61 : vector<16x32xf32> to vector<16x32xbf16>
    %63 = vector.extract_strided_slice %18 {offsets = [32, 0], sizes = [32, 128], strides = [1, 1]} : vector<128x128xbf16> to vector<32x128xbf16>
    %cst_25 = arith.constant dense<0.000000e+00> : vector<16x128xf32>
    %64 = tpu.matmul %62, %63, %cst_25 {dimension_numbers = #tpu.dot_dimension_numbers<[1], [0], [0], [1], [0, 0, 1, 1], [], []>} : vector<16x32xbf16>, vector<32x128xbf16>, vector<16x128xf32> -> vector<16x128xf32>
    %65 = arith.addf %42, %64 : vector<16x128xf32>
    %66 = vector.extract_strided_slice %7 {offsets = [0, 64], sizes = [16, 32], strides = [1, 1]} : vector<16x384xbf16> to vector<16x32xbf16>
    %67 = vector.extract_strided_slice %7 {offsets = [0, 192], sizes = [16, 32], strides = [1, 1]} : vector<16x384xbf16> to vector<16x32xbf16>
    %68 = vector.extract_strided_slice %7 {offsets = [0, 320], sizes = [16, 32], strides = [1, 1]} : vector<16x384xbf16> to vector<16x32xbf16>
    %cst_26 = arith.constant dense<0.000000e+00> : vector<16x16xf32>
    %69 = tpu.matmul %66, %67, %cst_26 {dimension_numbers = #tpu.dot_dimension_numbers<[1], [1], [0], [0], [0, 0, 1, 0], [], []>} : vector<16x32xbf16>, vector<16x32xbf16>, vector<16x16xf32> -> vector<16x16xf32>
    %cst_27 = arith.constant 0.176776692 : f32
    %70 = vector.broadcast %cst_27 : f32 to vector<16x16xf32>
    %71 = arith.mulf %69, %70 : vector<16x16xf32>
    %72 = arith.addf %71, %17 : vector<16x16xf32>
    %cst_28 = arith.constant dense<0xFF800000> : vector<16xf32>
    %73 = vector.multi_reduction <maximumf>, %72, %cst_28 [1] : vector<16x16xf32> to vector<16xf32>
    %74 = vector.shape_cast %73 : vector<16xf32> to vector<16x1xf32>
    %75 = vector.broadcast %74 : vector<16x1xf32> to vector<16x16xf32>
    %76 = arith.subf %72, %75 : vector<16x16xf32>
    %77 = math.exp %76 : vector<16x16xf32>
    %cst_29 = arith.constant dense<0.000000e+00> : vector<16xf32>
    %78 = vector.multi_reduction <add>, %77, %cst_29 [1] : vector<16x16xf32> to vector<16xf32>
    %79 = vector.shape_cast %78 : vector<16xf32> to vector<16x1xf32>
    %80 = tpu.reciprocal %79 {approx = true} : vector<16x1xf32> -> vector<16x1xf32>
    %81 = vector.broadcast %80 : vector<16x1xf32> to vector<16x16xf32>
    %82 = arith.mulf %77, %81 : vector<16x16xf32>
    %83 = arith.truncf %82 : vector<16x16xf32> to vector<16x16xbf16>
    %cst_30 = arith.constant dense<0.000000e+00> : vector<16x32xf32>
    %84 = tpu.matmul %83, %68, %cst_30 {dimension_numbers = #tpu.dot_dimension_numbers<[1], [0], [0], [1], [0, 0, 1, 1], [], []>} : vector<16x16xbf16>, vector<16x32xbf16>, vector<16x32xf32> -> vector<16x32xf32>
    %85 = arith.truncf %84 : vector<16x32xf32> to vector<16x32xbf16>
    %86 = vector.extract_strided_slice %18 {offsets = [64, 0], sizes = [32, 128], strides = [1, 1]} : vector<128x128xbf16> to vector<32x128xbf16>
    %cst_31 = arith.constant dense<0.000000e+00> : vector<16x128xf32>
    %87 = tpu.matmul %85, %86, %cst_31 {dimension_numbers = #tpu.dot_dimension_numbers<[1], [0], [0], [1], [0, 0, 1, 1], [], []>} : vector<16x32xbf16>, vector<32x128xbf16>, vector<16x128xf32> -> vector<16x128xf32>
    %88 = arith.addf %65, %87 : vector<16x128xf32>
    %89 = vector.extract_strided_slice %7 {offsets = [0, 96], sizes = [16, 32], strides = [1, 1]} : vector<16x384xbf16> to vector<16x32xbf16>
    %90 = vector.extract_strided_slice %7 {offsets = [0, 224], sizes = [16, 32], strides = [1, 1]} : vector<16x384xbf16> to vector<16x32xbf16>
    %91 = vector.extract_strided_slice %7 {offsets = [0, 352], sizes = [16, 32], strides = [1, 1]} : vector<16x384xbf16> to vector<16x32xbf16>
    %cst_32 = arith.constant dense<0.000000e+00> : vector<16x16xf32>
    %92 = tpu.matmul %89, %90, %cst_32 {dimension_numbers = #tpu.dot_dimension_numbers<[1], [1], [0], [0], [0, 0, 1, 0], [], []>} : vector<16x32xbf16>, vector<16x32xbf16>, vector<16x16xf32> -> vector<16x16xf32>
    %cst_33 = arith.constant 0.176776692 : f32
    %93 = vector.broadcast %cst_33 : f32 to vector<16x16xf32>
    %94 = arith.mulf %92, %93 : vector<16x16xf32>
    %95 = arith.addf %94, %17 : vector<16x16xf32>
    %cst_34 = arith.constant dense<0xFF800000> : vector<16xf32>
    %96 = vector.multi_reduction <maximumf>, %95, %cst_34 [1] : vector<16x16xf32> to vector<16xf32>
    %97 = vector.shape_cast %96 : vector<16xf32> to vector<16x1xf32>
    %98 = vector.broadcast %97 : vector<16x1xf32> to vector<16x16xf32>
    %99 = arith.subf %95, %98 : vector<16x16xf32>
    %100 = math.exp %99 : vector<16x16xf32>
    %cst_35 = arith.constant dense<0.000000e+00> : vector<16xf32>
    %101 = vector.multi_reduction <add>, %100, %cst_35 [1] : vector<16x16xf32> to vector<16xf32>
    %102 = vector.shape_cast %101 : vector<16xf32> to vector<16x1xf32>
    %103 = tpu.reciprocal %102 {approx = true} : vector<16x1xf32> -> vector<16x1xf32>
    %104 = vector.broadcast %103 : vector<16x1xf32> to vector<16x16xf32>
    %105 = arith.mulf %100, %104 : vector<16x16xf32>
    %106 = arith.truncf %105 : vector<16x16xf32> to vector<16x16xbf16>
    %cst_36 = arith.constant dense<0.000000e+00> : vector<16x32xf32>
    %107 = tpu.matmul %106, %91, %cst_36 {dimension_numbers = #tpu.dot_dimension_numbers<[1], [0], [0], [1], [0, 0, 1, 1], [], []>} : vector<16x16xbf16>, vector<16x32xbf16>, vector<16x32xf32> -> vector<16x32xf32>
    %108 = arith.truncf %107 : vector<16x32xf32> to vector<16x32xbf16>
    %109 = vector.extract_strided_slice %18 {offsets = [96, 0], sizes = [32, 128], strides = [1, 1]} : vector<128x128xbf16> to vector<32x128xbf16>
    %cst_37 = arith.constant dense<0.000000e+00> : vector<16x128xf32>
    %110 = tpu.matmul %108, %109, %cst_37 {dimension_numbers = #tpu.dot_dimension_numbers<[1], [0], [0], [1], [0, 0, 1, 1], [], []>} : vector<16x32xbf16>, vector<32x128xbf16>, vector<16x128xf32> -> vector<16x128xf32>
    %111 = arith.addf %88, %110 : vector<16x128xf32>
    %c0_38 = arith.constant 0 : index
    %c0_39 = arith.constant 0 : index
    %112 = vector.load %arg6[%c0_38, %c0_39] : memref<1x128xf32, #tpu.memory_space<vmem>>, vector<1x128xf32>
    %113 = vector.broadcast %112 : vector<1x128xf32> to vector<16x128xf32>
    %114 = arith.addf %111, %113 : vector<16x128xf32>
    %115 = arith.extf %1 : vector<16x128xbf16> to vector<16x128xf32>
    %116 = arith.addf %114, %115 : vector<16x128xf32>
    %cst_40 = arith.constant dense<0.000000e+00> : vector<16xf32>
    %117 = vector.multi_reduction <add>, %116, %cst_40 [1] : vector<16x128xf32> to vector<16xf32>
    %118 = vector.shape_cast %117 : vector<16xf32> to vector<16x1xf32>
    %cst_41 = arith.constant 1.280000e+02 : f32
    %119 = vector.broadcast %cst_41 : f32 to vector<16x1xf32>
    %120 = arith.divf %118, %119 : vector<16x1xf32>
    %121 = vector.broadcast %120 : vector<16x1xf32> to vector<16x128xf32>
    %122 = arith.subf %116, %121 : vector<16x128xf32>
    %123 = arith.mulf %122, %122 : vector<16x128xf32>
    %cst_42 = arith.constant dense<0.000000e+00> : vector<16xf32>
    %124 = vector.multi_reduction <add>, %123, %cst_42 [1] : vector<16x128xf32> to vector<16xf32>
    %125 = vector.shape_cast %124 : vector<16xf32> to vector<16x1xf32>
    %cst_43 = arith.constant 1.280000e+02 : f32
    %126 = vector.broadcast %cst_43 : f32 to vector<16x1xf32>
    %127 = arith.divf %125, %126 : vector<16x1xf32>
    %128 = vector.broadcast %120 : vector<16x1xf32> to vector<16x128xf32>
    %129 = arith.subf %116, %128 : vector<16x128xf32>
    %cst_44 = arith.constant 9.99999974E-6 : f32
    %130 = vector.broadcast %cst_44 : f32 to vector<16x1xf32>
    %131 = arith.addf %127, %130 : vector<16x1xf32>
    %132 = math.rsqrt %131 : vector<16x1xf32>
    %133 = vector.broadcast %132 : vector<16x1xf32> to vector<16x128xf32>
    %134 = arith.mulf %129, %133 : vector<16x128xf32>
    %c0_45 = arith.constant 0 : index
    %c0_46 = arith.constant 0 : index
    %135 = vector.load %arg7[%c0_45, %c0_46] : memref<1x128xf32, #tpu.memory_space<vmem>>, vector<1x128xf32>
    %136 = vector.broadcast %135 : vector<1x128xf32> to vector<16x128xf32>
    %137 = arith.mulf %134, %136 : vector<16x128xf32>
    %c0_47 = arith.constant 0 : index
    %c0_48 = arith.constant 0 : index
    %138 = vector.load %arg8[%c0_47, %c0_48] : memref<1x128xf32, #tpu.memory_space<vmem>>, vector<1x128xf32>
    %139 = vector.broadcast %138 : vector<1x128xf32> to vector<16x128xf32>
    %140 = arith.addf %137, %139 : vector<16x128xf32>
    %141 = arith.truncf %140 : vector<16x128xf32> to vector<16x128xbf16>
    %c0_49 = arith.constant 0 : index
    %c0_50 = arith.constant 0 : index
    %c0_51 = arith.constant 0 : index
    %142 = vector.load %arg9[%c0_49, %c0_50, %c0_51] : memref<1x16x128xbf16, #tpu.memory_space<vmem>>, vector<1x16x128xbf16>
    %143 = vector.shape_cast %142 : vector<1x16x128xbf16> to vector<16x128xbf16>
    %144 = vector.shape_cast %141 : vector<16x128xbf16> to vector<1x16x128xbf16>
    tpu.vector_store %arg9[%c0_49, %c0_50, %c0_51], %144 {strides = array<i32>} : memref<1x16x128xbf16, #tpu.memory_space<vmem>>, vector<1x16x128xbf16>,
    return
  }
  func.func @transform_0(%arg0: i32) -> (i32, i32, i32) {
    %c0_i32 = arith.constant 0 : i32
    %c0_i32_0 = arith.constant 0 : i32
    %c0_i32_1 = arith.constant 0 : i32
    return %arg0, %c0_i32, %c0_i32_0 : i32, i32, i32
  }
  func.func @transform_1(%arg0: i32) -> (i32, i32, i32) {
    %c0_i32 = arith.constant 0 : i32
    %c0_i32_0 = arith.constant 0 : i32
    %c0_i32_1 = arith.constant 0 : i32
    return %arg0, %c0_i32, %c0_i32_0 : i32, i32, i32
  }
  func.func @transform_2(%arg0: i32) -> (i32, i32) {
    %c0_i32 = arith.constant 0 : i32
    %c0_i32_0 = arith.constant 0 : i32
    %c0_i32_1 = arith.constant 0 : i32
    return %c0_i32, %c0_i32_0 : i32, i32
  }
  func.func @transform_3(%arg0: i32) -> (i32, i32) {
    %c0_i32 = arith.constant 0 : i32
    %c0_i32_0 = arith.constant 0 : i32
    %c0_i32_1 = arith.constant 0 : i32
    return %c0_i32, %c0_i32_0 : i32, i32
  }
  func.func @transform_4(%arg0: i32) -> (i32, i32) {
    %c0_i32 = arith.constant 0 : i32
    %c0_i32_0 = arith.constant 0 : i32
    %c0_i32_1 = arith.constant 0 : i32
    return %c0_i32, %c0_i32_0 : i32, i32
  }
  func.func @transform_5(%arg0: i32) -> (i32, i32) {
    %c0_i32 = arith.constant 0 : i32
    %c0_i32_0 = arith.constant 0 : i32
    %c0_i32_1 = arith.constant 0 : i32
    return %c0_i32, %c0_i32_0 : i32, i32
  }
  func.func @transform_6(%arg0: i32) -> (i32, i32) {
    %c0_i32 = arith.constant 0 : i32
    %c0_i32_0 = arith.constant 0 : i32
    %c0_i32_1 = arith.constant 0 : i32
    return %c0_i32, %c0_i32_0 : i32, i32
  }
  func.func @transform_7(%arg0: i32) -> (i32, i32) {
    %c0_i32 = arith.constant 0 : i32
    %c0_i32_0 = arith.constant 0 : i32
    %c0_i32_1 = arith.constant 0 : i32
    return %c0_i32, %c0_i32_0 : i32, i32
  }
  func.func @transform_8(%arg0: i32) -> (i32, i32, i32) {
    %c0_i32 = arith.constant 0 : i32
    %c0_i32_0 = arith.constant 0 : i32
    %c0_i32_1 = arith.constant 0 : i32
    return %arg0, %c0_i32, %c0_i32_0 : i32, i32, i32
  }
}

module attributes {stable_mosaic.version = 11 : i64} {
  func.func @_ffn_block_kernel(%arg0: i32, %arg1: memref<16x128xbf16, #tpu.memory_space<vmem>>, %arg2: memref<128x256xbf16, #tpu.memory_space<vmem>>, %arg3: memref<1x256xf32, #tpu.memory_space<vmem>>, %arg4: memref<256x128xbf16, #tpu.memory_space<vmem>>, %arg5: memref<1x128xf32, #tpu.memory_space<vmem>>, %arg6: memref<1x128xf32, #tpu.memory_space<vmem>>, %arg7: memref<1x128xf32, #tpu.memory_space<vmem>>, %arg8: memref<16x128xbf16, #tpu.memory_space<vmem>>) attributes {dimension_semantics = [#tpu.dimension_semantics<parallel>], iteration_bounds = array<i64: 2>, scalar_prefetch = 0 : i64, scratch_operands = 0 : i64, tpu.core_type = #tpu.core_type<tc>, window_params = [{transform_indices = @transform_0, window_bounds = array<i64: 16, 128>}, {pipeline_mode = #tpu.pipeline_mode<synchronous>, transform_indices = @transform_1, window_bounds = array<i64: 128, 256>}, {pipeline_mode = #tpu.pipeline_mode<synchronous>, transform_indices = @transform_2, window_bounds = array<i64: 1, 256>}, {pipeline_mode = #tpu.pipeline_mode<synchronous>, transform_indices = @transform_3, window_bounds = array<i64: 256, 128>}, {pipeline_mode = #tpu.pipeline_mode<synchronous>, transform_indices = @transform_4, window_bounds = array<i64: 1, 128>}, {pipeline_mode = #tpu.pipeline_mode<synchronous>, transform_indices = @transform_5, window_bounds = array<i64: 1, 128>}, {pipeline_mode = #tpu.pipeline_mode<synchronous>, transform_indices = @transform_6, window_bounds = array<i64: 1, 128>}, {transform_indices = @transform_7, window_bounds = array<i64: 16, 128>}]} {
    %c0 = arith.constant 0 : index
    %c0_0 = arith.constant 0 : index
    %0 = vector.load %arg1[%c0, %c0_0] : memref<16x128xbf16, #tpu.memory_space<vmem>>, vector<16x128xbf16>
    %c0_1 = arith.constant 0 : index
    %c0_2 = arith.constant 0 : index
    %1 = vector.load %arg2[%c0_1, %c0_2] : memref<128x256xbf16, #tpu.memory_space<vmem>>, vector<128x256xbf16>
    %cst = arith.constant dense<0.000000e+00> : vector<16x256xf32>
    %2 = tpu.matmul %0, %1, %cst {dimension_numbers = #tpu.dot_dimension_numbers<[1], [0], [0], [1], [0, 0, 1, 1], [], []>} : vector<16x128xbf16>, vector<128x256xbf16>, vector<16x256xf32> -> vector<16x256xf32>
    %c0_3 = arith.constant 0 : index
    %c0_4 = arith.constant 0 : index
    %3 = vector.load %arg3[%c0_3, %c0_4] : memref<1x256xf32, #tpu.memory_space<vmem>>, vector<1x256xf32>
    %4 = vector.broadcast %3 : vector<1x256xf32> to vector<16x256xf32>
    %5 = arith.addf %2, %4 : vector<16x256xf32>
    %cst_5 = arith.constant 0.000000e+00 : f32
    %6 = vector.broadcast %cst_5 : f32 to vector<16x256xf32>
    %7 = arith.maximumf %5, %6 : vector<16x256xf32>
    %8 = arith.truncf %7 : vector<16x256xf32> to vector<16x256xbf16>
    %c0_6 = arith.constant 0 : index
    %c0_7 = arith.constant 0 : index
    %9 = vector.load %arg4[%c0_6, %c0_7] : memref<256x128xbf16, #tpu.memory_space<vmem>>, vector<256x128xbf16>
    %cst_8 = arith.constant dense<0.000000e+00> : vector<16x128xf32>
    %10 = tpu.matmul %8, %9, %cst_8 {dimension_numbers = #tpu.dot_dimension_numbers<[1], [0], [0], [1], [0, 0, 1, 1], [], []>} : vector<16x256xbf16>, vector<256x128xbf16>, vector<16x128xf32> -> vector<16x128xf32>
    %c0_9 = arith.constant 0 : index
    %c0_10 = arith.constant 0 : index
    %11 = vector.load %arg5[%c0_9, %c0_10] : memref<1x128xf32, #tpu.memory_space<vmem>>, vector<1x128xf32>
    %12 = vector.broadcast %11 : vector<1x128xf32> to vector<16x128xf32>
    %13 = arith.addf %10, %12 : vector<16x128xf32>
    %14 = arith.extf %0 : vector<16x128xbf16> to vector<16x128xf32>
    %15 = arith.addf %13, %14 : vector<16x128xf32>
    %cst_11 = arith.constant dense<0.000000e+00> : vector<16xf32>
    %16 = vector.multi_reduction <add>, %15, %cst_11 [1] : vector<16x128xf32> to vector<16xf32>
    %17 = vector.shape_cast %16 : vector<16xf32> to vector<16x1xf32>
    %cst_12 = arith.constant 1.280000e+02 : f32
    %18 = vector.broadcast %cst_12 : f32 to vector<16x1xf32>
    %19 = arith.divf %17, %18 : vector<16x1xf32>
    %20 = vector.broadcast %19 : vector<16x1xf32> to vector<16x128xf32>
    %21 = arith.subf %15, %20 : vector<16x128xf32>
    %22 = arith.mulf %21, %21 : vector<16x128xf32>
    %cst_13 = arith.constant dense<0.000000e+00> : vector<16xf32>
    %23 = vector.multi_reduction <add>, %22, %cst_13 [1] : vector<16x128xf32> to vector<16xf32>
    %24 = vector.shape_cast %23 : vector<16xf32> to vector<16x1xf32>
    %cst_14 = arith.constant 1.280000e+02 : f32
    %25 = vector.broadcast %cst_14 : f32 to vector<16x1xf32>
    %26 = arith.divf %24, %25 : vector<16x1xf32>
    %27 = vector.broadcast %19 : vector<16x1xf32> to vector<16x128xf32>
    %28 = arith.subf %15, %27 : vector<16x128xf32>
    %cst_15 = arith.constant 9.99999974E-6 : f32
    %29 = vector.broadcast %cst_15 : f32 to vector<16x1xf32>
    %30 = arith.addf %26, %29 : vector<16x1xf32>
    %31 = math.rsqrt %30 : vector<16x1xf32>
    %32 = vector.broadcast %31 : vector<16x1xf32> to vector<16x128xf32>
    %33 = arith.mulf %28, %32 : vector<16x128xf32>
    %c0_16 = arith.constant 0 : index
    %c0_17 = arith.constant 0 : index
    %34 = vector.load %arg6[%c0_16, %c0_17] : memref<1x128xf32, #tpu.memory_space<vmem>>, vector<1x128xf32>
    %35 = vector.broadcast %34 : vector<1x128xf32> to vector<16x128xf32>
    %36 = arith.mulf %33, %35 : vector<16x128xf32>
    %c0_18 = arith.constant 0 : index
    %c0_19 = arith.constant 0 : index
    %37 = vector.load %arg7[%c0_18, %c0_19] : memref<1x128xf32, #tpu.memory_space<vmem>>, vector<1x128xf32>
    %38 = vector.broadcast %37 : vector<1x128xf32> to vector<16x128xf32>
    %39 = arith.addf %36, %38 : vector<16x128xf32>
    %40 = arith.truncf %39 : vector<16x128xf32> to vector<16x128xbf16>
    %c0_20 = arith.constant 0 : index
    %c0_21 = arith.constant 0 : index
    %41 = vector.load %arg8[%c0_20, %c0_21] : memref<16x128xbf16, #tpu.memory_space<vmem>>, vector<16x128xbf16>
    tpu.vector_store %arg8[%c0_20, %c0_21], %40 {strides = array<i32>} : memref<16x128xbf16, #tpu.memory_space<vmem>>, vector<16x128xbf16>,
    return
  }
  func.func @transform_0(%arg0: i32) -> (i32, i32) {
    %c0_i32 = arith.constant 0 : i32
    %c0_i32_0 = arith.constant 0 : i32
    return %arg0, %c0_i32 : i32, i32
  }
  func.func @transform_1(%arg0: i32) -> (i32, i32) {
    %c0_i32 = arith.constant 0 : i32
    %c0_i32_0 = arith.constant 0 : i32
    %c0_i32_1 = arith.constant 0 : i32
    return %c0_i32, %c0_i32_0 : i32, i32
  }
  func.func @transform_2(%arg0: i32) -> (i32, i32) {
    %c0_i32 = arith.constant 0 : i32
    %c0_i32_0 = arith.constant 0 : i32
    %c0_i32_1 = arith.constant 0 : i32
    return %c0_i32, %c0_i32_0 : i32, i32
  }
  func.func @transform_3(%arg0: i32) -> (i32, i32) {
    %c0_i32 = arith.constant 0 : i32
    %c0_i32_0 = arith.constant 0 : i32
    %c0_i32_1 = arith.constant 0 : i32
    return %c0_i32, %c0_i32_0 : i32, i32
  }
  func.func @transform_4(%arg0: i32) -> (i32, i32) {
    %c0_i32 = arith.constant 0 : i32
    %c0_i32_0 = arith.constant 0 : i32
    %c0_i32_1 = arith.constant 0 : i32
    return %c0_i32, %c0_i32_0 : i32, i32
  }
  func.func @transform_5(%arg0: i32) -> (i32, i32) {
    %c0_i32 = arith.constant 0 : i32
    %c0_i32_0 = arith.constant 0 : i32
    %c0_i32_1 = arith.constant 0 : i32
    return %c0_i32, %c0_i32_0 : i32, i32
  }
  func.func @transform_6(%arg0: i32) -> (i32, i32) {
    %c0_i32 = arith.constant 0 : i32
    %c0_i32_0 = arith.constant 0 : i32
    %c0_i32_1 = arith.constant 0 : i32
    return %c0_i32, %c0_i32_0 : i32, i32
  }
  func.func @transform_7(%arg0: i32) -> (i32, i32) {
    %c0_i32 = arith.constant 0 : i32
    %c0_i32_0 = arith.constant 0 : i32
    return %arg0, %c0_i32 : i32, i32
  }
}

module attributes {stable_mosaic.version = 11 : i64} {
  func.func @_cross_attn_block_kernel(%arg0: i32, %arg1: memref<1x16x128xbf16, #tpu.memory_space<vmem>>, %arg2: memref<1x16x128xbf16, #tpu.memory_space<vmem>>, %arg3: memref<128x128xbf16, #tpu.memory_space<vmem>>, %arg4: memref<1x128xf32, #tpu.memory_space<vmem>>, %arg5: memref<128x256xbf16, #tpu.memory_space<vmem>>, %arg6: memref<1x256xf32, #tpu.memory_space<vmem>>, %arg7: memref<128x128xbf16, #tpu.memory_space<vmem>>, %arg8: memref<1x128xf32, #tpu.memory_space<vmem>>, %arg9: memref<1x128xf32, #tpu.memory_space<vmem>>, %arg10: memref<1x128xf32, #tpu.memory_space<vmem>>, %arg11: memref<1x16x128xbf16, #tpu.memory_space<vmem>>) attributes {dimension_semantics = [#tpu.dimension_semantics<parallel>], iteration_bounds = array<i64: 2>, scalar_prefetch = 0 : i64, scratch_operands = 0 : i64, tpu.core_type = #tpu.core_type<tc>, window_params = [{transform_indices = @transform_0, window_bounds = array<i64: 1, 16, 128>}, {transform_indices = @transform_1, window_bounds = array<i64: 1, 16, 128>}, {pipeline_mode = #tpu.pipeline_mode<synchronous>, transform_indices = @transform_2, window_bounds = array<i64: 128, 128>}, {pipeline_mode = #tpu.pipeline_mode<synchronous>, transform_indices = @transform_3, window_bounds = array<i64: 1, 128>}, {pipeline_mode = #tpu.pipeline_mode<synchronous>, transform_indices = @transform_4, window_bounds = array<i64: 128, 256>}, {pipeline_mode = #tpu.pipeline_mode<synchronous>, transform_indices = @transform_5, window_bounds = array<i64: 1, 256>}, {pipeline_mode = #tpu.pipeline_mode<synchronous>, transform_indices = @transform_6, window_bounds = array<i64: 128, 128>}, {pipeline_mode = #tpu.pipeline_mode<synchronous>, transform_indices = @transform_7, window_bounds = array<i64: 1, 128>}, {pipeline_mode = #tpu.pipeline_mode<synchronous>, transform_indices = @transform_8, window_bounds = array<i64: 1, 128>}, {pipeline_mode = #tpu.pipeline_mode<synchronous>, transform_indices = @transform_9, window_bounds = array<i64: 1, 128>}, {transform_indices = @transform_10, window_bounds = array<i64: 1, 16, 128>}]} {
    %c0 = arith.constant 0 : index
    %c0_0 = arith.constant 0 : index
    %c0_1 = arith.constant 0 : index
    %0 = vector.load %arg1[%c0, %c0_0, %c0_1] : memref<1x16x128xbf16, #tpu.memory_space<vmem>>, vector<1x16x128xbf16>
    %1 = vector.shape_cast %0 : vector<1x16x128xbf16> to vector<16x128xbf16>
    %c0_2 = arith.constant 0 : index
    %c0_3 = arith.constant 0 : index
    %c0_4 = arith.constant 0 : index
    %2 = vector.load %arg2[%c0_2, %c0_3, %c0_4] : memref<1x16x128xbf16, #tpu.memory_space<vmem>>, vector<1x16x128xbf16>
    %3 = vector.shape_cast %2 : vector<1x16x128xbf16> to vector<16x128xbf16>
    %c0_5 = arith.constant 0 : index
    %c0_6 = arith.constant 0 : index
    %4 = vector.load %arg3[%c0_5, %c0_6] : memref<128x128xbf16, #tpu.memory_space<vmem>>, vector<128x128xbf16>
    %cst = arith.constant dense<0.000000e+00> : vector<16x128xf32>
    %5 = tpu.matmul %1, %4, %cst {dimension_numbers = #tpu.dot_dimension_numbers<[1], [0], [0], [1], [0, 0, 1, 1], [], []>} : vector<16x128xbf16>, vector<128x128xbf16>, vector<16x128xf32> -> vector<16x128xf32>
    %c0_7 = arith.constant 0 : index
    %c0_8 = arith.constant 0 : index
    %6 = vector.load %arg4[%c0_7, %c0_8] : memref<1x128xf32, #tpu.memory_space<vmem>>, vector<1x128xf32>
    %7 = vector.broadcast %6 : vector<1x128xf32> to vector<16x128xf32>
    %8 = arith.addf %5, %7 : vector<16x128xf32>
    %9 = arith.truncf %8 : vector<16x128xf32> to vector<16x128xbf16>
    %c0_9 = arith.constant 0 : index
    %c0_10 = arith.constant 0 : index
    %10 = vector.load %arg5[%c0_9, %c0_10] : memref<128x256xbf16, #tpu.memory_space<vmem>>, vector<128x256xbf16>
    %cst_11 = arith.constant dense<0.000000e+00> : vector<16x256xf32>
    %11 = tpu.matmul %3, %10, %cst_11 {dimension_numbers = #tpu.dot_dimension_numbers<[1], [0], [0], [1], [0, 0, 1, 1], [], []>} : vector<16x128xbf16>, vector<128x256xbf16>, vector<16x256xf32> -> vector<16x256xf32>
    %c0_12 = arith.constant 0 : index
    %c0_13 = arith.constant 0 : index
    %12 = vector.load %arg6[%c0_12, %c0_13] : memref<1x256xf32, #tpu.memory_space<vmem>>, vector<1x256xf32>
    %13 = vector.broadcast %12 : vector<1x256xf32> to vector<16x256xf32>
    %14 = arith.addf %11, %13 : vector<16x256xf32>
    %15 = arith.truncf %14 : vector<16x256xf32> to vector<16x256xbf16>
    %c0_14 = arith.constant 0 : index
    %c0_15 = arith.constant 0 : index
    %16 = vector.load %arg7[%c0_14, %c0_15] : memref<128x128xbf16, #tpu.memory_space<vmem>>, vector<128x128xbf16>
    %cst_16 = arith.constant 0.000000e+00 : f32
    %17 = vector.broadcast %cst_16 : f32 to vector<16x128xf32>
    %18 = vector.extract_strided_slice %9 {offsets = [0, 0], sizes = [16, 32], strides = [1, 1]} : vector<16x128xbf16> to vector<16x32xbf16>
    %19 = vector.extract_strided_slice %15 {offsets = [0, 0], sizes = [16, 32], strides = [1, 1]} : vector<16x256xbf16> to vector<16x32xbf16>
    %20 = vector.extract_strided_slice %15 {offsets = [0, 128], sizes = [16, 32], strides = [1, 1]} : vector<16x256xbf16> to vector<16x32xbf16>
    %cst_17 = arith.constant dense<0.000000e+00> : vector<16x16xf32>
    %21 = tpu.matmul %18, %19, %cst_17 {dimension_numbers = #tpu.dot_dimension_numbers<[1], [1], [0], [0], [0, 0, 1, 0], [], []>} : vector<16x32xbf16>, vector<16x32xbf16>, vector<16x16xf32> -> vector<16x16xf32>
    %cst_18 = arith.constant 0.176776692 : f32
    %22 = vector.broadcast %cst_18 : f32 to vector<16x16xf32>
    %23 = arith.mulf %21, %22 : vector<16x16xf32>
    %cst_19 = arith.constant dense<0xFF800000> : vector<16xf32>
    %24 = vector.multi_reduction <maximumf>, %23, %cst_19 [1] : vector<16x16xf32> to vector<16xf32>
    %25 = vector.shape_cast %24 : vector<16xf32> to vector<16x1xf32>
    %26 = vector.broadcast %25 : vector<16x1xf32> to vector<16x16xf32>
    %27 = arith.subf %23, %26 : vector<16x16xf32>
    %28 = math.exp %27 : vector<16x16xf32>
    %cst_20 = arith.constant dense<0.000000e+00> : vector<16xf32>
    %29 = vector.multi_reduction <add>, %28, %cst_20 [1] : vector<16x16xf32> to vector<16xf32>
    %30 = vector.shape_cast %29 : vector<16xf32> to vector<16x1xf32>
    %31 = tpu.reciprocal %30 {approx = true} : vector<16x1xf32> -> vector<16x1xf32>
    %32 = vector.broadcast %31 : vector<16x1xf32> to vector<16x16xf32>
    %33 = arith.mulf %28, %32 : vector<16x16xf32>
    %34 = arith.truncf %33 : vector<16x16xf32> to vector<16x16xbf16>
    %cst_21 = arith.constant dense<0.000000e+00> : vector<16x32xf32>
    %35 = tpu.matmul %34, %20, %cst_21 {dimension_numbers = #tpu.dot_dimension_numbers<[1], [0], [0], [1], [0, 0, 1, 1], [], []>} : vector<16x16xbf16>, vector<16x32xbf16>, vector<16x32xf32> -> vector<16x32xf32>
    %36 = arith.truncf %35 : vector<16x32xf32> to vector<16x32xbf16>
    %37 = vector.extract_strided_slice %16 {offsets = [0, 0], sizes = [32, 128], strides = [1, 1]} : vector<128x128xbf16> to vector<32x128xbf16>
    %cst_22 = arith.constant dense<0.000000e+00> : vector<16x128xf32>
    %38 = tpu.matmul %36, %37, %cst_22 {dimension_numbers = #tpu.dot_dimension_numbers<[1], [0], [0], [1], [0, 0, 1, 1], [], []>} : vector<16x32xbf16>, vector<32x128xbf16>, vector<16x128xf32> -> vector<16x128xf32>
    %39 = arith.addf %17, %38 : vector<16x128xf32>
    %40 = vector.extract_strided_slice %9 {offsets = [0, 32], sizes = [16, 32], strides = [1, 1]} : vector<16x128xbf16> to vector<16x32xbf16>
    %41 = vector.extract_strided_slice %15 {offsets = [0, 32], sizes = [16, 32], strides = [1, 1]} : vector<16x256xbf16> to vector<16x32xbf16>
    %42 = vector.extract_strided_slice %15 {offsets = [0, 160], sizes = [16, 32], strides = [1, 1]} : vector<16x256xbf16> to vector<16x32xbf16>
    %cst_23 = arith.constant dense<0.000000e+00> : vector<16x16xf32>
    %43 = tpu.matmul %40, %41, %cst_23 {dimension_numbers = #tpu.dot_dimension_numbers<[1], [1], [0], [0], [0, 0, 1, 0], [], []>} : vector<16x32xbf16>, vector<16x32xbf16>, vector<16x16xf32> -> vector<16x16xf32>
    %cst_24 = arith.constant 0.176776692 : f32
    %44 = vector.broadcast %cst_24 : f32 to vector<16x16xf32>
    %45 = arith.mulf %43, %44 : vector<16x16xf32>
    %cst_25 = arith.constant dense<0xFF800000> : vector<16xf32>
    %46 = vector.multi_reduction <maximumf>, %45, %cst_25 [1] : vector<16x16xf32> to vector<16xf32>
    %47 = vector.shape_cast %46 : vector<16xf32> to vector<16x1xf32>
    %48 = vector.broadcast %47 : vector<16x1xf32> to vector<16x16xf32>
    %49 = arith.subf %45, %48 : vector<16x16xf32>
    %50 = math.exp %49 : vector<16x16xf32>
    %cst_26 = arith.constant dense<0.000000e+00> : vector<16xf32>
    %51 = vector.multi_reduction <add>, %50, %cst_26 [1] : vector<16x16xf32> to vector<16xf32>
    %52 = vector.shape_cast %51 : vector<16xf32> to vector<16x1xf32>
    %53 = tpu.reciprocal %52 {approx = true} : vector<16x1xf32> -> vector<16x1xf32>
    %54 = vector.broadcast %53 : vector<16x1xf32> to vector<16x16xf32>
    %55 = arith.mulf %50, %54 : vector<16x16xf32>
    %56 = arith.truncf %55 : vector<16x16xf32> to vector<16x16xbf16>
    %cst_27 = arith.constant dense<0.000000e+00> : vector<16x32xf32>
    %57 = tpu.matmul %56, %42, %cst_27 {dimension_numbers = #tpu.dot_dimension_numbers<[1], [0], [0], [1], [0, 0, 1, 1], [], []>} : vector<16x16xbf16>, vector<16x32xbf16>, vector<16x32xf32> -> vector<16x32xf32>
    %58 = arith.truncf %57 : vector<16x32xf32> to vector<16x32xbf16>
    %59 = vector.extract_strided_slice %16 {offsets = [32, 0], sizes = [32, 128], strides = [1, 1]} : vector<128x128xbf16> to vector<32x128xbf16>
    %cst_28 = arith.constant dense<0.000000e+00> : vector<16x128xf32>
    %60 = tpu.matmul %58, %59, %cst_28 {dimension_numbers = #tpu.dot_dimension_numbers<[1], [0], [0], [1], [0, 0, 1, 1], [], []>} : vector<16x32xbf16>, vector<32x128xbf16>, vector<16x128xf32> -> vector<16x128xf32>
    %61 = arith.addf %39, %60 : vector<16x128xf32>
    %62 = vector.extract_strided_slice %9 {offsets = [0, 64], sizes = [16, 32], strides = [1, 1]} : vector<16x128xbf16> to vector<16x32xbf16>
    %63 = vector.extract_strided_slice %15 {offsets = [0, 64], sizes = [16, 32], strides = [1, 1]} : vector<16x256xbf16> to vector<16x32xbf16>
    %64 = vector.extract_strided_slice %15 {offsets = [0, 192], sizes = [16, 32], strides = [1, 1]} : vector<16x256xbf16> to vector<16x32xbf16>
    %cst_29 = arith.constant dense<0.000000e+00> : vector<16x16xf32>
    %65 = tpu.matmul %62, %63, %cst_29 {dimension_numbers = #tpu.dot_dimension_numbers<[1], [1], [0], [0], [0, 0, 1, 0], [], []>} : vector<16x32xbf16>, vector<16x32xbf16>, vector<16x16xf32> -> vector<16x16xf32>
    %cst_30 = arith.constant 0.176776692 : f32
    %66 = vector.broadcast %cst_30 : f32 to vector<16x16xf32>
    %67 = arith.mulf %65, %66 : vector<16x16xf32>
    %cst_31 = arith.constant dense<0xFF800000> : vector<16xf32>
    %68 = vector.multi_reduction <maximumf>, %67, %cst_31 [1] : vector<16x16xf32> to vector<16xf32>
    %69 = vector.shape_cast %68 : vector<16xf32> to vector<16x1xf32>
    %70 = vector.broadcast %69 : vector<16x1xf32> to vector<16x16xf32>
    %71 = arith.subf %67, %70 : vector<16x16xf32>
    %72 = math.exp %71 : vector<16x16xf32>
    %cst_32 = arith.constant dense<0.000000e+00> : vector<16xf32>
    %73 = vector.multi_reduction <add>, %72, %cst_32 [1] : vector<16x16xf32> to vector<16xf32>
    %74 = vector.shape_cast %73 : vector<16xf32> to vector<16x1xf32>
    %75 = tpu.reciprocal %74 {approx = true} : vector<16x1xf32> -> vector<16x1xf32>
    %76 = vector.broadcast %75 : vector<16x1xf32> to vector<16x16xf32>
    %77 = arith.mulf %72, %76 : vector<16x16xf32>
    %78 = arith.truncf %77 : vector<16x16xf32> to vector<16x16xbf16>
    %cst_33 = arith.constant dense<0.000000e+00> : vector<16x32xf32>
    %79 = tpu.matmul %78, %64, %cst_33 {dimension_numbers = #tpu.dot_dimension_numbers<[1], [0], [0], [1], [0, 0, 1, 1], [], []>} : vector<16x16xbf16>, vector<16x32xbf16>, vector<16x32xf32> -> vector<16x32xf32>
    %80 = arith.truncf %79 : vector<16x32xf32> to vector<16x32xbf16>
    %81 = vector.extract_strided_slice %16 {offsets = [64, 0], sizes = [32, 128], strides = [1, 1]} : vector<128x128xbf16> to vector<32x128xbf16>
    %cst_34 = arith.constant dense<0.000000e+00> : vector<16x128xf32>
    %82 = tpu.matmul %80, %81, %cst_34 {dimension_numbers = #tpu.dot_dimension_numbers<[1], [0], [0], [1], [0, 0, 1, 1], [], []>} : vector<16x32xbf16>, vector<32x128xbf16>, vector<16x128xf32> -> vector<16x128xf32>
    %83 = arith.addf %61, %82 : vector<16x128xf32>
    %84 = vector.extract_strided_slice %9 {offsets = [0, 96], sizes = [16, 32], strides = [1, 1]} : vector<16x128xbf16> to vector<16x32xbf16>
    %85 = vector.extract_strided_slice %15 {offsets = [0, 96], sizes = [16, 32], strides = [1, 1]} : vector<16x256xbf16> to vector<16x32xbf16>
    %86 = vector.extract_strided_slice %15 {offsets = [0, 224], sizes = [16, 32], strides = [1, 1]} : vector<16x256xbf16> to vector<16x32xbf16>
    %cst_35 = arith.constant dense<0.000000e+00> : vector<16x16xf32>
    %87 = tpu.matmul %84, %85, %cst_35 {dimension_numbers = #tpu.dot_dimension_numbers<[1], [1], [0], [0], [0, 0, 1, 0], [], []>} : vector<16x32xbf16>, vector<16x32xbf16>, vector<16x16xf32> -> vector<16x16xf32>
    %cst_36 = arith.constant 0.176776692 : f32
    %88 = vector.broadcast %cst_36 : f32 to vector<16x16xf32>
    %89 = arith.mulf %87, %88 : vector<16x16xf32>
    %cst_37 = arith.constant dense<0xFF800000> : vector<16xf32>
    %90 = vector.multi_reduction <maximumf>, %89, %cst_37 [1] : vector<16x16xf32> to vector<16xf32>
    %91 = vector.shape_cast %90 : vector<16xf32> to vector<16x1xf32>
    %92 = vector.broadcast %91 : vector<16x1xf32> to vector<16x16xf32>
    %93 = arith.subf %89, %92 : vector<16x16xf32>
    %94 = math.exp %93 : vector<16x16xf32>
    %cst_38 = arith.constant dense<0.000000e+00> : vector<16xf32>
    %95 = vector.multi_reduction <add>, %94, %cst_38 [1] : vector<16x16xf32> to vector<16xf32>
    %96 = vector.shape_cast %95 : vector<16xf32> to vector<16x1xf32>
    %97 = tpu.reciprocal %96 {approx = true} : vector<16x1xf32> -> vector<16x1xf32>
    %98 = vector.broadcast %97 : vector<16x1xf32> to vector<16x16xf32>
    %99 = arith.mulf %94, %98 : vector<16x16xf32>
    %100 = arith.truncf %99 : vector<16x16xf32> to vector<16x16xbf16>
    %cst_39 = arith.constant dense<0.000000e+00> : vector<16x32xf32>
    %101 = tpu.matmul %100, %86, %cst_39 {dimension_numbers = #tpu.dot_dimension_numbers<[1], [0], [0], [1], [0, 0, 1, 1], [], []>} : vector<16x16xbf16>, vector<16x32xbf16>, vector<16x32xf32> -> vector<16x32xf32>
    %102 = arith.truncf %101 : vector<16x32xf32> to vector<16x32xbf16>
    %103 = vector.extract_strided_slice %16 {offsets = [96, 0], sizes = [32, 128], strides = [1, 1]} : vector<128x128xbf16> to vector<32x128xbf16>
    %cst_40 = arith.constant dense<0.000000e+00> : vector<16x128xf32>
    %104 = tpu.matmul %102, %103, %cst_40 {dimension_numbers = #tpu.dot_dimension_numbers<[1], [0], [0], [1], [0, 0, 1, 1], [], []>} : vector<16x32xbf16>, vector<32x128xbf16>, vector<16x128xf32> -> vector<16x128xf32>
    %105 = arith.addf %83, %104 : vector<16x128xf32>
    %c0_41 = arith.constant 0 : index
    %c0_42 = arith.constant 0 : index
    %106 = vector.load %arg8[%c0_41, %c0_42] : memref<1x128xf32, #tpu.memory_space<vmem>>, vector<1x128xf32>
    %107 = vector.broadcast %106 : vector<1x128xf32> to vector<16x128xf32>
    %108 = arith.addf %105, %107 : vector<16x128xf32>
    %109 = arith.extf %1 : vector<16x128xbf16> to vector<16x128xf32>
    %110 = arith.addf %108, %109 : vector<16x128xf32>
    %cst_43 = arith.constant dense<0.000000e+00> : vector<16xf32>
    %111 = vector.multi_reduction <add>, %110, %cst_43 [1] : vector<16x128xf32> to vector<16xf32>
    %112 = vector.shape_cast %111 : vector<16xf32> to vector<16x1xf32>
    %cst_44 = arith.constant 1.280000e+02 : f32
    %113 = vector.broadcast %cst_44 : f32 to vector<16x1xf32>
    %114 = arith.divf %112, %113 : vector<16x1xf32>
    %115 = vector.broadcast %114 : vector<16x1xf32> to vector<16x128xf32>
    %116 = arith.subf %110, %115 : vector<16x128xf32>
    %117 = arith.mulf %116, %116 : vector<16x128xf32>
    %cst_45 = arith.constant dense<0.000000e+00> : vector<16xf32>
    %118 = vector.multi_reduction <add>, %117, %cst_45 [1] : vector<16x128xf32> to vector<16xf32>
    %119 = vector.shape_cast %118 : vector<16xf32> to vector<16x1xf32>
    %cst_46 = arith.constant 1.280000e+02 : f32
    %120 = vector.broadcast %cst_46 : f32 to vector<16x1xf32>
    %121 = arith.divf %119, %120 : vector<16x1xf32>
    %122 = vector.broadcast %114 : vector<16x1xf32> to vector<16x128xf32>
    %123 = arith.subf %110, %122 : vector<16x128xf32>
    %cst_47 = arith.constant 9.99999974E-6 : f32
    %124 = vector.broadcast %cst_47 : f32 to vector<16x1xf32>
    %125 = arith.addf %121, %124 : vector<16x1xf32>
    %126 = math.rsqrt %125 : vector<16x1xf32>
    %127 = vector.broadcast %126 : vector<16x1xf32> to vector<16x128xf32>
    %128 = arith.mulf %123, %127 : vector<16x128xf32>
    %c0_48 = arith.constant 0 : index
    %c0_49 = arith.constant 0 : index
    %129 = vector.load %arg9[%c0_48, %c0_49] : memref<1x128xf32, #tpu.memory_space<vmem>>, vector<1x128xf32>
    %130 = vector.broadcast %129 : vector<1x128xf32> to vector<16x128xf32>
    %131 = arith.mulf %128, %130 : vector<16x128xf32>
    %c0_50 = arith.constant 0 : index
    %c0_51 = arith.constant 0 : index
    %132 = vector.load %arg10[%c0_50, %c0_51] : memref<1x128xf32, #tpu.memory_space<vmem>>, vector<1x128xf32>
    %133 = vector.broadcast %132 : vector<1x128xf32> to vector<16x128xf32>
    %134 = arith.addf %131, %133 : vector<16x128xf32>
    %135 = arith.truncf %134 : vector<16x128xf32> to vector<16x128xbf16>
    %c0_52 = arith.constant 0 : index
    %c0_53 = arith.constant 0 : index
    %c0_54 = arith.constant 0 : index
    %136 = vector.load %arg11[%c0_52, %c0_53, %c0_54] : memref<1x16x128xbf16, #tpu.memory_space<vmem>>, vector<1x16x128xbf16>
    %137 = vector.shape_cast %136 : vector<1x16x128xbf16> to vector<16x128xbf16>
    %138 = vector.shape_cast %135 : vector<16x128xbf16> to vector<1x16x128xbf16>
    tpu.vector_store %arg11[%c0_52, %c0_53, %c0_54], %138 {strides = array<i32>} : memref<1x16x128xbf16, #tpu.memory_space<vmem>>, vector<1x16x128xbf16>,
    return
  }
  func.func @transform_0(%arg0: i32) -> (i32, i32, i32) {
    %c0_i32 = arith.constant 0 : i32
    %c0_i32_0 = arith.constant 0 : i32
    %c0_i32_1 = arith.constant 0 : i32
    return %arg0, %c0_i32, %c0_i32_0 : i32, i32, i32
  }
  func.func @transform_1(%arg0: i32) -> (i32, i32, i32) {
    %c0_i32 = arith.constant 0 : i32
    %c0_i32_0 = arith.constant 0 : i32
    %c0_i32_1 = arith.constant 0 : i32
    return %arg0, %c0_i32, %c0_i32_0 : i32, i32, i32
  }
  func.func @transform_2(%arg0: i32) -> (i32, i32) {
    %c0_i32 = arith.constant 0 : i32
    %c0_i32_0 = arith.constant 0 : i32
    %c0_i32_1 = arith.constant 0 : i32
    return %c0_i32, %c0_i32_0 : i32, i32
  }
  func.func @transform_3(%arg0: i32) -> (i32, i32) {
    %c0_i32 = arith.constant 0 : i32
    %c0_i32_0 = arith.constant 0 : i32
    %c0_i32_1 = arith.constant 0 : i32
    return %c0_i32, %c0_i32_0 : i32, i32
  }
  func.func @transform_4(%arg0: i32) -> (i32, i32) {
    %c0_i32 = arith.constant 0 : i32
    %c0_i32_0 = arith.constant 0 : i32
    %c0_i32_1 = arith.constant 0 : i32
    return %c0_i32, %c0_i32_0 : i32, i32
  }
  func.func @transform_5(%arg0: i32) -> (i32, i32) {
    %c0_i32 = arith.constant 0 : i32
    %c0_i32_0 = arith.constant 0 : i32
    %c0_i32_1 = arith.constant 0 : i32
    return %c0_i32, %c0_i32_0 : i32, i32
  }
  func.func @transform_6(%arg0: i32) -> (i32, i32) {
    %c0_i32 = arith.constant 0 : i32
    %c0_i32_0 = arith.constant 0 : i32
    %c0_i32_1 = arith.constant 0 : i32
    return %c0_i32, %c0_i32_0 : i32, i32
  }
  func.func @transform_7(%arg0: i32) -> (i32, i32) {
    %c0_i32 = arith.constant 0 : i32
    %c0_i32_0 = arith.constant 0 : i32
    %c0_i32_1 = arith.constant 0 : i32
    return %c0_i32, %c0_i32_0 : i32, i32
  }
  func.func @transform_8(%arg0: i32) -> (i32, i32) {
    %c0_i32 = arith.constant 0 : i32
    %c0_i32_0 = arith.constant 0 : i32
    %c0_i32_1 = arith.constant 0 : i32
    return %c0_i32, %c0_i32_0 : i32, i32
  }
  func.func @transform_9(%arg0: i32) -> (i32, i32) {
    %c0_i32 = arith.constant 0 : i32
    %c0_i32_0 = arith.constant 0 : i32
    %c0_i32_1 = arith.constant 0 : i32
    return %c0_i32, %c0_i32_0 : i32, i32
  }
  func.func @transform_10(%arg0: i32) -> (i32, i32, i32) {
    %c0_i32 = arith.constant 0 : i32
    %c0_i32_0 = arith.constant 0 : i32
    %c0_i32_1 = arith.constant 0 : i32
    return %arg0, %c0_i32, %c0_i32_0 : i32, i32, i32
  }
}

module attributes {stable_mosaic.version = 11 : i64} {
  func.func @_linear_kernel(%arg0: i32, %arg1: i32, %arg2: memref<16x128xbf16, #tpu.memory_space<vmem>>, %arg3: memref<128x256xbf16, #tpu.memory_space<vmem>>, %arg4: memref<1x256xf32, #tpu.memory_space<vmem>>, %arg5: memref<16x256xf32, #tpu.memory_space<vmem>>) attributes {dimension_semantics = [#tpu.dimension_semantics<parallel>, #tpu.dimension_semantics<parallel>], iteration_bounds = array<i64: 2, 1>, scalar_prefetch = 0 : i64, scratch_operands = 0 : i64, tpu.core_type = #tpu.core_type<tc>, window_params = [{transform_indices = @transform_0, window_bounds = array<i64: 16, 128>}, {transform_indices = @transform_1, window_bounds = array<i64: 128, 256>}, {transform_indices = @transform_2, window_bounds = array<i64: 1, 256>}, {transform_indices = @transform_3, window_bounds = array<i64: 16, 256>}]} {
    %c0 = arith.constant 0 : index
    %c0_0 = arith.constant 0 : index
    %0 = vector.load %arg2[%c0, %c0_0] : memref<16x128xbf16, #tpu.memory_space<vmem>>, vector<16x128xbf16>
    %c0_1 = arith.constant 0 : index
    %c0_2 = arith.constant 0 : index
    %1 = vector.load %arg3[%c0_1, %c0_2] : memref<128x256xbf16, #tpu.memory_space<vmem>>, vector<128x256xbf16>
    %cst = arith.constant dense<0.000000e+00> : vector<16x256xf32>
    %2 = tpu.matmul %0, %1, %cst {dimension_numbers = #tpu.dot_dimension_numbers<[1], [0], [0], [1], [0, 0, 1, 1], [], []>} : vector<16x128xbf16>, vector<128x256xbf16>, vector<16x256xf32> -> vector<16x256xf32>
    %c0_3 = arith.constant 0 : index
    %c0_4 = arith.constant 0 : index
    %3 = vector.load %arg4[%c0_3, %c0_4] : memref<1x256xf32, #tpu.memory_space<vmem>>, vector<1x256xf32>
    %4 = vector.broadcast %3 : vector<1x256xf32> to vector<16x256xf32>
    %5 = arith.addf %2, %4 : vector<16x256xf32>
    %c0_5 = arith.constant 0 : index
    %c0_6 = arith.constant 0 : index
    %6 = vector.load %arg5[%c0_5, %c0_6] : memref<16x256xf32, #tpu.memory_space<vmem>>, vector<16x256xf32>
    tpu.vector_store %arg5[%c0_5, %c0_6], %5 {strides = array<i32>} : memref<16x256xf32, #tpu.memory_space<vmem>>, vector<16x256xf32>,
    return
  }
  func.func @transform_0(%arg0: i32, %arg1: i32) -> (i32, i32) {
    %c0_i32 = arith.constant 0 : i32
    %c0_i32_0 = arith.constant 0 : i32
    return %arg0, %c0_i32 : i32, i32
  }
  func.func @transform_1(%arg0: i32, %arg1: i32) -> (i32, i32) {
    %c0_i32 = arith.constant 0 : i32
    %c0_i32_0 = arith.constant 0 : i32
    return %c0_i32, %arg1 : i32, i32
  }
  func.func @transform_2(%arg0: i32, %arg1: i32) -> (i32, i32) {
    %c0_i32 = arith.constant 0 : i32
    %c0_i32_0 = arith.constant 0 : i32
    return %c0_i32, %arg1 : i32, i32
  }
  func.func @transform_3(%arg0: i32, %arg1: i32) -> (i32, i32) {
    %c0_i32 = arith.constant 0 : i32
    return %arg0, %arg1 : i32, i32
  }
}

</mosaic_0001>

<bundles_post_ra>
// kernel: transformer_decoder_forward.8
= control target key start
LH: loop header
LB: loop body
LE: loop exit
PB: predicated region body
PF: predicated region fallthrough
CT: control target
= control target key end

     0   :  { %8 = vsyncpa [#allocation3], 0  ;;  %s916_s0 = inlined_call_operand.hbm [shape: f32[32,192], index: 0, kind: input, shape index: {}]   ;;  %s917_s1 = inlined_call_operand.hbm [shape: bf16[192,128], index: 1, kind: input, shape index: {}]   ;;  %s918_s2 = inlined_call_operand.vmem [shape: f32[1,128], index: 2, kind: input, shape index: {}]   ;;  %s919_s3 = inlined_call_operand.vmem [shape: bf16[32,128], index: 3, kind: output, shape index: {}]  }
   0x1   :  { %10 = vsyncpa [#allocation3 + $0x1], 0 }
   0x2   :  { %11 = vsyncpa [#allocation5], 0  ;;  %s787_s12 = smov 0   ;;  %s789_s13 = smov 0  }
   0x3   :  { %s791_s14 = smov 0   ;;  %s793_s15 = smov 0  }
   0x4   :  { %s795_s16 = smov 0   ;;  %s797_s17 = smov 0  }
   0x5 LB: > { %s525_s18 = sadd.s32 4294967295, %s758_s17   ;;  %p49_p0 = scmp.ne.s32.totalorder %s742_s13, %s738_s12  ;;  %s758_s17 = sphi %s797_s17, %s17_s17   ;;  %s754_s16 = sphi %s795_s16, %s929_s16   ;;  %s750_s15 = sphi %s793_s15, %s928_s15   ;;  %s746_s14 = sphi %s791_s14, %s927_s14   ;;  %s742_s13 = sphi %s789_s13, %s926_s13   ;;  %s738_s12 = sphi %s787_s12, %s925_s12  }
   0x6   : > { %p817_p1 = scmp.eq.s32.totalorder %s525_s18, 0  ;;  %p527_p2 = scmp.ge.s32.totalorder %s758_s17, 1 }
   0x7   : > { %p140_p3 = scmp.lt.s32.totalorder %s758_s17, 3  ;;  %s760_s22 = smov [#allocation4]  }
   0x8   : > { %p825_p4 = por %p817_p1, %p49_p0  ;;  %s154_s23 = sshll.u32 %s760_s22, 4  ;;  %s155_s23 = int_to_ptr.vmem [resolvable:$true] %s154_s23 }
   0x9   : > { %p829_p5 = pnand %p527_p2, %p140_p3  ;;  %s29_s25 = sadd.s32 1, %s754_s16 }
   0xa   : > { %s661_s26 = scalar_lea.vmem %s155_s23, 1536  ;;  %p669_p12 = scmp.lt.s32.totalorder %s155_s23, %s155_s23 }
   0xb   : > { %p573_p6 = pneg %p829_p5  ;;  %p662_p9 = scmp.ne.s32.totalorder %s155_s23, %s661_s26 }
   0xc   : > { %p670_p13 = scmp.lt.s32.totalorder %s661_s26, %s661_s26 }
   0xd   : > { %p837_p7 = pnand %p573_p6, %p817_p1 }
   0xe   : > { %p671_p0 = por %p670_p13, %p669_p12 }
   0xf   : > { %p652_p8 = pneg %p837_p7 }
  0x11   : > { %p664_p10 = pnand %p662_p9, %p652_p8 }
  0x13   : > { %p665_p11 = pneg %p664_p10 }
  0x15   : > { %p672_p2 = pnand %p671_p0, %p665_p11 }
  0x17   : > { %675 = shalt.err (!%p672_p2)
}
  0x18   : > { %s761_s27 = smov 64   ;;  %s762_s28 = smov 4  }
  0x19   : > { %576 = dma.hbm_to_vmem [thread:$0]  (!%p837_p7), %s917_s1, 1536, %s155_s23, [#allocation5], %s761_s27, %s761_s27, %s762_s28  }
  0x1a   : > { %p31_p3 = scmp.ge.s32.totalorder %s29_s25, 2  ;;  %s36_s4 = sadd.s32 1, %s746_s14 }
  0x1b   : > { %p43_p6 = scmp.ne.s32.totalorder %s746_s14, %s742_s13  ;;  %p44_p8 = scmp.eq.s32.totalorder %s758_s17, 0 }
  0x1c   : > { %s931_s25 = smov (%p31_p3, %s29_s25), 0  ;;  %p582_p10 = scmp.lt.s32.totalorder %s758_s17, 2 }
  0x1d   : > { %p45_p9 = por %p44_p8, %p43_p6  ;;  %s33_s5 = ssub.s32 %s754_s16, %s931_s25 }
  0x1e   : > { %s174_s6 = sand.u32 1, %s746_s14   ;;  %p34_p11 = scmp.eq.s32.totalorder %s33_s5, 0 }
  0x1f   : > { %s531_s7 = sshll.u32 %s174_s6, 5  ;;  %s559_s8 = sshll.u32 %s754_s16, 9 }
  0x20   : > { %s861_s9 = scalar_select %p34_p11, %s746_s14, %s36_s4  }
  0x21   : > { %s185_s12 = scalar_lea.hbm %s916_s0, %s559_s8  ;;  %s178_s18 = scalar_lea.vmem [#allocation2], %s531_s7 }
  0x22   : > { %s186_s22 = sshll.u32 %s178_s18, 4  ;;  %p866_p7 = pnand %p582_p10, %p45_p9  ;;  %s187_s22 = int_to_ptr.vmem [resolvable:$true] %s186_s22 }
  0x23   : > { %s175_s24 = scalar_lea.sflag [#allocation3], %s174_s6  ;;  %s689_s26 = scalar_lea.vmem %s187_s22, 512 }
  0x24   : > { %p678_p12 = pneg %p866_p7  ;;  %p690_p13 = scmp.ne.s32.totalorder %s187_s22, %s689_s26 }
  0x25   : > { %s763_s27 = smov [#allocation2]  }
  0x26   : > { %p692_p0 = pnand %p690_p13, %p678_p12  ;;  %s694_s28 = sshll.u32 %s763_s27, 4  ;;  %s695_s28 = int_to_ptr.vmem [resolvable:$false] %s694_s28 }
  0x27   : > { %s696_s29 = scalar_lea.vmem %s695_s28, 1024  ;;  %p697_p3 = scmp.lt.s32.totalorder %s187_s22, %s695_s28 }
  0x28   : > { %p693_p2 = pneg %p692_p0  ;;  %p698_p6 = scmp.lt.s32.totalorder %s696_s29, %s689_s26 }
  0x2a   : > { %p699_p8 = por %p698_p6, %p697_p3 }
  0x2c   : > { %p700_p9 = pnand %p699_p8, %p693_p2 }
  0x2e   : > { %703 = shalt.err (!%p700_p9)
}
  0x2f   : > { %s764_s30 = smov 256   ;;  %s765_s4 = smov 16  }
  0x30   : > { %580 = dma.hbm_to_vmem [thread:$0]  (!%p866_p7), %s185_s12, 512, %s187_s22, %s175_s24, %s764_s30, %s764_s30, %s765_s4  }
  0x31   : > { %198 = sbr.rel (%p829_p5) target bundleno = 308 (0x134), region = 32  ;;  %s200_s5 = sand.u32 (!%p829_p5), 1, %s742_s13  }
  0x32   : > { %s536_s6 = sshll.u32 (!%p829_p5), %s200_s5, 5  ;;  %s201_s7 = scalar_lea.sflag (!%p829_p5), [#allocation3], %s200_s5 }
  0x33   : > { %s877_s8 = scalar_lea.vmem (!%p829_p5), [#allocation2], %s536_s6 }
  0x36   : > { %729 = dma.done.wait (%p825_p4), %s201_s7, 512  }
  0x37   : > { %731 = vsyncadd (%p825_p4), %s201_s7, 4294966784 }
  0x38   : > { %733 = dma.done.wait (%p817_p1), [#allocation5], 1536  }
  0x39   : > { %735 = vsyncadd (%p817_p1), [#allocation5], 4294965760  ;;  %v766_v0 = vmov 0   ;;  %v638_v1 = vld [vmem:[#allocation4 + $0x38] sm:$0xff]   ;;  %v639_v2 = vld [vmem:[#allocation4 + $0x30] sm:$0xff]   ;;  %vm360_vm0 = vcmask 523264  }
  0x3a   : > { %364 = vmatprep.subr.bf16.mxu0 %v766_v0  ;;  %v640_v3 = vld [vmem:[#allocation4 + $0x28] sm:$0xff]   ;;  %v641_v4 = vld [vmem:[#allocation4 + $0x20] sm:$0xff]   ;;  %v254_v6 = vld [vmem:[%s877_s8 + $0x18] sm:$0xff]  ;;  %s538_s19 = sshll.u32 %s750_s15, 1 }
  0x3b   : > { %365 = vmatpush1.bf16.msra.mxu0 %v638_v1  ;;  %v252_v5 = vld [vmem:[%s877_s8 + $0x8] sm:$0xff]  ;;  %v642_v8 = vld [vmem:[#allocation4 + $0x18] sm:$0xff]   ;;  %v643_v9 = vld [vmem:[#allocation4 + $0x10] sm:$0xff]   ;;  %p242_p1 = scmp.lt.s32.totalorder %s538_s19, 3 }
  0x3c   : > { %366 = vmatprep.subr.bf16.mxu0 %v766_v0  ;;  %v256_v7 = vpack.c.bf16 %v254_v6, %v252_v5  ;;  %v644_v10 = vld [vmem:[#allocation4 + $0x8] sm:$0xff]   ;;  %v645_v11 = vld [vmem:[#allocation4] sm:$0xff]   ;;  %v646_v12 = vld [vmem:[#allocation4 + $0x58] sm:$0xff]  }
  0x3d   : > { %v647_v13 = vld [vmem:[#allocation4 + $0x50] sm:$0xff]   ;;  %v648_v14 = vld [vmem:[#allocation4 + $0x48] sm:$0xff]   ;;  %v649_v15 = vld [vmem:[#allocation4 + $0x40] sm:$0xff]   ;;  %s933_s19 = smov (!%p242_p1, %s538_s19), 3 }
  0x3e   : > { %553 = vmatprep.mubr.msk.bf16.mxu0 %vm360_vm0, %v256_v7  ;;  %v251_v16 = vld [vmem:[%s877_s8] sm:$0xff]  ;;  %v253_v17 = vld [vmem:[%s877_s8 + $0x10] sm:$0xff]  ;;  %s539_s10 = sshll.u32 %s933_s19, 2 }
  0x3f   : > { %367 = vmatpush1.bf16.msra.mxu0 %v639_v2  ;;  %v255_v18 = vpack.c.bf16 %v253_v17, %v251_v16  ;;  %v540_v20 = vld [vmem:[%s918_s2] ss:$0 sm:$0xff]  ;;  %s248_s18 = scalar_lea.vmem %s919_s3, %s539_s10 }
  0x40   : > { %368 = vmatprep.subr.bf16.mxu0 %v766_v0 }
  0x43   : > { %369 = vmatpush1.bf16.msra.mxu0 %v640_v3 }
  0x44   : > { %370 = vmatprep.subr.bf16.mxu0 %v766_v0 }
  0x47   : > { %371 = vmatpush1.bf16.msra.mxu0 %v641_v4 }
  0x48   : > { %372 = vmatprep.subr.bf16.mxu0 %v766_v0 }
  0x4b   : > { %373 = vmatpush1.bf16.msra.mxu0 %v642_v8 }
  0x4c   : > { %374 = vmatprep.subr.bf16.mxu0 %v766_v0 }
  0x4f   : > { %375 = vmatpush1.bf16.msra.mxu0 %v643_v9 }
  0x50   : > { %376 = vmatprep.subr.bf16.mxu0 %v766_v0 }
  0x53   : > { %377 = vmatpush1.bf16.msra.mxu0 %v644_v10 }
  0x54   : > { %378 = vmatprep.subr.bf16.mxu0 %v766_v0 }
  0x57   : > { %379 = vmatpush1.bf16.msra.mxu0 %v645_v11 }
  0x58   : > { %388 = vmatprep.subr.bf16.mxu0 %v766_v0 }
  0x5b   : > { %389 = vmatpush2.bf16.msra.mxu0 %v646_v12 }
  0x5c   : > { %390 = vmatprep.subr.bf16.mxu0 %v766_v0 }
  0x5f   : > { %391 = vmatpush2.bf16.msra.mxu0 %v647_v13 }
  0x60   : > { %392 = vmatprep.subr.bf16.mxu0 %v766_v0 }
  0x63   : > { %393 = vmatpush2.bf16.msra.mxu0 %v648_v14 }
  0x64   : > { %394 = vmatprep.subr.bf16.mxu0 %v766_v0 }
  0x67   : > { %395 = vmatpush2.bf16.msra.mxu0 %v649_v15 }
  0x6a   : > { %397 = vmatmul.mubr.bf16.vlgmr.msra.gmra.mxu0 %v255_v18 }
 0x12a   : > { %v398_v19 = vpop.f32.mrf.mxu0 }
 0x12b   : > { %v399_v23 = vadd.f32 %v540_v20, %v398_v19 }
 0x12c   : > { %v400_v21 = vpop.f32.mrf.mxu0 }
 0x12e   : > { %v401_v22 = vpop.f32.mrf.mxu0 }
 0x12f   : > { %v402_v24 = vadd.f32 %v540_v20, %v401_v22 }
 0x130   : > { %v403_v25 = vpop.f32.mrf.mxu0 }
 0x131   : > { %v565_v26 = vpack.c.bf16 %v402_v24, %v399_v23 }
 0x133   : > { %566 = vst [vmem:[%s248_s18] sm:$0xff] %v565_v26  }
 0x134 PF: > { %s17_s17 = sadd.s32 1, %s758_s17   ;;  %s925_s12 = smov %s742_s13 }
 0x135   : > { %p14_p4 = scmp.ge.s32.totalorder %s17_s17, 4   ;;  %s926_s13 = smov %s746_s14 }
 0x136   : > { %s927_s14 = smov %s861_s9  ;;  %s928_s15 = smov %s754_s16 }
 0x137   : > { %s929_s16 = smov %s931_s25  ;;  %16 = sbr.rel (!%p14_p4) target bundleno = 5 (0x5), region = 80 }
 0x13c   :  { %443 = vsyncpa [#allocation3], 1 }
 0x13d   :  { %445 = vsyncpa [#allocation3 + $0x1], 1 }
 0x13e   :  { %446 = vsyncpa [#allocation5], 1 }

// kernel: transformer_decoder_forward.11
= control target key start
LH: loop header
LB: loop body
LE: loop exit
PB: predicated region body
PF: predicated region fallthrough
CT: control target
= control target key end

     0   :  { %s917_s24 = smov 0   ;;  %s1049_s0 = inlined_call_operand.vmem [shape: bf16[32,128], index: 0, kind: input, shape index: {}]   ;;  %s1050_s1 = inlined_call_operand.vmem [shape: bf16[128,256], index: 1, kind: input, shape index: {}]   ;;  %s1051_s2 = inlined_call_operand.vmem [shape: f32[1,256], index: 2, kind: input, shape index: {}]   ;;  %s1052_s3 = inlined_call_operand.vmem [shape: bf16[256,128], index: 3, kind: input, shape index: {}]   ;;  %s1053_s4 = inlined_call_operand.vmem [shape: f32[1,128], index: 4, kind: input, shape index: {}, may-alias: {4,6}]   ;;  %s1054_s5 = inlined_call_operand.vmem [shape: f32[1,128], index: 5, kind: input, shape index: {}]   ;;  %s1055_s6 = inlined_call_operand.vmem [shape: f32[1,128], index: 6, kind: input, shape index: {}, may-alias: {4,6}]   ;;  %s1056_s7 = inlined_call_operand.vmem [shape: bf16[32,128], index: 7, kind: output, shape index: {}]  }
   0x1 LB: > { %s735_s25 = sadd.s32 4294967295, %s874_s24   ;;  %p739_p0 = scmp.ge.s32.totalorder %s874_s24, 1  ;;  %s874_s24 = sphi %s917_s24, %s17_s24  }
   0x2   : > { %p238_p1 = scmp.lt.s32.totalorder %s874_s24, 3 }
   0x4   : > { %p239_p2 = pnand %p739_p0, %p238_p1 }
   0x5   : > { %s740_s17 = sshll.u32 (!%p239_p2), %s735_s25, 1 }
   0x6   : > { %242 = sbr.rel (%p239_p2) target bundleno = 764 (0x2fc), region = 48  ;;  %p271_p3 = scmp.lt.s32.totalorder (!%p239_p2), %s740_s17, 3 }
   0xb   : > { %v822_v0 = vld [vmem:[%s1050_s1 + $0x74] ss:$8 sps:$4 sm:$0xff]   ;;  %v824_v1 = vld [vmem:[%s1050_s1 + $0x70] ss:$8 sps:$4 sm:$0xff]   ;;  %v876_v2 = vmov 0   ;;  %s1058_s17 = smov (!%p271_p3, %s740_s17), 3  ;;  %v303_v34 = vlaneseq }
   0xc   : > { %431 = vmatprep.mubr.bf16.mxu0 %v876_v2  ;;  %399 = vmatprep.subr.bf16.mxu0 %v822_v0  ;;  %v825_v3 = vld [vmem:[%s1050_s1 + $0x64] ss:$8 sps:$4 sm:$0xff]   ;;  %v827_v4 = vld [vmem:[%s1050_s1 + $0x60] ss:$8 sps:$4 sm:$0xff]   ;;  %v828_v5 = vld [vmem:[%s1050_s1 + $0x54] ss:$8 sps:$4 sm:$0xff]  }
   0xd   : > { %400 = vmatpush1.bf16.msra.mxu0 %v824_v1  ;;  %v830_v6 = vld [vmem:[%s1050_s1 + $0x50] ss:$8 sps:$4 sm:$0xff]   ;;  %v831_v7 = vld [vmem:[%s1050_s1 + $0x44] ss:$8 sps:$4 sm:$0xff]   ;;  %v833_v8 = vld [vmem:[%s1050_s1 + $0x40] ss:$8 sps:$4 sm:$0xff]  }
   0xe   : > { %401 = vmatprep.subr.bf16.mxu0 %v825_v3  ;;  %v834_v9 = vld [vmem:[%s1050_s1 + $0x34] ss:$8 sps:$4 sm:$0xff]   ;;  %v836_v12 = vld [vmem:[%s1050_s1 + $0x30] ss:$8 sps:$4 sm:$0xff]   ;;  %v851_v15 = vld [vmem:[%s1052_s3 + $0x68] sm:$0xff]   ;;  %s741_s28 = sshll.u32 %s1058_s17, 2 }
   0xf   : > { %v847_v10 = vld [vmem:[%s1052_s3 + $0x78] sm:$0xff]   ;;  %v849_v13 = vld [vmem:[%s1052_s3 + $0x70] sm:$0xff]   ;;  %v837_v16 = vld [vmem:[%s1050_s1 + $0x24] ss:$8 sps:$4 sm:$0xff]   ;;  %s274_s12 = scalar_lea.vmem %s1049_s0, %s741_s28  ;;  %v304_v35 = vshrl.u32 %v303_v34, 7  ;;  %s280_s20 = scalar_lea.vmem %s1056_s7, %s741_s28 }
  0x10   : > { %v848_v11 = vld [vmem:[%s1052_s3 + $0x38] sm:$0xff]   ;;  %791 = vmatprep.subr.bf16.mxu1 %v847_v10  ;;  %v850_v14 = vld [vmem:[%s1052_s3 + $0x30] sm:$0xff]   ;;  %v839_v17 = vld [vmem:[%s1050_s1 + $0x20] ss:$8 sps:$4 sm:$0xff]  }
  0x11   : > { %402 = vmatpush1.bf16.msra.mxu0 %v827_v4  ;;  %792 = vmatpush3.bf16.msra.mxu1 %v848_v11  ;;  %v840_v18 = vld [vmem:[%s1050_s1 + $0x14] ss:$8 sps:$4 sm:$0xff]   ;;  %v852_v19 = vld [vmem:[%s1052_s3 + $0x28] sm:$0xff]   ;;  %v853_v20 = vld [vmem:[%s1052_s3 + $0x60] sm:$0xff]   ;;  %v309_v36 = vsub.s32 1, %v304_v35  ;;  %v305_v37 = vsub.s32 0, %v304_v35 }
  0x12   : > { %403 = vmatprep.subr.bf16.mxu0 %v828_v5  ;;  %793 = vmatprep.subr.bf16.mxu1 %v849_v13  ;;  %v854_v21 = vld [vmem:[%s1052_s3 + $0x20] sm:$0xff]   ;;  %v842_v22 = vld [vmem:[%s1050_s1 + $0x10] ss:$8 sps:$4 sm:$0xff]   ;;  %v859_v30 = vld [vmem:[%s1052_s3 + $0x48] sm:$0xff]  }
  0x13   : > { %v855_v23 = vld [vmem:[%s1052_s3 + $0x58] sm:$0xff]   ;;  %v843_v24 = vld [vmem:[%s1050_s1 + $0x4] ss:$8 sps:$4 sm:$0xff]   ;;  %v845_v26 = vld [vmem:[%s1050_s1] ss:$8 sps:$4 sm:$0xff]  }
  0x14   : > { %v856_v25 = vld [vmem:[%s1052_s3 + $0x18] sm:$0xff]   ;;  %v283_v27 = vld [vmem:[%s274_s12] sm:$0xff]   ;;  %v857_v28 = vld [vmem:[%s1052_s3 + $0x50] sm:$0xff]  }
  0x15   : > { %404 = vmatpush1.bf16.msra.mxu0 %v830_v6  ;;  %794 = vmatpush3.bf16.msra.mxu1 %v850_v14  ;;  %v858_v29 = vld [vmem:[%s1052_s3 + $0x10] sm:$0xff]   ;;  %v860_v31 = vld [vmem:[%s1052_s3 + $0x8] sm:$0xff]   ;;  %v861_v32 = vld [vmem:[%s1052_s3 + $0x40] sm:$0xff]   ;;  %v624_v59 = vunpack.c.l.bf16 %v283_v27  ;;  %v625_v1 = vunpack.c.h.bf16 %v283_v27 }
  0x16   : > { %405 = vmatprep.subr.bf16.mxu0 %v831_v7  ;;  %795 = vmatprep.subr.bf16.mxu1 %v851_v15  ;;  %v862_v33 = vld [vmem:[%s1052_s3] sm:$0xff]  }
  0x17   : > { %v301_v38 = vld [vmem:[%s1051_s2] sm:$0x3] }
  0x18   : > { %v310_v40 = vrot.slane %v301_v38, %v309_v36  ;;  %v306_v41 = vrot.slane %v301_v38, %v305_v37  ;;  %v761_v56 = vld [vmem:[%s1053_s4] ss:$0 sm:$0xff] }
  0x19   : > { %406 = vmatpush1.bf16.msra.mxu0 %v833_v8  ;;  %796 = vmatpush3.bf16.msra.mxu1 %v852_v19 }
  0x1a   : > { %407 = vmatprep.subr.bf16.mxu0 %v834_v9  ;;  %797 = vmatprep.subr.bf16.mxu1 %v853_v20  ;;  %v778_v20 = vld [vmem:[%s1054_s5] ss:$0 sm:$0xff] }
  0x1d   : > { %408 = vmatpush1.bf16.msra.mxu0 %v836_v12  ;;  %798 = vmatpush3.bf16.msra.mxu1 %v854_v21 }
  0x1e   : > { %409 = vmatprep.subr.bf16.mxu0 %v837_v16  ;;  %799 = vmatprep.subr.bf16.mxu1 %v855_v23 }
  0x21   : > { %410 = vmatpush1.bf16.msra.mxu0 %v839_v17  ;;  %800 = vmatpush3.bf16.msra.mxu1 %v856_v25 }
  0x22   : > { %411 = vmatprep.subr.bf16.mxu0 %v840_v18  ;;  %801 = vmatprep.subr.bf16.mxu1 %v857_v28 }
  0x25   : > { %412 = vmatpush1.bf16.msra.mxu0 %v842_v22  ;;  %802 = vmatpush3.bf16.msra.mxu1 %v858_v29 }
  0x26   : > { %413 = vmatprep.subr.bf16.mxu0 %v843_v24  ;;  %803 = vmatprep.subr.bf16.mxu1 %v859_v30  ;;  %v779_v24 = vld [vmem:[%s1055_s6] ss:$0 sm:$0xff] }
  0x29   : > { %414 = vmatpush1.bf16.msra.mxu0 %v845_v26  ;;  %804 = vmatpush3.bf16.msra.mxu1 %v860_v31 }
  0x2a   : > { %805 = vmatprep.subr.bf16.mxu1 %v861_v32 }
  0x2c   : > { %432 = vmatmul.mubr.bf16.vlgmr.msra.gmra.mxu0 %v283_v27 }
  0x2d   : > { %806 = vmatpush3.bf16.msra.mxu1 %v862_v33 }
  0xec   : > { %v433_v39 = vpop.f32.mrf.mxu0 }
  0xed   : > { %v434_v46 = vadd.f32 %v433_v39, %v306_v41 }
  0xee   : > { %v435_v42 = vpop.f32.mrf.mxu0 }
  0xef   : > { %v436_v44 = vadd.f32 %v435_v42, %v310_v40  ;;  %v442_v52 = vmax.f32 %v434_v46, 0.0 }
  0xf0   : > { %v437_v43 = vpop.f32.mrf.mxu0 }
  0xf1   : > { %v438_v45 = vadd.f32 %v437_v43, %v306_v41  ;;  %v443_v50 = vmax.f32 %v436_v44, 0.0 }
  0xf2   : > { %v439_v47 = vpop.f32.mrf.mxu0 }
  0xf3   : > { %v440_v48 = vadd.f32 %v439_v47, %v310_v40  ;;  %v444_v49 = vmax.f32 %v438_v45, 0.0 }
  0xf5   : > { %v445_v51 = vmax.f32 %v440_v48, 0.0  ;;  %v446_v54 = vpack.c.bf16 %v444_v49, %v442_v52 }
  0xf7   : > { %v447_v53 = vpack.c.bf16 %v445_v51, %v443_v50 }
  0xf9   : > { %615 = vmatprep.mubr.bf16.mxu1 %v447_v53 }
  0xfa   : > { %616 = vmatmul.mubr.bf16.vlgmr.msra.gmra.mxu1 %v446_v54 }
 0x1ba   : > { %v807_v55 = vpop.f32.mrf.mxu1 }
 0x1bc   : > { %v808_v57 = vpop.f32.mrf.mxu1 }
 0x1bd   : > { %v809_v58 = vadd.f32 %v808_v57, %v807_v55 }
 0x1be   : > { %v810_v60 = vpop.f32.mrf.mxu1 }
 0x1bf   : > { %v618_v61 = vadd.f32 %v809_v58, %v761_v56 }
 0x1c0   : > { %v811_v62 = vpop.f32.mrf.mxu1 }
 0x1c1   : > { %v812_v63 = vadd.f32 %v811_v62, %v810_v60  ;;  %v626_v0 = vadd.f32 %v624_v59, %v618_v61 }
 0x1c3   : > { %v621_v2 = vadd.f32 %v812_v63, %v761_v56  ;;  %628 = vadd.xlane.f32.xlu0 %v626_v0 }
 0x1c5   : > { %v627_v3 = vadd.f32 %v625_v1, %v621_v2 }
 0x1c7   : > { %630 = vadd.xlane.f32.xlu0 %v627_v3 }
 0x24c   : > { %v629_v4 = vpop.xlane.xlu0 %628 }
 0x24d   : > { %v633_v5 = vmul.f32 0.0078125, %v629_v4 }
 0x24f   : > { %v635_v6 = vsub.f32 %v626_v0, %v633_v5 }
 0x250   : > { %v631_v7 = vpop.xlane.xlu0 %630 }
 0x251   : > { %v634_v8 = vmul.f32 0.0078125, %v631_v7  ;;  %v637_v9 = vmul.f32 %v635_v6, %v635_v6 }
 0x253   : > { %v636_v10 = vsub.f32 %v627_v3, %v634_v8  ;;  %639 = vadd.xlane.f32.xlu1 %v637_v9 }
 0x255   : > { %v638_v11 = vmul.f32 %v636_v10, %v636_v10 }
 0x257   : > { %641 = vadd.xlane.f32.xlu1 %v638_v11 }
 0x2dc   : > { %v640_v12 = vpop.xlane.xlu1 %639 }
 0x2dd   : > { %v643_v13 = vmul.f32 0.0078125, %v640_v12 }
 0x2df   : > { %v645_v14 = vadd.f32 1e-05, %v643_v13 }
 0x2e0   : > { %v642_v15 = vpop.xlane.xlu1 %641 }
 0x2e1   : > { %864 = vrsqrt.f32 %v645_v14  ;;  %v644_v16 = vmul.f32 0.0078125, %v642_v15 }
 0x2e3   : > { %v646_v17 = vadd.f32 1e-05, %v644_v16 }
 0x2e5   : > { %866 = vrsqrt.f32 %v646_v17 }
 0x2ee   : > { %v865_v18 = vpop.eup %864 }
 0x2ef   : > { %v649_v19 = vmul.f32 %v865_v18, %v635_v6 }
 0x2f1   : > { %v658_v22 = vmul.f32 %v778_v20, %v649_v19 }
 0x2f2   : > { %v867_v21 = vpop.eup %866 }
 0x2f3   : > { %v650_v23 = vmul.f32 %v867_v21, %v636_v10  ;;  %v667_v26 = vadd.f32 %v779_v24, %v658_v22 }
 0x2f5   : > { %v659_v25 = vmul.f32 %v778_v20, %v650_v23 }
 0x2f7   : > { %v668_v27 = vadd.f32 %v779_v24, %v659_v25 }
 0x2f9   : > { %v789_v28 = vpack.c.bf16 %v668_v27, %v667_v26 }
 0x2fb   : > { %790 = vst [vmem:[%s280_s20] sm:$0xff] %v789_v28  }
 0x2fc PF: > { %s17_s24 = sadd.s32 1, %s874_s24  }
 0x2fd   : > { %p14_p4 = scmp.ge.s32.totalorder %s17_s24, 4  }
 0x2ff   :  { %16 = sbr.rel (!%p14_p4) target bundleno = 1 (0x1), region = 78 }

// kernel: transformer_decoder_forward.9
= control target key start
LH: loop header
LB: loop body
LE: loop exit
PB: predicated region body
PF: predicated region fallthrough
CT: control target
= control target key end

     0   :  { %s1846_s27 = smov 0   ;;  %s2133_s0 = inlined_call_operand.vmem [shape: bf16[2,16,128], index: 0, kind: input, shape index: {}]   ;;  %s2134_s1 = inlined_call_operand.vmem [shape: f32[2,1,16], index: 1, kind: input, shape index: {}]   ;;  %s2135_s2 = inlined_call_operand.vmem [shape: bf16[128,384], index: 2, kind: input, shape index: {}]   ;;  %s2136_s3 = inlined_call_operand.vmem [shape: f32[1,384], index: 3, kind: input, shape index: {}]   ;;  %s2137_s4 = inlined_call_operand.vmem [shape: bf16[128,128], index: 4, kind: input, shape index: {}]   ;;  %s2138_s5 = inlined_call_operand.vmem [shape: f32[1,128], index: 5, kind: input, shape index: {}, may-alias: {5,7}]   ;;  %s2139_s6 = inlined_call_operand.vmem [shape: f32[1,128], index: 6, kind: input, shape index: {}]   ;;  %s2140_s7 = inlined_call_operand.vmem [shape: f32[1,128], index: 7, kind: input, shape index: {}, may-alias: {5,7}]   ;;  %s2141_s8 = inlined_call_operand.vmem [shape: bf16[2,16,128], index: 8, kind: output, shape index: {}]  }
   0x1 LB: > { %s1485_s28 = sadd.s32 4294967295, %s1792_s27   ;;  %p1489_p0 = scmp.ge.s32.totalorder %s1792_s27, 1  ;;  %s1792_s27 = sphi %s1846_s27, %s18_s27  }
   0x2   : > { %p270_p1 = scmp.lt.s32.totalorder %s1792_s27, 3 }
   0x4   : > { %p271_p2 = pnand %p1489_p0, %p270_p1 }
   0x5   : > { %p307_p3 = scmp.lt.s32.totalorder (!%p271_p2), %s1485_s28, 1  ;;  %s1797_s26 = smov (!%p271_p2), 96  }
   0x6   : > { %274 = sbr.rel (%p271_p2) target bundleno = 2841 (0xb19), region = 52  ;;  %s1799_s30 = smov (!%p271_p2), 64  }
   0x7   : > { %s1800_s16 = smov (!%p271_p2), 32  }
   0xb   : > { %v1708_v0 = vld [vmem:[%s2135_s2 + $0xac] ss:$12 sps:$4 sm:$0xff]   ;;  %v1710_v1 = vld [vmem:[%s2135_s2 + $0xa8] ss:$12 sps:$4 sm:$0xff]   ;;  %v1794_v2 = vmov 0   ;;  %s2143_s28 = smov (!%p307_p3, %s1485_s28), 1  ;;  %v357_v19 = vlaneseq }
   0xc   : > { %538 = vmatprep.mubr.bf16.mxu0 %v1794_v2  ;;  %506 = vmatprep.subr.bf16.mxu0 %v1708_v0  ;;  %v1711_v3 = vld [vmem:[%s2135_s2 + $0x94] ss:$12 sps:$4 sm:$0xff]   ;;  %v1713_v4 = vld [vmem:[%s2135_s2 + $0x90] ss:$12 sps:$4 sm:$0xff]   ;;  %v1716_v6 = vld [vmem:[%s2135_s2 + $0x78] ss:$12 sps:$4 sm:$0xff]   ;;  %s314_s29 = scalar_lea.vmem %s2134_s1, %s2143_s28 }
   0xd   : > { %507 = vmatpush1.bf16.msra.mxu0 %v1710_v1  ;;  %v1714_v5 = vld [vmem:[%s2135_s2 + $0x7c] ss:$12 sps:$4 sm:$0xff]   ;;  %v1717_v7 = vld [vmem:[%s2135_s2 + $0x64] ss:$12 sps:$4 sm:$0xff]   ;;  %v1719_v8 = vld [vmem:[%s2135_s2 + $0x60] ss:$12 sps:$4 sm:$0xff]  }
   0xe   : > { %508 = vmatprep.subr.bf16.mxu0 %v1711_v3  ;;  %s1547_s23 = sshll.u32 %s2143_s28, 3  ;;  %v1720_v9 = vld [vmem:[%s2135_s2 + $0x4c] ss:$12 sps:$4 sm:$0xff]   ;;  %v1722_v10 = vld [vmem:[%s2135_s2 + $0x48] ss:$12 sps:$4 sm:$0xff]   ;;  %v1795_v18 = vmov 0.0  }
   0xf   : > { %v1723_v11 = vld [vmem:[%s2135_s2 + $0x34] ss:$12 sps:$4 sm:$0xff]   ;;  %v1725_v12 = vld [vmem:[%s2135_s2 + $0x30] ss:$12 sps:$4 sm:$0xff]   ;;  %v1728_v14 = vld [vmem:[%s2135_s2 + $0x18] ss:$12 sps:$4 sm:$0xff]   ;;  %s311_s20 = scalar_lea.vmem %s2133_s0, %s1547_s23  ;;  %1593 = vmatprep.subr.bf16.mxu1 %v1795_v18  ;;  %s319_s14 = scalar_lea.vmem %s2141_s8, %s1547_s23 }
  0x10   : > { %v1726_v13 = vld [vmem:[%s2135_s2 + $0x1c] ss:$12 sps:$4 sm:$0xff]   ;;  %v1729_v15 = vld [vmem:[%s2135_s2 + $0x4] ss:$12 sps:$4 sm:$0xff]   ;;  %v1731_v16 = vld [vmem:[%s2135_s2] ss:$12 sps:$4 sm:$0xff]  }
  0x11   : > { %509 = vmatpush1.bf16.msra.mxu0 %v1713_v4  ;;  %v1910_v17 = vld [vmem:[%s311_s20] sm:$0xff]   ;;  %vm1796_vm0 = vmmov 0   ;;  %v1919_v20 = vshrl.u32 %v357_v19, 7  ;;  %vm627_vm1 = vcmask 261120   ;;  %v1733_v37 = vld [vmem:[%s2135_s2 + $0xb0] ss:$12 sps:$4 sm:$0xff]  }
  0x12   : > { %510 = vmatprep.subr.bf16.mxu0 %v1714_v5  ;;  %1609 = vmatprep.mubr.msk.bf16.mxu1 %vm1796_vm0, %v1795_v18  ;;  %v1925_v23 = vld [vmem:[%s2136_s3] sm:$0x7]  ;;  %v1734_v38 = vld [vmem:[%s2135_s2 + $0x98] ss:$12 sps:$4 sm:$0xff]   ;;  %v1736_v40 = vld [vmem:[%s2135_s2 + $0x68] ss:$12 sps:$4 sm:$0xff]  }
  0x13   : > { %v363_v21 = vsub.s32 1, %v1919_v20  ;;  %v359_v25 = vsub.s32 0, %v1919_v20  ;;  %1594 = vmatpush3.bf16.msra.mxu1 %v1733_v37  ;;  %v1735_v39 = vld [vmem:[%s2135_s2 + $0x80] ss:$12 sps:$4 sm:$0xff]   ;;  %v1737_v41 = vld [vmem:[%s2135_s2 + $0x50] ss:$12 sps:$4 sm:$0xff]  }
  0x14   : > { %1595 = vmatprep.subr.bf16.mxu1 %v1795_v18  ;;  %v1738_v42 = vld [vmem:[%s2135_s2 + $0x38] ss:$12 sps:$4 sm:$0xff]   ;;  %v1739_v43 = vld [vmem:[%s2135_s2 + $0x20] ss:$12 sps:$4 sm:$0xff]   ;;  %v1740_v44 = vld [vmem:[%s2135_s2 + $0x8] ss:$12 sps:$4 sm:$0xff]  }
  0x15   : > { %511 = vmatpush1.bf16.msra.mxu0 %v1716_v6  ;;  %v364_v26 = vrot.slane %v1925_v23, %v363_v21  ;;  %v360_v29 = vrot.slane %v1925_v23, %v359_v25  ;;  %v597_v48 = vand.u32 127, %v357_v19  ;;  %v595_v49 = vadd.s32 8, %v1919_v20  ;;  %v1519_v52 = vld [vmem:[%s314_s29] ss:$0 sm:$0xff] }
  0x16   : > { %512 = vmatprep.subr.bf16.mxu0 %v1717_v7  ;;  %v1798_v50 = vmov -1e+30   ;;  %vm679_vm4 = vcmask 130048   ;;  %v367_v21 = vsub.s32 2, %v1919_v20 }
  0x17   : > { %1596 = vmatpush3.bf16.msra.mxu1 %v1734_v38  ;;  %vm598_vm2 = vcmp.le.s32.totalorder %v597_v48, %v1919_v20  ;;  %vm599_vm3 = vcmp.le.s32.totalorder %v597_v48, %v595_v49 }
  0x18   : > { %1597 = vmatprep.subr.bf16.mxu1 %v1795_v18  ;;  %v600_v51 = vsel %vm598_vm2, 0.0, %v1798_v50  ;;  %v601_v55 = vsel %vm599_vm3, 0.0, %v1798_v50 }
  0x19   : > { %513 = vmatpush1.bf16.msra.mxu0 %v1719_v8  ;;  %v1991_v53 = vadd.f32 %v1519_v52, %v600_v51  ;;  %v1994_v59 = vadd.f32 %v1519_v52, %v601_v55  ;;  %v1743_v52 = vld [vmem:[%s2137_s4 + $0x18] sm:$0xff]  }
  0x1a   : > { %514 = vmatprep.subr.bf16.mxu0 %v1720_v9 }
  0x1b   : > { %1598 = vmatpush3.bf16.msra.mxu1 %v1735_v39 }
  0x1c   : > { %1599 = vmatprep.subr.bf16.mxu1 %v1795_v18 }
  0x1d   : > { %515 = vmatpush1.bf16.msra.mxu0 %v1722_v10 }
  0x1e   : > { %516 = vmatprep.subr.bf16.mxu0 %v1723_v11 }
  0x1f   : > { %1600 = vmatpush3.bf16.msra.mxu1 %v1736_v40 }
  0x20   : > { %1601 = vmatprep.subr.bf16.mxu1 %v1795_v18 }
  0x21   : > { %517 = vmatpush1.bf16.msra.mxu0 %v1725_v12 }
  0x22   : > { %518 = vmatprep.subr.bf16.mxu0 %v1726_v13 }
  0x23   : > { %1602 = vmatpush3.bf16.msra.mxu1 %v1737_v41 }
  0x24   : > { %1603 = vmatprep.subr.bf16.mxu1 %v1795_v18 }
  0x25   : > { %519 = vmatpush1.bf16.msra.mxu0 %v1728_v14 }
  0x26   : > { %520 = vmatprep.subr.bf16.mxu0 %v1729_v15 }
  0x27   : > { %1604 = vmatpush3.bf16.msra.mxu1 %v1738_v42 }
  0x28   : > { %1605 = vmatprep.subr.bf16.mxu1 %v1795_v18 }
  0x29   : > { %521 = vmatpush1.bf16.msra.mxu0 %v1731_v16 }
  0x2a   : > { %1613 = vmatprep.subr.bf16.mxu0 %v1795_v18 }
  0x2b   : > { %1606 = vmatpush3.bf16.msra.mxu1 %v1739_v43 }
  0x2c   : > { %539 = vmatmul.mubr.bf16.vlgmr.msra.gmra.mxu0 %v1910_v17  ;;  %1607 = vmatprep.subr.bf16.mxu1 %v1795_v18 }
  0x2d   : > { %1615 = vmatprep.mubr.msk.bf16.mxu0 %vm1796_vm0, %v1795_v18 }
  0x2f   : > { %1608 = vmatpush3.bf16.msra.mxu1 %v1740_v44 }
  0x30   : > { %1619 = vmatprep.subr.bf16.mxu1 %v1795_v18 }
  0x32   : > { %1610 = vmatmul.mubr.bf16.vlgmr.msra.gmra.mxu1 %v1910_v17 }
  0x33   : > { %1621 = vmatprep.mubr.msk.bf16.mxu1 %vm1796_vm0, %v1795_v18 }
  0xec   : > { %v540_v22 = vpop.f32.mrf.mxu0 }
  0xed   : > { %v541_v34 = vadd.f32 %v540_v22, %v360_v29 }
  0xee   : > { %v542_v24 = vpop.f32.mrf.mxu0 }
  0xef   : > { %v543_v30 = vadd.f32 %v542_v24, %v364_v26  ;;  %v368_v24 = vrot.slane %v1925_v23, %v367_v21 }
  0xf0   : > { %v544_v27 = vpop.f32.mrf.mxu0 }
  0xf1   : > { %v545_v32 = vadd.f32 %v544_v27, %v360_v29 }
  0xf2   : > { %v546_v28 = vpop.f32.mrf.mxu0  ;;  %v583_v22 = vpop.f32.mrf.mxu1 }
  0xf3   : > { %v547_v31 = vadd.f32 %v546_v28, %v364_v26  ;;  %v1936_v36 = vpack.c.bf16 %v545_v32, %v541_v34  ;;  %v584_v26 = vadd.f32 %v583_v22, %v368_v24 }
  0xf4   : > { %v1611_v25 = vpop.f32.mrf.mxu1 }
  0xf5   : > { %v1930_v33 = vpack.c.bf16 %v547_v31, %v543_v30 }
  0xf6   : > { %v586_v27 = vpop.f32.mrf.mxu1 }
  0xf7   : > { %752 = vrot.lane.b32.xlu0 %v1930_v33, %s1797_s26  ;;  %v632_v35 = vsel %vm627_vm1, %v1930_v33, 0  ;;  %v587_v28 = vadd.f32 %v586_v27, %v368_v24 }
  0xf8   : > { %1614 = vmatpush3.bf16.xpose.msra.mxu0 %v632_v35  ;;  %v1612_v29 = vpop.f32.mrf.mxu1 }
  0xf9   : > { %1625 = vmatprep.subr.bf16.mxu0 %v1795_v18  ;;  %v2007_v31 = vpack.c.bf16 %v587_v28, %v584_v26 }
  0xfb   : > { %749 = vrot.lane.b32.xlu0 %v1936_v36, %s1797_s26  ;;  %1620 = vmatpush3.bf16.msra.mxu1 %v2007_v31 }
  0xfc   : > { %1631 = vmatprep.subr.bf16.mxu1 %v1795_v18 }
  0xff   : > { %1616 = vmatmul.mubr.msk.bf16.vlgmr.msra.gmra.mxu0 %vm627_vm1, %v1936_v36 }
 0x100   : > { %1627 = vmatprep.mubr.msk.bf16.mxu0 %vm1796_vm0, %v1795_v18 }
 0x169   : > { %v753_v45 = vpop.permute.xlu0 %752 }
 0x16a   : > { %v758_v46 = vsel %vm627_vm1, %v753_v45, 0 }
 0x16b   : > { %1626 = vmatpush3.bf16.xpose.msra.mxu0 %v758_v46 }
 0x16c   : > { %1637 = vmatprep.subr.bf16.mxu0 %v1795_v18 }
 0x16d   : > { %v750_v47 = vpop.permute.xlu0 %749 }
 0x172   : > { %1628 = vmatmul.mubr.msk.bf16.vlgmr.msra.gmra.mxu0 %vm627_vm1, %v750_v47 }
 0x173   : > { %1641 = vmatprep.mubr.msk.bf16.mxu0 %vm1796_vm0, %v1795_v18  ;;  %1638 = vmatpush3.bf16.msra.mxu0 %v1743_v52 }
 0x174   : > { %1639 = vmatprep.subr.bf16.mxu0 %v1795_v18 }
 0x1bf   : > { %v668_v54 = vpop.f32.mrf.mxu0 }
 0x1c0   : > { %v675_v56 = vmul.f32 0.17677669, %v668_v54 }
 0x1c1   : > { %v1617_v57 = vpop.f32.mrf.mxu0 }
 0x1c2   : > { %v677_v58 = vadd.f32 %v675_v56, %v1991_v53 }
 0x1c3   : > { %v671_v60 = vpop.f32.mrf.mxu0 }
 0x1c4   : > { %v676_v61 = vmul.f32 0.17677669, %v671_v60  ;;  %v680_v62 = vsel %vm679_vm4, %v677_v58, -inf }
 0x1c5   : > { %681 = vmax.xlane.f32.xlu1 %v680_v62  ;;  %v1618_v63 = vpop.f32.mrf.mxu0  ;;  %v1741_v62 = vld [vmem:[%s2137_s4 + $0x8] sm:$0xff]  }
 0x1c6   : > { %v678_v0 = vadd.f32 %v676_v61, %v1994_v59 }
 0x1c8   : > { %v683_v1 = vsel %vm679_vm4, %v678_v0, -inf }
 0x1c9   : > { %684 = vmax.xlane.f32.xlu1 %v683_v1  ;;  %v1744_v1 = vld [vmem:[%s2137_s4 + $0x10] sm:$0xff]  }
 0x1ca   : > { %1640 = vmatpush3.bf16.msra.mxu0 %v1744_v1 }
 0x1cb   : > { %1653 = vmatprep.subr.bf16.mxu0 %v1795_v18 }
 0x232   : > { %v794_v2 = vpop.f32.mrf.mxu0 }
 0x233   : > { %v801_v3 = vmul.f32 0.17677669, %v794_v2 }
 0x234   : > { %v1629_v4 = vpop.f32.mrf.mxu0 }
 0x235   : > { %v803_v5 = vadd.f32 %v801_v3, %v1991_v53 }
 0x236   : > { %v797_v6 = vpop.f32.mrf.mxu0 }
 0x237   : > { %v802_v7 = vmul.f32 0.17677669, %v797_v6  ;;  %v805_v8 = vsel %vm679_vm4, %v803_v5, -inf }
 0x238   : > { %806 = vmax.xlane.f32.xlu0 %v805_v8  ;;  %v1630_v9 = vpop.f32.mrf.mxu0 }
 0x239   : > { %v804_v10 = vadd.f32 %v802_v7, %v1994_v59 }
 0x23b   : > { %v808_v11 = vsel %vm679_vm4, %v804_v10, -inf }
 0x23c   : > { %809 = vmax.xlane.f32.xlu1 %v808_v11 }
 0x24e   : > { %v682_v12 = vpop.xlane.xlu1 %681  ;;  %991 = vrot.lane.b32.xlu0 %v1930_v33, %s1799_s30 }
 0x24f   : > { %v686_v13 = vsub.f32 %v677_v58, %v682_v12 }
 0x251   : > { %v688_v14 = vmul.f32 1.442695, %v686_v13 }
 0x252   : > { %v685_v15 = vpop.xlane.xlu1 %684 }
 0x253   : > { %1750 = vpow2.f32 %v688_v14  ;;  %v687_v16 = vsub.f32 %v678_v0, %v685_v15  ;;  %v1742_v0 = vld [vmem:[%s2137_s4] sm:$0xff]  }
 0x255   : > { %v690_v19 = vmul.f32 1.442695, %v687_v16 }
 0x257   : > { %1752 = vpow2.f32 %v690_v19 }
 0x260   : > { %v1751_v30 = vpop.eup %1750 }
 0x261   : > { %v692_v32 = vsel %vm679_vm4, %v1751_v30, 0.0 }
 0x262   : > { %693 = vadd.xlane.f32.xlu1 %v692_v32 }
 0x264   : > { %v1753_v34 = vpop.eup %1752 }
 0x265   : > { %v695_v20 = vsel %vm679_vm4, %v1753_v34, 0.0 }
 0x266   : > { %696 = vadd.xlane.f32.xlu1 %v695_v20 }
 0x2c1   : > { %v807_v23 = vpop.xlane.xlu0 %806 }
 0x2c2   : > { %v811_v35 = vsub.f32 %v803_v5, %v807_v23 }
 0x2c4   : > { %v813_v37 = vmul.f32 1.442695, %v811_v35 }
 0x2c5   : > { %v810_v38 = vpop.xlane.xlu1 %809  ;;  %v992_v9 = vpop.permute.xlu0 %991 }
 0x2c6   : > { %1754 = vpow2.f32 %v813_v37  ;;  %v812_v39 = vsub.f32 %v804_v10, %v810_v38  ;;  %v997_v13 = vsel %vm627_vm1, %v992_v9, 0 }
 0x2c8   : > { %v815_v40 = vmul.f32 1.442695, %v812_v39 }
 0x2ca   : > { %1756 = vpow2.f32 %v815_v40 }
 0x2d3   : > { %v1755_v41 = vpop.eup %1754 }
 0x2d4   : > { %v817_v42 = vsel %vm679_vm4, %v1755_v41, 0.0 }
 0x2d5   : > { %818 = vadd.xlane.f32.xlu1 %v817_v42 }
 0x2d7   : > { %v1757_v43 = vpop.eup %1756 }
 0x2d8   : > { %v820_v44 = vsel %vm679_vm4, %v1757_v43, 0.0 }
 0x2d9   : > { %821 = vadd.xlane.f32.xlu1 %v820_v44 }
 0x2ea   : > { %829 = vrot.lane.b32.xlu1 %v2007_v31, %s1797_s26 }
 0x2eb   : > { %v694_v45 = vpop.xlane.xlu1 %693 }
 0x2ec   : > { %1758 = vrcp.f32 %v694_v45 }
 0x2ee   : > { %989 = vrot.lane.b32.xlu1 %v1936_v36, %s1799_s30 }
 0x2ef   : > { %v697_v46 = vpop.xlane.xlu1 %696 }
 0x2f0   : > { %1760 = vrcp.f32 %v697_v46 }
 0x2f9   : > { %v1759_v47 = vpop.eup %1758 }
 0x2fa   : > { %v700_v49 = vmul.f32 %v1759_v47, %v1751_v30 }
 0x2fd   : > { %v1761_v48 = vpop.eup %1760 }
 0x2fe   : > { %v701_v50 = vmul.f32 %v1761_v48, %v1753_v34 }
 0x300   : > { %v702_v51 = vpack.c.bf16 %v701_v50, %v700_v49 }
 0x302   : > { %1622 = vmatmul.mubr.msk.bf16.vlgmr.msra.gmra.mxu1 %vm679_vm4, %v702_v51 }
 0x303   : > { %1633 = vmatprep.mubr.msk.bf16.mxu1 %vm1796_vm0, %v1795_v18 }
 0x35e   : > { %v819_v54 = vpop.xlane.xlu1 %818 }
 0x35f   : > { %1762 = vrcp.f32 %v819_v54 }
 0x362   : > { %v822_v55 = vpop.xlane.xlu1 %821 }
 0x363   : > { %1764 = vrcp.f32 %v822_v55 }
 0x366   : > { %v830_v56 = vpop.permute.xlu1 %829 }
 0x367   : > { %1632 = vmatpush3.bf16.msra.mxu1 %v830_v56 }
 0x368   : > { %1645 = vmatprep.subr.bf16.mxu1 %v1795_v18 }
 0x36a   : > { %v990_v14 = vpop.permute.xlu1 %989 }
 0x36c   : > { %v1763_v57 = vpop.eup %1762 }
 0x36d   : > { %v825_v60 = vmul.f32 %v1763_v57, %v1755_v41 }
 0x370   : > { %v1765_v58 = vpop.eup %1764 }
 0x371   : > { %v826_v61 = vmul.f32 %v1765_v58, %v1757_v43 }
 0x373   : > { %v827_v63 = vpack.c.bf16 %v826_v61, %v825_v60  ;;  %v1746_v60 = vld [vmem:[%s2137_s4 + $0x20] sm:$0xff]  }
 0x375   : > { %1634 = vmatmul.mubr.msk.bf16.vlgmr.msra.gmra.mxu1 %vm679_vm4, %v827_v63 }
 0x376   : > { %1646 = vmatpush3.bf16.msra.mxu1 %v1741_v62  ;;  %1649 = vmatprep.mubr.msk.bf16.mxu1 %vm1796_vm0, %v1795_v18 }
 0x377   : > { %1647 = vmatprep.subr.bf16.mxu1 %v1795_v18 }
 0x37a   : > { %1648 = vmatpush3.bf16.msra.mxu1 %v1742_v0 }
 0x37b   : > { %1659 = vmatprep.subr.bf16.mxu1 %v1795_v18 }
 0x3c2   : > { %v740_v2 = vpop.f32.mrf.mxu1 }
 0x3c4   : > { %v1623_v3 = vpop.f32.mrf.mxu1 }
 0x3c6   : > { %v743_v4 = vpop.f32.mrf.mxu1 }
 0x3c7   : > { %v747_v5 = vpack.c.bf16 %v743_v4, %v740_v2 }
 0x3c8   : > { %v1624_v6 = vpop.f32.mrf.mxu1 }
 0x3c9   : > { %1650 = vmatmul.mubr.msk.bf16.vlgmr.msra.gmra.mxu1 %vm627_vm1, %v747_v5 }
 0x3ca   : > { %1661 = vmatprep.mubr.msk.bf16.mxu1 %vm1796_vm0, %v1795_v18 }
 0x435   : > { %v869_v7 = vpop.f32.mrf.mxu1 }
 0x437   : > { %v1635_v8 = vpop.f32.mrf.mxu1 }
 0x439   : > { %v872_v10 = vpop.f32.mrf.mxu1 }
 0x43a   : > { %v876_v11 = vpack.c.bf16 %v872_v10, %v869_v7 }
 0x43b   : > { %v1636_v12 = vpop.f32.mrf.mxu1 }
 0x43c   : > { %1642 = vmatmul.mubr.msk.bf16.vlgmr.msra.gmra.mxu0 %vm627_vm1, %v876_v11 }
 0x43d   : > { %1654 = vmatpush3.bf16.xpose.msra.mxu0 %v997_v13  ;;  %1655 = vmatprep.mubr.msk.bf16.mxu0 %vm1796_vm0, %v1795_v18 }
 0x43e   : > { %1665 = vmatprep.subr.bf16.mxu0 %v1795_v18 }
 0x444   : > { %1656 = vmatmul.mubr.msk.bf16.vlgmr.msra.gmra.mxu0 %vm627_vm1, %v990_v14 }
 0x445   : > { %1669 = vmatprep.mubr.msk.bf16.mxu0 %vm1796_vm0, %v1795_v18 }
 0x489   : > { %v2053_v15 = vpop.f32.mrf.mxu1 }
 0x48b   : > { %v1651_v16 = vpop.f32.mrf.mxu1 }
 0x48d   : > { %v2055_v19 = vpop.f32.mrf.mxu1 }
 0x48f   : > { %v1652_v21 = vpop.f32.mrf.mxu1 }
 0x4fc   : > { %v2057_v22 = vpop.f32.mrf.mxu0 }
 0x4fe   : > { %v1643_v24 = vpop.f32.mrf.mxu0 }
 0x500   : > { %v2059_v25 = vpop.f32.mrf.mxu0 }
 0x502   : > { %v1644_v26 = vpop.f32.mrf.mxu0 }
 0x504   : > { %v1033_v27 = vpop.f32.mrf.mxu0 }
 0x505   : > { %v1040_v28 = vmul.f32 0.17677669, %v1033_v27 }
 0x506   : > { %v1657_v29 = vpop.f32.mrf.mxu0 }
 0x507   : > { %v1042_v30 = vadd.f32 %v1040_v28, %v1991_v53 }
 0x508   : > { %v1036_v32 = vpop.f32.mrf.mxu0 }
 0x509   : > { %v1041_v34 = vmul.f32 0.17677669, %v1036_v32  ;;  %v1044_v20 = vsel %vm679_vm4, %v1042_v30, -inf }
 0x50a   : > { %1045 = vmax.xlane.f32.xlu1 %v1044_v20  ;;  %v1658_v23 = vpop.f32.mrf.mxu0 }
 0x50b   : > { %v1043_v35 = vadd.f32 %v1041_v34, %v1994_v59  ;;  %v986_v34 = vadd.f32 %v2055_v19, %v2059_v25  ;;  %v1748_v19 = vld [vmem:[%s2137_s4 + $0x30] sm:$0xff]  }
 0x50d   : > { %v1047_v37 = vsel %vm679_vm4, %v1043_v35, -inf }
 0x50e   : > { %1048 = vmax.xlane.f32.xlu0 %v1047_v37 }
 0x524   : > { %1067 = vrot.lane.b32.xlu0 %v2007_v31, %s1799_s30 }
 0x593   : > { %v1046_v38 = vpop.xlane.xlu1 %1045 }
 0x594   : > { %v1050_v39 = vsub.f32 %v1042_v30, %v1046_v38 }
 0x596   : > { %v1052_v40 = vmul.f32 1.442695, %v1050_v39 }
 0x597   : > { %v1049_v41 = vpop.xlane.xlu0 %1048 }
 0x598   : > { %1766 = vpow2.f32 %v1052_v40  ;;  %v1051_v42 = vsub.f32 %v1043_v35, %v1049_v41 }
 0x59a   : > { %v1054_v43 = vmul.f32 1.442695, %v1051_v42 }
 0x59b   : > { %v1068_v44 = vpop.permute.xlu0 %1067 }
 0x59c   : > { %1768 = vpow2.f32 %v1054_v43  ;;  %1660 = vmatpush3.bf16.msra.mxu1 %v1068_v44 }
 0x59d   : > { %1673 = vmatprep.subr.bf16.mxu1 %v1795_v18 }
 0x5a5   : > { %v1767_v45 = vpop.eup %1766 }
 0x5a6   : > { %v1056_v46 = vsel %vm679_vm4, %v1767_v45, 0.0 }
 0x5a7   : > { %1057 = vadd.xlane.f32.xlu1 %v1056_v46 }
 0x5a9   : > { %v1769_v47 = vpop.eup %1768 }
 0x5aa   : > { %v1059_v48 = vsel %vm679_vm4, %v1769_v47, 0.0 }
 0x5ab   : > { %1060 = vadd.xlane.f32.xlu1 %v1059_v48  ;;  %v1540_v48 = vld [vmem:[%s2138_s5] ss:$0 sm:$0xff] }
 0x5bc   : > { %1175 = vrot.lane.b32.xlu1 %v1930_v33, %s1800_s16 }
 0x5c0   : > { %1173 = vrot.lane.b32.xlu1 %v1936_v36, %s1800_s16  ;;  %v1745_v36 = vld [vmem:[%s2137_s4 + $0x28] sm:$0xff]  }
 0x5c1   : > { %1666 = vmatpush3.bf16.msra.mxu0 %v1745_v36 }
 0x5c2   : > { %1667 = vmatprep.subr.bf16.mxu0 %v1795_v18 }
 0x5c5   : > { %1668 = vmatpush3.bf16.msra.mxu0 %v1746_v60 }
 0x5c6   : > { %1679 = vmatprep.subr.bf16.mxu0 %v1795_v18 }
 0x630   : > { %v1058_v49 = vpop.xlane.xlu1 %1057 }
 0x631   : > { %1770 = vrcp.f32 %v1058_v49 }
 0x634   : > { %v1061_v50 = vpop.xlane.xlu1 %1060 }
 0x635   : > { %1772 = vrcp.f32 %v1061_v50 }
 0x638   : > { %v1176_v56 = vpop.permute.xlu1 %1175 }
 0x639   : > { %v1181_v58 = vsel %vm627_vm1, %v1176_v56, 0  ;;  %v1367_v56 = vunpack.c.h.bf16 %v1910_v17 }
 0x63c   : > { %v1174_v33 = vpop.permute.xlu1 %1173 }
 0x63e   : > { %v1771_v51 = vpop.eup %1770 }
 0x63f   : > { %v1064_v54 = vmul.f32 %v1771_v51, %v1767_v45 }
 0x642   : > { %v1773_v52 = vpop.eup %1772 }
 0x643   : > { %v1065_v55 = vmul.f32 %v1773_v52, %v1769_v47 }
 0x645   : > { %v1066_v57 = vpack.c.bf16 %v1065_v55, %v1064_v54 }
 0x647   : > { %1662 = vmatmul.mubr.msk.bf16.vlgmr.msra.gmra.mxu1 %vm679_vm4, %v1066_v57 }
 0x648   : > { %1674 = vmatpush3.bf16.xpose.msra.mxu1 %v1181_v58  ;;  %1675 = vmatprep.mubr.msk.bf16.mxu1 %vm1796_vm0, %v1795_v18 }
 0x649   : > { %1685 = vmatprep.subr.bf16.mxu1 %v1795_v18 }
 0x64f   : > { %1676 = vmatmul.mubr.msk.bf16.vlgmr.msra.gmra.mxu1 %vm627_vm1, %v1174_v33 }
 0x650   : > { %1689 = vmatprep.mubr.msk.bf16.mxu1 %vm1796_vm0, %v1795_v18 }
 0x707   : > { %v1107_v61 = vpop.f32.mrf.mxu1 }
 0x709   : > { %v1663_v62 = vpop.f32.mrf.mxu1 }
 0x70b   : > { %v1110_v63 = vpop.f32.mrf.mxu1 }
 0x70c   : > { %v1114_v0 = vpack.c.bf16 %v1110_v63, %v1107_v61 }
 0x70d   : > { %v1664_v1 = vpop.f32.mrf.mxu1 }
 0x70e   : > { %1670 = vmatmul.mubr.msk.bf16.vlgmr.msra.gmra.mxu0 %vm627_vm1, %v1114_v0 }
 0x70f   : > { %v1217_v2 = vpop.f32.mrf.mxu1  ;;  %1681 = vmatprep.mubr.msk.bf16.mxu0 %vm1796_vm0, %v1795_v18 }
 0x710   : > { %v1224_v3 = vmul.f32 0.17677669, %v1217_v2 }
 0x711   : > { %v1677_v4 = vpop.f32.mrf.mxu1 }
 0x712   : > { %v1226_v5 = vadd.f32 %v1224_v3, %v1991_v53 }
 0x713   : > { %v1220_v6 = vpop.f32.mrf.mxu1 }
 0x714   : > { %v1225_v7 = vmul.f32 0.17677669, %v1220_v6  ;;  %v1228_v8 = vsel %vm679_vm4, %v1226_v5, -inf }
 0x715   : > { %1229 = vmax.xlane.f32.xlu0 %v1228_v8  ;;  %v1678_v9 = vpop.f32.mrf.mxu1 }
 0x716   : > { %v1227_v10 = vadd.f32 %v1225_v7, %v1994_v59 }
 0x718   : > { %v1231_v11 = vsel %vm679_vm4, %v1227_v10, -inf }
 0x719   : > { %1232 = vmax.xlane.f32.xlu1 %v1231_v11 }
 0x72a   : > { %1251 = vrot.lane.b32.xlu1 %v2007_v31, %s1800_s16  ;;  %v983_v31 = vadd.f32 %v2053_v15, %v2057_v22  ;;  %v1747_v15 = vld [vmem:[%s2137_s4 + $0x38] sm:$0xff]  }
 0x72b   : > { %1686 = vmatpush3.bf16.msra.mxu1 %v1747_v15 }
 0x72c   : > { %1687 = vmatprep.subr.bf16.mxu1 %v1795_v18  ;;  %v1366_v18 = vunpack.c.l.bf16 %v1910_v17 }
 0x72f   : > { %1688 = vmatpush3.bf16.msra.mxu1 %v1748_v19 }
 0x79e   : > { %v1230_v12 = vpop.xlane.xlu0 %1229 }
 0x79f   : > { %v1234_v13 = vsub.f32 %v1226_v5, %v1230_v12 }
 0x7a1   : > { %v1236_v14 = vmul.f32 1.442695, %v1234_v13 }
 0x7a2   : > { %v1233_v16 = vpop.xlane.xlu1 %1232 }
 0x7a3   : > { %1774 = vpow2.f32 %v1236_v14  ;;  %v1235_v53 = vsub.f32 %v1227_v10, %v1233_v16  ;;  %v1541_v10 = vld [vmem:[%s2139_s6] ss:$0 sm:$0xff] }
 0x7a4   : > { %v1542_v14 = vld [vmem:[%s2140_s7] ss:$0 sm:$0xff] }
 0x7a5   : > { %v1238_v21 = vmul.f32 1.442695, %v1235_v53 }
 0x7a6   : > { %v1252_v24 = vpop.permute.xlu1 %1251 }
 0x7a7   : > { %1776 = vpow2.f32 %v1238_v21  ;;  %1680 = vmatpush3.bf16.msra.mxu0 %v1252_v24 }
 0x7b0   : > { %v1775_v26 = vpop.eup %1774 }
 0x7b1   : > { %v1240_v27 = vsel %vm679_vm4, %v1775_v26, 0.0 }
 0x7b2   : > { %1241 = vadd.xlane.f32.xlu0 %v1240_v27 }
 0x7b4   : > { %v1777_v59 = vpop.eup %1776 }
 0x7b5   : > { %v1243_v28 = vsel %vm679_vm4, %v1777_v59, 0.0 }
 0x7b6   : > { %1244 = vadd.xlane.f32.xlu0 %v1243_v28 }
 0x7ce   : > { %v1164_v29 = vpop.f32.mrf.mxu0 }
 0x7cf   : > { %v1171_v30 = vadd.f32 %v1164_v29, %v983_v31 }
 0x7d0   : > { %v1671_v32 = vpop.f32.mrf.mxu0 }
 0x7d2   : > { %v1167_v20 = vpop.f32.mrf.mxu0 }
 0x7d3   : > { %v1172_v23 = vadd.f32 %v1167_v20, %v986_v34 }
 0x7d4   : > { %v1672_v35 = vpop.f32.mrf.mxu0 }
 0x83b   : > { %v1242_v37 = vpop.xlane.xlu0 %1241 }
 0x83c   : > { %1778 = vrcp.f32 %v1242_v37 }
 0x83f   : > { %v1245_v38 = vpop.xlane.xlu0 %1244 }
 0x840   : > { %1780 = vrcp.f32 %v1245_v38 }
 0x849   : > { %v1779_v39 = vpop.eup %1778 }
 0x84a   : > { %v1248_v41 = vmul.f32 %v1779_v39, %v1775_v26 }
 0x84d   : > { %v1781_v40 = vpop.eup %1780 }
 0x84e   : > { %v1249_v42 = vmul.f32 %v1781_v40, %v1777_v59 }
 0x850   : > { %v1250_v43 = vpack.c.bf16 %v1249_v42, %v1248_v41 }
 0x852   : > { %1682 = vmatmul.mubr.msk.bf16.vlgmr.msra.gmra.mxu0 %vm679_vm4, %v1250_v43 }
 0x912   : > { %v1291_v22 = vpop.f32.mrf.mxu0 }
 0x914   : > { %v1683_v25 = vpop.f32.mrf.mxu0 }
 0x916   : > { %v1294_v44 = vpop.f32.mrf.mxu0 }
 0x917   : > { %v1298_v45 = vpack.c.bf16 %v1294_v44, %v1291_v22 }
 0x918   : > { %v1684_v46 = vpop.f32.mrf.mxu0 }
 0x919   : > { %1690 = vmatmul.mubr.msk.bf16.vlgmr.msra.gmra.mxu1 %vm627_vm1, %v1298_v45 }
 0x9d9   : > { %v1348_v47 = vpop.f32.mrf.mxu1 }
 0x9da   : > { %v1355_v49 = vadd.f32 %v1348_v47, %v1171_v30 }
 0x9db   : > { %v1691_v50 = vpop.f32.mrf.mxu1 }
 0x9dc   : > { %v1364_v51 = vadd.f32 %v1540_v48, %v1355_v49 }
 0x9dd   : > { %v1351_v52 = vpop.f32.mrf.mxu1 }
 0x9de   : > { %v1356_v54 = vadd.f32 %v1351_v52, %v1172_v23  ;;  %v1368_v55 = vadd.f32 %v1366_v18, %v1364_v51 }
 0x9df   : > { %v1692_v57 = vpop.f32.mrf.mxu1 }
 0x9e0   : > { %v1365_v58 = vadd.f32 %v1540_v48, %v1356_v54  ;;  %1370 = vadd.xlane.f32.xlu0 %v1368_v55 }
 0x9e2   : > { %v1369_v33 = vadd.f32 %v1367_v56, %v1365_v58 }
 0x9e4   : > { %1372 = vadd.xlane.f32.xlu0 %v1369_v33 }
 0xa69   : > { %v1371_v36 = vpop.xlane.xlu0 %1370 }
 0xa6a   : > { %v1375_v60 = vmul.f32 0.0078125, %v1371_v36 }
 0xa6c   : > { %v1377_v61 = vsub.f32 %v1368_v55, %v1375_v60 }
 0xa6d   : > { %v1373_v62 = vpop.xlane.xlu0 %1372 }
 0xa6e   : > { %v1376_v63 = vmul.f32 0.0078125, %v1373_v62  ;;  %v1379_v0 = vmul.f32 %v1377_v61, %v1377_v61 }
 0xa70   : > { %v1378_v1 = vsub.f32 %v1369_v33, %v1376_v63  ;;  %1381 = vadd.xlane.f32.xlu0 %v1379_v0 }
 0xa72   : > { %v1380_v2 = vmul.f32 %v1378_v1, %v1378_v1 }
 0xa74   : > { %1383 = vadd.xlane.f32.xlu0 %v1380_v2 }
 0xaf9   : > { %v1382_v3 = vpop.xlane.xlu0 %1381 }
 0xafa   : > { %v1385_v4 = vmul.f32 0.0078125, %v1382_v3 }
 0xafc   : > { %v1387_v5 = vadd.f32 1e-05, %v1385_v4 }
 0xafd   : > { %v1384_v17 = vpop.xlane.xlu0 %1383 }
 0xafe   : > { %1782 = vrsqrt.f32 %v1387_v5  ;;  %v1386_v6 = vmul.f32 0.0078125, %v1384_v17 }
 0xb00   : > { %v1388_v7 = vadd.f32 1e-05, %v1386_v6 }
 0xb02   : > { %1784 = vrsqrt.f32 %v1388_v7 }
 0xb0b   : > { %v1783_v8 = vpop.eup %1782 }
 0xb0c   : > { %v1391_v9 = vmul.f32 %v1783_v8, %v1377_v61 }
 0xb0e   : > { %v1400_v12 = vmul.f32 %v1541_v10, %v1391_v9 }
 0xb0f   : > { %v1785_v11 = vpop.eup %1784 }
 0xb10   : > { %v1392_v13 = vmul.f32 %v1785_v11, %v1378_v1  ;;  %v1409_v53 = vadd.f32 %v1542_v14, %v1400_v12 }
 0xb12   : > { %v1401_v16 = vmul.f32 %v1541_v10, %v1392_v13 }
 0xb14   : > { %v1410_v21 = vadd.f32 %v1542_v14, %v1401_v16 }
 0xb16   : > { %v1554_v24 = vpack.c.bf16 %v1410_v21, %v1409_v53 }
 0xb18   : > { %1555 = vst [vmem:[%s319_s14] sm:$0xff] %v1554_v24  }
 0xb19 PF: > { %s18_s27 = sadd.s32 1, %s1792_s27  }
 0xb1a   : > { %p15_p4 = scmp.ge.s32.totalorder %s18_s27, 4  }
 0xb1c   :  { %17 = sbr.rel (!%p15_p4) target bundleno = 1 (0x1), region = 85 }

// kernel: transformer_decoder_forward.10
= control target key start
LH: loop header
LB: loop body
LE: loop exit
PB: predicated region body
PF: predicated region fallthrough
CT: control target
= control target key end

     0   :  { %s1906_s13 = smov 0   ;;  %s2172_s0 = inlined_call_operand.vmem [shape: bf16[2,16,128], index: 0, kind: input, shape index: {}]   ;;  %s2173_s1 = inlined_call_operand.vmem [shape: bf16[2,16,128], index: 1, kind: input, shape index: {}]   ;;  %s2174_s2 = inlined_call_operand.vmem [shape: bf16[128,128], index: 2, kind: input, shape index: {}]   ;;  %s2175_s3 = inlined_call_operand.vmem [shape: f32[1,128], index: 3, kind: input, shape index: {}, may-alias: {3,7,9}]   ;;  %s2176_s4 = inlined_call_operand.vmem [shape: bf16[128,256], index: 4, kind: input, shape index: {}]   ;;  %s2177_s5 = inlined_call_operand.vmem [shape: f32[1,256], index: 5, kind: input, shape index: {}]   ;;  %s2178_s6 = inlined_call_operand.vmem [shape: bf16[128,128], index: 6, kind: input, shape index: {}]   ;;  %s2179_s7 = inlined_call_operand.vmem [shape: f32[1,128], index: 7, kind: input, shape index: {}, may-alias: {3,7,9}]   ;;  %s2180_s8 = inlined_call_operand.vmem [shape: f32[1,128], index: 8, kind: input, shape index: {}]   ;;  %s2181_s9 = inlined_call_operand.vmem [shape: f32[1,128], index: 9, kind: input, shape index: {}, may-alias: {3,7,9}]   ;;  %s2182_s10 = inlined_call_operand.vmem [shape: bf16[2,16,128], index: 10, kind: output, shape index: {}]  }
   0x1 LB: > { %s1532_s14 = sadd.s32 4294967295, %s1843_s13   ;;  %p1536_p0 = scmp.ge.s32.totalorder %s1843_s13, 1  ;;  %s1843_s13 = sphi %s1906_s13, %s20_s13  }
   0x2   : > { %p322_p1 = scmp.lt.s32.totalorder %s1843_s13, 3 }
   0x4   : > { %p323_p2 = pnand %p1536_p0, %p322_p1 }
   0x5   : > { %p365_p3 = scmp.lt.s32.totalorder (!%p323_p2), %s1532_s14, 1  ;;  %s1848_s19 = smov (!%p323_p2), 96  }
   0x6   : > { %326 = sbr.rel (%p323_p2) target bundleno = 2834 (0xb12), region = 60  ;;  %s1849_s20 = smov (!%p323_p2), 64  }
   0x7   : > { %s1850_s30 = smov (!%p323_p2), 32  }
   0xb   : > { %v1758_v0 = vld [vmem:[%s2176_s4 + $0x74] ss:$8 sps:$4 sm:$0xff]   ;;  %v1760_v1 = vld [vmem:[%s2176_s4 + $0x70] ss:$8 sps:$4 sm:$0xff]   ;;  %v1845_v2 = vmov 0.0   ;;  %v1846_v3 = vmov 0   ;;  %v522_v28 = vlaneseq }
   0xc   : > { %1644 = vmatprep.subr.bf16.mxu0 %v1845_v2  ;;  %650 = vmatprep.mubr.bf16.mxu1 %v1846_v3  ;;  %v1761_v4 = vld [vmem:[%s2174_s2 + $0x38] sm:$0xff]   ;;  %v1762_v5 = vld [vmem:[%s2176_s4 + $0x64] ss:$8 sps:$4 sm:$0xff]   ;;  %v1764_v6 = vld [vmem:[%s2176_s4 + $0x60] ss:$8 sps:$4 sm:$0xff]   ;;  %vm1847_vm0 = vmmov 0  }
   0xd   : > { %618 = vmatprep.subr.bf16.mxu1 %v1758_v0  ;;  %1660 = vmatprep.mubr.msk.bf16.mxu0 %vm1847_vm0, %v1845_v2  ;;  %v1765_v7 = vld [vmem:[%s2174_s2 + $0x30] sm:$0xff]   ;;  %v1769_v10 = vld [vmem:[%s2174_s2 + $0x28] sm:$0xff]   ;;  %s2184_s14 = smov (!%p365_p3, %s1532_s14), 1  ;;  %v1773_v13 = vld [vmem:[%s2174_s2 + $0x20] sm:$0xff]   ;;  %v523_v29 = vshrl.u32 %v522_v28, 7  ;;  %vm679_vm1 = vcmask 261120  }
   0xe   : > { %619 = vmatpush1.bf16.msra.mxu1 %v1760_v1  ;;  %1645 = vmatpush3.bf16.msra.mxu0 %v1761_v4  ;;  %v1766_v8 = vld [vmem:[%s2176_s4 + $0x54] ss:$8 sps:$4 sm:$0xff]   ;;  %v1768_v9 = vld [vmem:[%s2176_s4 + $0x50] ss:$8 sps:$4 sm:$0xff]   ;;  %v1770_v11 = vld [vmem:[%s2176_s4 + $0x44] ss:$8 sps:$4 sm:$0xff]  }
   0xf   : > { %620 = vmatprep.subr.bf16.mxu1 %v1762_v5  ;;  %1646 = vmatprep.subr.bf16.mxu0 %v1845_v2  ;;  %v1772_v12 = vld [vmem:[%s2176_s4 + $0x40] ss:$8 sps:$4 sm:$0xff]   ;;  %v1774_v14 = vld [vmem:[%s2176_s4 + $0x34] ss:$8 sps:$4 sm:$0xff]   ;;  %v1776_v15 = vld [vmem:[%s2176_s4 + $0x30] ss:$8 sps:$4 sm:$0xff]  }
  0x10   : > { %s1966_s25 = sshll.u32 %s2184_s14, 3  ;;  %v1777_v16 = vld [vmem:[%s2174_s2 + $0x18] sm:$0xff]   ;;  %v1778_v17 = vld [vmem:[%s2176_s4 + $0x24] ss:$8 sps:$4 sm:$0xff]   ;;  %v1780_v18 = vld [vmem:[%s2176_s4 + $0x20] ss:$8 sps:$4 sm:$0xff]  }
  0x11   : > { %s374_s14 = scalar_lea.vmem %s2173_s1, %s1966_s25  ;;  %v1781_v19 = vld [vmem:[%s2174_s2 + $0x10] sm:$0xff]   ;;  %v1785_v22 = vld [vmem:[%s2174_s2 + $0x8] sm:$0xff]   ;;  %s369_s29 = scalar_lea.vmem %s2172_s0, %s1966_s25  ;;  %v1789_v25 = vld [vmem:[%s2174_s2] sm:$0xff]   ;;  %v524_v30 = vsub.s32 0, %v523_v29  ;;  %v528_v32 = vsub.s32 1, %v523_v29  ;;  %vm729_vm2 = vcmask 130048  }
  0x12   : > { %621 = vmatpush1.bf16.msra.mxu1 %v1764_v6  ;;  %1647 = vmatpush3.bf16.msra.mxu0 %v1765_v7  ;;  %v1782_v20 = vld [vmem:[%s2176_s4 + $0x14] ss:$8 sps:$4 sm:$0xff]   ;;  %v1784_v21 = vld [vmem:[%s2176_s4 + $0x10] ss:$8 sps:$4 sm:$0xff]   ;;  %v1786_v23 = vld [vmem:[%s2176_s4 + $0x4] ss:$8 sps:$4 sm:$0xff]  }
  0x13   : > { %622 = vmatprep.subr.bf16.mxu1 %v1766_v8  ;;  %1648 = vmatprep.subr.bf16.mxu0 %v1845_v2  ;;  %v1788_v24 = vld [vmem:[%s2176_s4] ss:$8 sps:$4 sm:$0xff]  }
  0x14   : > { %v2009_v26 = vld [vmem:[%s369_s29] sm:$0xff]   ;;  %s379_s29 = scalar_lea.vmem %s2182_s10, %s1966_s25 }
  0x15   : > { %v1790_v27 = vld [vmem:[%s374_s14] sm:$0xff]  }
  0x16   : > { %623 = vmatpush1.bf16.msra.mxu1 %v1768_v9  ;;  %1649 = vmatpush3.bf16.msra.mxu0 %v1769_v10  ;;  %v520_v31 = vld [vmem:[%s2177_s5] sm:$0x3] }
  0x17   : > { %624 = vmatprep.subr.bf16.mxu1 %v1770_v11  ;;  %1650 = vmatprep.subr.bf16.mxu0 %v1845_v2  ;;  %v525_v34 = vrot.slane %v520_v31, %v524_v30  ;;  %v1543_v37 = vld [vmem:[%s2175_s3] ss:$0 sm:$0xff]  ;;  %v529_v38 = vrot.slane %v520_v31, %v528_v32 }
  0x1a   : > { %625 = vmatpush1.bf16.msra.mxu1 %v1772_v12  ;;  %1651 = vmatpush3.bf16.msra.mxu0 %v1773_v13 }
  0x1b   : > { %626 = vmatprep.subr.bf16.mxu1 %v1774_v14  ;;  %1652 = vmatprep.subr.bf16.mxu0 %v1845_v2 }
  0x1e   : > { %627 = vmatpush1.bf16.msra.mxu1 %v1776_v15  ;;  %1653 = vmatpush3.bf16.msra.mxu0 %v1777_v16 }
  0x1f   : > { %628 = vmatprep.subr.bf16.mxu1 %v1778_v17  ;;  %1654 = vmatprep.subr.bf16.mxu0 %v1845_v2 }
  0x22   : > { %629 = vmatpush1.bf16.msra.mxu1 %v1780_v18  ;;  %1655 = vmatpush3.bf16.msra.mxu0 %v1781_v19 }
  0x23   : > { %630 = vmatprep.subr.bf16.mxu1 %v1782_v20  ;;  %1656 = vmatprep.subr.bf16.mxu0 %v1845_v2 }
  0x26   : > { %631 = vmatpush1.bf16.msra.mxu1 %v1784_v21  ;;  %1657 = vmatpush3.bf16.msra.mxu0 %v1785_v22 }
  0x27   : > { %632 = vmatprep.subr.bf16.mxu1 %v1786_v23  ;;  %1658 = vmatprep.subr.bf16.mxu0 %v1845_v2 }
  0x2a   : > { %633 = vmatpush1.bf16.msra.mxu1 %v1788_v24  ;;  %1659 = vmatpush3.bf16.msra.mxu0 %v1789_v25 }
  0x2b   : > { %1670 = vmatprep.subr.bf16.mxu1 %v1845_v2  ;;  %1664 = vmatprep.subr.bf16.mxu0 %v1845_v2 }
  0x2d   : > { %651 = vmatmul.mubr.bf16.vlgmr.msra.gmra.mxu1 %v1790_v27  ;;  %1661 = vmatmul.mubr.bf16.vlgmr.msra.gmra.mxu0 %v2009_v26 }
  0x2e   : > { %1672 = vmatprep.mubr.msk.bf16.mxu1 %vm1847_vm0, %v1845_v2  ;;  %1666 = vmatprep.mubr.msk.bf16.mxu0 %vm1847_vm0, %v1845_v2 }
  0xed   : > { %v652_v33 = vpop.f32.mrf.mxu1  ;;  %v496_v35 = vpop.f32.mrf.mxu0 }
  0xee   : > { %v653_v41 = vadd.f32 %v652_v33, %v525_v34  ;;  %v497_v42 = vadd.f32 %v1543_v37, %v496_v35 }
  0xef   : > { %v654_v36 = vpop.f32.mrf.mxu1  ;;  %v1662_v39 = vpop.f32.mrf.mxu0 }
  0xf0   : > { %v655_v47 = vadd.f32 %v654_v36, %v529_v38 }
  0xf1   : > { %v656_v40 = vpop.f32.mrf.mxu1  ;;  %v499_v44 = vpop.f32.mrf.mxu0 }
  0xf2   : > { %v657_v43 = vadd.f32 %v656_v40, %v525_v34  ;;  %v500_v46 = vadd.f32 %v1543_v37, %v499_v44 }
  0xf3   : > { %v658_v45 = vpop.f32.mrf.mxu1  ;;  %v1663_v50 = vpop.f32.mrf.mxu0 }
  0xf4   : > { %v2025_v48 = vpack.c.bf16 %v657_v43, %v653_v41  ;;  %v659_v49 = vadd.f32 %v658_v45, %v529_v38  ;;  %v2029_v52 = vpack.c.bf16 %v500_v46, %v497_v42  ;;  %v1794_v38 = vld [vmem:[%s2178_s6 + $0x18] sm:$0xff]   ;;  %v1792_v46 = vld [vmem:[%s2178_s6 + $0x8] sm:$0xff]   ;;  %v1795_v50 = vld [vmem:[%s2178_s6 + $0x10] sm:$0xff]  }
  0xf6   : > { %v2027_v51 = vpack.c.bf16 %v659_v49, %v655_v47  ;;  %802 = vrot.lane.b32.xlu0 %v2025_v48, %s1848_s19  ;;  %v684_v53 = vsel %vm679_vm1, %v2025_v48, 0  ;;  %v1793_v49 = vld [vmem:[%s2178_s6] sm:$0xff]  }
  0xf7   : > { %1665 = vmatpush3.bf16.xpose.msra.mxu0 %v684_v53 }
  0xf8   : > { %1671 = vmatpush3.bf16.msra.mxu1 %v2027_v51  ;;  %1676 = vmatprep.subr.bf16.mxu0 %v1845_v2 }
  0xf9   : > { %1682 = vmatprep.subr.bf16.mxu1 %v1845_v2 }
  0xfa   : > { %799 = vrot.lane.b32.xlu0 %v2029_v52, %s1848_s19 }
  0xfe   : > { %1667 = vmatmul.mubr.msk.bf16.vlgmr.msra.gmra.mxu0 %vm679_vm1, %v2029_v52 }
  0xff   : > { %1678 = vmatprep.mubr.msk.bf16.mxu0 %vm1847_vm0, %v1845_v2 }
 0x168   : > { %v803_v54 = vpop.permute.xlu0 %802 }
 0x169   : > { %v808_v55 = vsel %vm679_vm1, %v803_v54, 0 }
 0x16a   : > { %1677 = vmatpush3.bf16.xpose.msra.mxu0 %v808_v55 }
 0x16b   : > { %1688 = vmatprep.subr.bf16.mxu0 %v1845_v2 }
 0x16c   : > { %v800_v56 = vpop.permute.xlu0 %799 }
 0x171   : > { %1679 = vmatmul.mubr.msk.bf16.vlgmr.msra.gmra.mxu0 %vm679_vm1, %v800_v56 }
 0x172   : > { %1692 = vmatprep.mubr.msk.bf16.mxu0 %vm1847_vm0, %v1845_v2  ;;  %1689 = vmatpush3.bf16.msra.mxu0 %v1794_v38 }
 0x173   : > { %1690 = vmatprep.subr.bf16.mxu0 %v1845_v2 }
 0x176   : > { %1691 = vmatpush3.bf16.msra.mxu0 %v1795_v50 }
 0x177   : > { %1704 = vmatprep.subr.bf16.mxu0 %v1845_v2 }
 0x1be   : > { %v720_v57 = vpop.f32.mrf.mxu0 }
 0x1bf   : > { %v727_v58 = vmul.f32 0.17677669, %v720_v57 }
 0x1c0   : > { %v1668_v59 = vpop.f32.mrf.mxu0 }
 0x1c1   : > { %v730_v60 = vsel %vm729_vm2, %v727_v58, -inf }
 0x1c2   : > { %731 = vmax.xlane.f32.xlu1 %v730_v60  ;;  %v723_v61 = vpop.f32.mrf.mxu0 }
 0x1c3   : > { %v728_v62 = vmul.f32 0.17677669, %v723_v61 }
 0x1c4   : > { %v1669_v63 = vpop.f32.mrf.mxu0 }
 0x1c5   : > { %v733_v0 = vsel %vm729_vm2, %v728_v62, -inf }
 0x1c6   : > { %734 = vmax.xlane.f32.xlu1 %v733_v0 }
 0x231   : > { %v844_v1 = vpop.f32.mrf.mxu0 }
 0x232   : > { %v851_v3 = vmul.f32 0.17677669, %v844_v1 }
 0x233   : > { %v1680_v4 = vpop.f32.mrf.mxu0 }
 0x234   : > { %v853_v5 = vsel %vm729_vm2, %v851_v3, -inf }
 0x235   : > { %854 = vmax.xlane.f32.xlu0 %v853_v5  ;;  %v847_v6 = vpop.f32.mrf.mxu0 }
 0x236   : > { %v852_v7 = vmul.f32 0.17677669, %v847_v6 }
 0x237   : > { %v1681_v8 = vpop.f32.mrf.mxu0 }
 0x238   : > { %v856_v9 = vsel %vm729_vm2, %v852_v7, -inf }
 0x239   : > { %857 = vmax.xlane.f32.xlu1 %v856_v9 }
 0x24b   : > { %v732_v10 = vpop.xlane.xlu1 %731  ;;  %1039 = vrot.lane.b32.xlu0 %v2025_v48, %s1849_s20 }
 0x24c   : > { %v736_v11 = vsub.f32 %v727_v58, %v732_v10 }
 0x24e   : > { %v738_v12 = vmul.f32 1.442695, %v736_v11 }
 0x24f   : > { %v735_v13 = vpop.xlane.xlu1 %734 }
 0x250   : > { %1801 = vpow2.f32 %v738_v12  ;;  %v737_v14 = vsub.f32 %v728_v62, %v735_v13 }
 0x252   : > { %v740_v15 = vmul.f32 1.442695, %v737_v14 }
 0x254   : > { %1803 = vpow2.f32 %v740_v15 }
 0x25d   : > { %v1802_v16 = vpop.eup %1801 }
 0x25e   : > { %v742_v17 = vsel %vm729_vm2, %v1802_v16, 0.0 }
 0x25f   : > { %743 = vadd.xlane.f32.xlu1 %v742_v17 }
 0x261   : > { %v1804_v18 = vpop.eup %1803 }
 0x262   : > { %v745_v19 = vsel %vm729_vm2, %v1804_v18, 0.0 }
 0x263   : > { %746 = vadd.xlane.f32.xlu1 %v745_v19 }
 0x2be   : > { %v855_v20 = vpop.xlane.xlu0 %854 }
 0x2bf   : > { %v859_v21 = vsub.f32 %v851_v3, %v855_v20 }
 0x2c1   : > { %v861_v22 = vmul.f32 1.442695, %v859_v21 }
 0x2c2   : > { %v858_v23 = vpop.xlane.xlu1 %857  ;;  %v1040_v60 = vpop.permute.xlu0 %1039 }
 0x2c3   : > { %1805 = vpow2.f32 %v861_v22  ;;  %v860_v24 = vsub.f32 %v852_v7, %v858_v23  ;;  %v1045_v0 = vsel %vm679_vm1, %v1040_v60, 0 }
 0x2c5   : > { %v863_v25 = vmul.f32 1.442695, %v860_v24 }
 0x2c7   : > { %1807 = vpow2.f32 %v863_v25 }
 0x2d0   : > { %v1806_v27 = vpop.eup %1805 }
 0x2d1   : > { %v865_v28 = vsel %vm729_vm2, %v1806_v27, 0.0 }
 0x2d2   : > { %866 = vadd.xlane.f32.xlu1 %v865_v28 }
 0x2d4   : > { %v1808_v29 = vpop.eup %1807 }
 0x2d5   : > { %v868_v30 = vsel %vm729_vm2, %v1808_v29, 0.0 }
 0x2d6   : > { %869 = vadd.xlane.f32.xlu1 %v868_v30 }
 0x2e7   : > { %877 = vrot.lane.b32.xlu1 %v2027_v51, %s1848_s19 }
 0x2e8   : > { %v744_v31 = vpop.xlane.xlu1 %743 }
 0x2e9   : > { %1809 = vrcp.f32 %v744_v31 }
 0x2eb   : > { %1037 = vrot.lane.b32.xlu1 %v2029_v52, %s1849_s20 }
 0x2ec   : > { %v747_v32 = vpop.xlane.xlu1 %746 }
 0x2ed   : > { %1811 = vrcp.f32 %v747_v32 }
 0x2f6   : > { %v1810_v33 = vpop.eup %1809 }
 0x2f7   : > { %v750_v35 = vmul.f32 %v1810_v33, %v1802_v16 }
 0x2fa   : > { %v1812_v34 = vpop.eup %1811 }
 0x2fb   : > { %v751_v36 = vmul.f32 %v1812_v34, %v1804_v18 }
 0x2fd   : > { %v752_v37 = vpack.c.bf16 %v751_v36, %v750_v35 }
 0x2ff   : > { %1673 = vmatmul.mubr.msk.bf16.vlgmr.msra.gmra.mxu1 %vm729_vm2, %v752_v37 }
 0x300   : > { %1684 = vmatprep.mubr.msk.bf16.mxu1 %vm1847_vm0, %v1845_v2 }
 0x35b   : > { %v867_v39 = vpop.xlane.xlu1 %866 }
 0x35c   : > { %1813 = vrcp.f32 %v867_v39 }
 0x35f   : > { %v870_v40 = vpop.xlane.xlu1 %869 }
 0x360   : > { %1815 = vrcp.f32 %v870_v40  ;;  %v1797_v40 = vld [vmem:[%s2178_s6 + $0x20] sm:$0xff]  }
 0x363   : > { %v878_v41 = vpop.permute.xlu1 %877 }
 0x364   : > { %1683 = vmatpush3.bf16.msra.mxu1 %v878_v41 }
 0x365   : > { %1696 = vmatprep.subr.bf16.mxu1 %v1845_v2 }
 0x367   : > { %v1038_v1 = vpop.permute.xlu1 %1037 }
 0x369   : > { %v1814_v42 = vpop.eup %1813 }
 0x36a   : > { %v873_v44 = vmul.f32 %v1814_v42, %v1806_v27 }
 0x36d   : > { %v1816_v43 = vpop.eup %1815 }
 0x36e   : > { %v874_v45 = vmul.f32 %v1816_v43, %v1808_v29 }
 0x370   : > { %v875_v47 = vpack.c.bf16 %v874_v45, %v873_v44 }
 0x372   : > { %1685 = vmatmul.mubr.msk.bf16.vlgmr.msra.gmra.mxu1 %vm729_vm2, %v875_v47 }
 0x373   : > { %1697 = vmatpush3.bf16.msra.mxu1 %v1792_v46  ;;  %1700 = vmatprep.mubr.msk.bf16.mxu1 %vm1847_vm0, %v1845_v2 }
 0x374   : > { %1698 = vmatprep.subr.bf16.mxu1 %v1845_v2 }
 0x377   : > { %1699 = vmatpush3.bf16.msra.mxu1 %v1793_v49 }
 0x378   : > { %1710 = vmatprep.subr.bf16.mxu1 %v1845_v2 }
 0x3bf   : > { %v790_v53 = vpop.f32.mrf.mxu1 }
 0x3c1   : > { %v1674_v54 = vpop.f32.mrf.mxu1 }
 0x3c3   : > { %v793_v55 = vpop.f32.mrf.mxu1 }
 0x3c4   : > { %v797_v56 = vpack.c.bf16 %v793_v55, %v790_v53 }
 0x3c5   : > { %v1675_v57 = vpop.f32.mrf.mxu1 }
 0x3c6   : > { %1701 = vmatmul.mubr.msk.bf16.vlgmr.msra.gmra.mxu1 %vm679_vm1, %v797_v56 }
 0x3c7   : > { %1712 = vmatprep.mubr.msk.bf16.mxu1 %vm1847_vm0, %v1845_v2 }
 0x432   : > { %v917_v58 = vpop.f32.mrf.mxu1 }
 0x434   : > { %v1686_v59 = vpop.f32.mrf.mxu1 }
 0x436   : > { %v920_v61 = vpop.f32.mrf.mxu1 }
 0x437   : > { %v924_v62 = vpack.c.bf16 %v920_v61, %v917_v58 }
 0x438   : > { %v1687_v63 = vpop.f32.mrf.mxu1 }
 0x439   : > { %1693 = vmatmul.mubr.msk.bf16.vlgmr.msra.gmra.mxu0 %vm679_vm1, %v924_v62 }
 0x43a   : > { %1705 = vmatpush3.bf16.xpose.msra.mxu0 %v1045_v0  ;;  %1706 = vmatprep.mubr.msk.bf16.mxu0 %vm1847_vm0, %v1845_v2 }
 0x43b   : > { %1716 = vmatprep.subr.bf16.mxu0 %v1845_v2 }
 0x441   : > { %1707 = vmatmul.mubr.msk.bf16.vlgmr.msra.gmra.mxu0 %vm679_vm1, %v1038_v1 }
 0x442   : > { %1720 = vmatprep.mubr.msk.bf16.mxu0 %vm1847_vm0, %v1845_v2 }
 0x486   : > { %v2097_v3 = vpop.f32.mrf.mxu1 }
 0x488   : > { %v1702_v4 = vpop.f32.mrf.mxu1 }
 0x48a   : > { %v2099_v5 = vpop.f32.mrf.mxu1 }
 0x48c   : > { %v1703_v6 = vpop.f32.mrf.mxu1 }
 0x4f9   : > { %v2101_v7 = vpop.f32.mrf.mxu0 }
 0x4fb   : > { %v1694_v8 = vpop.f32.mrf.mxu0 }
 0x4fd   : > { %v2103_v9 = vpop.f32.mrf.mxu0 }
 0x4ff   : > { %v1695_v10 = vpop.f32.mrf.mxu0 }
 0x501   : > { %v1081_v11 = vpop.f32.mrf.mxu0 }
 0x502   : > { %v1088_v12 = vmul.f32 0.17677669, %v1081_v11 }
 0x503   : > { %v1708_v13 = vpop.f32.mrf.mxu0 }
 0x504   : > { %v1090_v14 = vsel %vm729_vm2, %v1088_v12, -inf }
 0x505   : > { %1091 = vmax.xlane.f32.xlu1 %v1090_v14  ;;  %v1084_v15 = vpop.f32.mrf.mxu0 }
 0x506   : > { %v1089_v16 = vmul.f32 0.17677669, %v1084_v15 }
 0x507   : > { %v1709_v17 = vpop.f32.mrf.mxu0 }
 0x508   : > { %v1093_v18 = vsel %vm729_vm2, %v1089_v16, -inf }
 0x509   : > { %1094 = vmax.xlane.f32.xlu0 %v1093_v18 }
 0x51f   : > { %1113 = vrot.lane.b32.xlu0 %v2027_v51, %s1849_s20 }
 0x58e   : > { %v1092_v19 = vpop.xlane.xlu1 %1091 }
 0x58f   : > { %v1096_v20 = vsub.f32 %v1088_v12, %v1092_v19  ;;  %v1034_v12 = vadd.f32 %v2099_v5, %v2103_v9  ;;  %v1799_v5 = vld [vmem:[%s2178_s6 + $0x30] sm:$0xff]  }
 0x591   : > { %v1098_v21 = vmul.f32 1.442695, %v1096_v20 }
 0x592   : > { %v1095_v22 = vpop.xlane.xlu0 %1094 }
 0x593   : > { %1817 = vpow2.f32 %v1098_v21  ;;  %v1097_v23 = vsub.f32 %v1089_v16, %v1095_v22 }
 0x595   : > { %v1100_v24 = vmul.f32 1.442695, %v1097_v23 }
 0x596   : > { %v1114_v25 = vpop.permute.xlu0 %1113 }
 0x597   : > { %1819 = vpow2.f32 %v1100_v24  ;;  %1711 = vmatpush3.bf16.msra.mxu1 %v1114_v25 }
 0x598   : > { %1724 = vmatprep.subr.bf16.mxu1 %v1845_v2 }
 0x5a0   : > { %v1818_v27 = vpop.eup %1817 }
 0x5a1   : > { %v1102_v28 = vsel %vm729_vm2, %v1818_v27, 0.0 }
 0x5a2   : > { %1103 = vadd.xlane.f32.xlu1 %v1102_v28  ;;  %v1590_v28 = vld [vmem:[%s2179_s7] ss:$0 sm:$0xff] }
 0x5a4   : > { %v1820_v29 = vpop.eup %1819 }
 0x5a5   : > { %v1105_v30 = vsel %vm729_vm2, %v1820_v29, 0.0 }
 0x5a6   : > { %1106 = vadd.xlane.f32.xlu1 %v1105_v30 }
 0x5b7   : > { %1221 = vrot.lane.b32.xlu1 %v2025_v48, %s1850_s30 }
 0x5bb   : > { %1219 = vrot.lane.b32.xlu1 %v2029_v52, %s1850_s30  ;;  %v1796_v52 = vld [vmem:[%s2178_s6 + $0x28] sm:$0xff]  }
 0x5bc   : > { %1717 = vmatpush3.bf16.msra.mxu0 %v1796_v52 }
 0x5bd   : > { %1718 = vmatprep.subr.bf16.mxu0 %v1845_v2 }
 0x5c0   : > { %1719 = vmatpush3.bf16.msra.mxu0 %v1797_v40 }
 0x5c1   : > { %1730 = vmatprep.subr.bf16.mxu0 %v1845_v2 }
 0x62b   : > { %v1104_v31 = vpop.xlane.xlu1 %1103 }
 0x62c   : > { %1821 = vrcp.f32 %v1104_v31 }
 0x62f   : > { %v1107_v32 = vpop.xlane.xlu1 %1106 }
 0x630   : > { %1823 = vrcp.f32 %v1107_v32 }
 0x633   : > { %v1222_v37 = vpop.permute.xlu1 %1221 }
 0x634   : > { %v1227_v39 = vsel %vm679_vm1, %v1222_v37, 0 }
 0x637   : > { %v1220_v48 = vpop.permute.xlu1 %1219 }
 0x639   : > { %v1822_v33 = vpop.eup %1821 }
 0x63a   : > { %v1110_v35 = vmul.f32 %v1822_v33, %v1818_v27 }
 0x63d   : > { %v1824_v34 = vpop.eup %1823 }
 0x63e   : > { %v1111_v36 = vmul.f32 %v1824_v34, %v1820_v29 }
 0x640   : > { %v1112_v38 = vpack.c.bf16 %v1111_v36, %v1110_v35  ;;  %v1411_v35 = vunpack.c.h.bf16 %v2009_v26 }
 0x642   : > { %1713 = vmatmul.mubr.msk.bf16.vlgmr.msra.gmra.mxu1 %vm729_vm2, %v1112_v38 }
 0x643   : > { %1725 = vmatpush3.bf16.xpose.msra.mxu1 %v1227_v39  ;;  %1726 = vmatprep.mubr.msk.bf16.mxu1 %vm1847_vm0, %v1845_v2 }
 0x644   : > { %1736 = vmatprep.subr.bf16.mxu1 %v1845_v2 }
 0x64a   : > { %1727 = vmatmul.mubr.msk.bf16.vlgmr.msra.gmra.mxu1 %vm679_vm1, %v1220_v48 }
 0x64b   : > { %1740 = vmatprep.mubr.msk.bf16.mxu1 %vm1847_vm0, %v1845_v2 }
 0x702   : > { %v1153_v41 = vpop.f32.mrf.mxu1 }
 0x704   : > { %v1714_v42 = vpop.f32.mrf.mxu1 }
 0x706   : > { %v1156_v43 = vpop.f32.mrf.mxu1 }
 0x707   : > { %v1160_v44 = vpack.c.bf16 %v1156_v43, %v1153_v41 }
 0x708   : > { %v1715_v45 = vpop.f32.mrf.mxu1 }
 0x709   : > { %1721 = vmatmul.mubr.msk.bf16.vlgmr.msra.gmra.mxu0 %vm679_vm1, %v1160_v44 }
 0x70a   : > { %v1263_v46 = vpop.f32.mrf.mxu1  ;;  %1732 = vmatprep.mubr.msk.bf16.mxu0 %vm1847_vm0, %v1845_v2 }
 0x70b   : > { %v1270_v47 = vmul.f32 0.17677669, %v1263_v46 }
 0x70c   : > { %v1728_v49 = vpop.f32.mrf.mxu1 }
 0x70d   : > { %v1272_v50 = vsel %vm729_vm2, %v1270_v47, -inf }
 0x70e   : > { %1273 = vmax.xlane.f32.xlu0 %v1272_v50  ;;  %v1266_v53 = vpop.f32.mrf.mxu1 }
 0x70f   : > { %v1271_v54 = vmul.f32 0.17677669, %v1266_v53 }
 0x710   : > { %v1729_v55 = vpop.f32.mrf.mxu1 }
 0x711   : > { %v1275_v56 = vsel %vm729_vm2, %v1271_v54, -inf  ;;  %v1591_v55 = vld [vmem:[%s2180_s8] ss:$0 sm:$0xff] }
 0x712   : > { %1276 = vmax.xlane.f32.xlu1 %v1275_v56 }
 0x723   : > { %1295 = vrot.lane.b32.xlu1 %v2027_v51, %s1850_s30  ;;  %v1031_v51 = vadd.f32 %v2097_v3, %v2101_v7  ;;  %v1798_v3 = vld [vmem:[%s2178_s6 + $0x38] sm:$0xff]  }
 0x724   : > { %1737 = vmatpush3.bf16.msra.mxu1 %v1798_v3 }
 0x725   : > { %1738 = vmatprep.subr.bf16.mxu1 %v1845_v2  ;;  %v1410_v2 = vunpack.c.l.bf16 %v2009_v26 }
 0x728   : > { %1739 = vmatpush3.bf16.msra.mxu1 %v1799_v5 }
 0x797   : > { %v1274_v57 = vpop.xlane.xlu0 %1273 }
 0x798   : > { %v1278_v58 = vsub.f32 %v1270_v47, %v1274_v57 }
 0x79a   : > { %v1280_v59 = vmul.f32 1.442695, %v1278_v58 }
 0x79b   : > { %v1277_v60 = vpop.xlane.xlu1 %1276 }
 0x79c   : > { %1825 = vpow2.f32 %v1280_v59  ;;  %v1279_v61 = vsub.f32 %v1271_v54, %v1277_v60  ;;  %v1592_v59 = vld [vmem:[%s2181_s9] ss:$0 sm:$0xff] }
 0x79e   : > { %v1282_v62 = vmul.f32 1.442695, %v1279_v61 }
 0x79f   : > { %v1296_v63 = vpop.permute.xlu1 %1295 }
 0x7a0   : > { %1827 = vpow2.f32 %v1282_v62  ;;  %1731 = vmatpush3.bf16.msra.mxu0 %v1296_v63 }
 0x7a9   : > { %v1826_v0 = vpop.eup %1825 }
 0x7aa   : > { %v1284_v1 = vsel %vm729_vm2, %v1826_v0, 0.0 }
 0x7ab   : > { %1285 = vadd.xlane.f32.xlu0 %v1284_v1 }
 0x7ad   : > { %v1828_v4 = vpop.eup %1827 }
 0x7ae   : > { %v1287_v6 = vsel %vm729_vm2, %v1828_v4, 0.0 }
 0x7af   : > { %1288 = vadd.xlane.f32.xlu0 %v1287_v6 }
 0x7c9   : > { %v1210_v8 = vpop.f32.mrf.mxu0 }
 0x7ca   : > { %v1217_v10 = vadd.f32 %v1210_v8, %v1031_v51 }
 0x7cb   : > { %v1722_v11 = vpop.f32.mrf.mxu0 }
 0x7cd   : > { %v1213_v13 = vpop.f32.mrf.mxu0 }
 0x7ce   : > { %v1218_v14 = vadd.f32 %v1213_v13, %v1034_v12 }
 0x7cf   : > { %v1723_v15 = vpop.f32.mrf.mxu0 }
 0x834   : > { %v1286_v16 = vpop.xlane.xlu0 %1285 }
 0x835   : > { %1829 = vrcp.f32 %v1286_v16 }
 0x838   : > { %v1289_v17 = vpop.xlane.xlu0 %1288 }
 0x839   : > { %1831 = vrcp.f32 %v1289_v17 }
 0x842   : > { %v1830_v18 = vpop.eup %1829 }
 0x843   : > { %v1292_v20 = vmul.f32 %v1830_v18, %v1826_v0 }
 0x846   : > { %v1832_v19 = vpop.eup %1831 }
 0x847   : > { %v1293_v21 = vmul.f32 %v1832_v19, %v1828_v4 }
 0x849   : > { %v1294_v22 = vpack.c.bf16 %v1293_v21, %v1292_v20 }
 0x84b   : > { %1733 = vmatmul.mubr.msk.bf16.vlgmr.msra.gmra.mxu0 %vm729_vm2, %v1294_v22 }
 0x90b   : > { %v1335_v7 = vpop.f32.mrf.mxu0 }
 0x90d   : > { %v1734_v9 = vpop.f32.mrf.mxu0 }
 0x90f   : > { %v1338_v23 = vpop.f32.mrf.mxu0 }
 0x910   : > { %v1342_v24 = vpack.c.bf16 %v1338_v23, %v1335_v7 }
 0x911   : > { %v1735_v25 = vpop.f32.mrf.mxu0 }
 0x912   : > { %1741 = vmatmul.mubr.msk.bf16.vlgmr.msra.gmra.mxu1 %vm679_vm1, %v1342_v24 }
 0x9d2   : > { %v1392_v27 = vpop.f32.mrf.mxu1 }
 0x9d3   : > { %v1399_v29 = vadd.f32 %v1392_v27, %v1217_v10 }
 0x9d4   : > { %v1742_v30 = vpop.f32.mrf.mxu1 }
 0x9d5   : > { %v1408_v31 = vadd.f32 %v1590_v28, %v1399_v29 }
 0x9d6   : > { %v1395_v32 = vpop.f32.mrf.mxu1 }
 0x9d7   : > { %v1400_v33 = vadd.f32 %v1395_v32, %v1218_v14  ;;  %v1412_v34 = vadd.f32 %v1410_v2, %v1408_v31 }
 0x9d8   : > { %v1743_v36 = vpop.f32.mrf.mxu1 }
 0x9d9   : > { %v1409_v37 = vadd.f32 %v1590_v28, %v1400_v33  ;;  %1414 = vadd.xlane.f32.xlu0 %v1412_v34 }
 0x9db   : > { %v1413_v38 = vadd.f32 %v1411_v35, %v1409_v37 }
 0x9dd   : > { %1416 = vadd.xlane.f32.xlu0 %v1413_v38 }
 0xa62   : > { %v1415_v39 = vpop.xlane.xlu0 %1414 }
 0xa63   : > { %v1419_v48 = vmul.f32 0.0078125, %v1415_v39 }
 0xa65   : > { %v1421_v52 = vsub.f32 %v1412_v34, %v1419_v48 }
 0xa66   : > { %v1417_v40 = vpop.xlane.xlu0 %1416 }
 0xa67   : > { %v1420_v41 = vmul.f32 0.0078125, %v1417_v40  ;;  %v1423_v42 = vmul.f32 %v1421_v52, %v1421_v52 }
 0xa69   : > { %v1422_v43 = vsub.f32 %v1413_v38, %v1420_v41  ;;  %1425 = vadd.xlane.f32.xlu0 %v1423_v42 }
 0xa6b   : > { %v1424_v44 = vmul.f32 %v1422_v43, %v1422_v43 }
 0xa6d   : > { %1427 = vadd.xlane.f32.xlu0 %v1424_v44 }
 0xaf2   : > { %v1426_v45 = vpop.xlane.xlu0 %1425 }
 0xaf3   : > { %v1429_v46 = vmul.f32 0.0078125, %v1426_v45 }
 0xaf5   : > { %v1431_v47 = vadd.f32 1e-05, %v1429_v46 }
 0xaf6   : > { %v1428_v26 = vpop.xlane.xlu0 %1427 }
 0xaf7   : > { %1833 = vrsqrt.f32 %v1431_v47  ;;  %v1430_v49 = vmul.f32 0.0078125, %v1428_v26 }
 0xaf9   : > { %v1432_v50 = vadd.f32 1e-05, %v1430_v49 }
 0xafb   : > { %1835 = vrsqrt.f32 %v1432_v50 }
 0xb04   : > { %v1834_v53 = vpop.eup %1833 }
 0xb05   : > { %v1435_v54 = vmul.f32 %v1834_v53, %v1421_v52 }
 0xb07   : > { %v1444_v57 = vmul.f32 %v1591_v55, %v1435_v54 }
 0xb08   : > { %v1836_v56 = vpop.eup %1835 }
 0xb09   : > { %v1436_v58 = vmul.f32 %v1836_v56, %v1422_v43  ;;  %v1453_v61 = vadd.f32 %v1592_v59, %v1444_v57 }
 0xb0b   : > { %v1445_v60 = vmul.f32 %v1591_v55, %v1436_v58 }
 0xb0d   : > { %v1454_v62 = vadd.f32 %v1592_v59, %v1445_v60 }
 0xb0f   : > { %v1605_v63 = vpack.c.bf16 %v1454_v62, %v1453_v61 }
 0xb11   : > { %1606 = vst [vmem:[%s379_s29] sm:$0xff] %v1605_v63  }
 0xb12 PF: > { %s20_s13 = sadd.s32 1, %s1843_s13  }
 0xb13   : > { %p17_p4 = scmp.ge.s32.totalorder %s20_s13, 4  }
 0xb15   :  { %19 = sbr.rel (!%p17_p4) target bundleno = 1 (0x1), region = 93 }

// kernel: transformer_decoder_forward.15
= control target key start
LH: loop header
LB: loop body
LE: loop exit
PB: predicated region body
PF: predicated region fallthrough
CT: control target
= control target key end

     0   :  { %8 = vsyncpa [#allocation3], 0  ;;  %s893_s0 = inlined_call_operand.vmem [shape: bf16[32,128], index: 0, kind: input, shape index: {}]   ;;  %s894_s1 = inlined_call_operand.vmem [shape: bf16[128,256], index: 1, kind: input, shape index: {}]   ;;  %s895_s2 = inlined_call_operand.vmem [shape: f32[1,256], index: 2, kind: input, shape index: {}]   ;;  %s896_s3 = inlined_call_operand.hbm [shape: f32[32,256], index: 3, kind: output, shape index: {}]  }
   0x1   :  { %10 = vsyncpa [#allocation3 + $0x1], 0  ;;  %s729_s12 = smov 0   ;;  %s731_s13 = smov 0  }
   0x2   :  { %s733_s14 = smov 0   ;;  %s735_s15 = smov 0  }
   0x3   :  { %s737_s16 = smov 0   ;;  %s739_s17 = smov 0  }
   0x4 LB: > { %s509_s18 = sadd.s32 4294967295, %s703_s17   ;;  %s510_s19 = sadd.s32 4294967294, %s703_s17   ;;  %s703_s17 = sphi %s739_s17, %s16_s17   ;;  %s699_s16 = sphi %s737_s16, %s903_s16   ;;  %s695_s15 = sphi %s735_s15, %s902_s15   ;;  %s691_s14 = sphi %s733_s14, %s901_s14   ;;  %s687_s13 = sphi %s731_s13, %s900_s13   ;;  %s683_s12 = sphi %s729_s12, %s899_s12  }
   0x5   : > { %s28_s20 = sadd.s32 1, %s699_s16  ;;  %s115_s21 = sadd.s32 1, %s691_s14 }
   0x6   : > { %p30_p0 = scmp.ge.s32.totalorder %s28_s20, 2  ;;  %p125_p1 = scmp.ne.s32.totalorder %s691_s14, %s687_s13 }
   0x7   : > { %p126_p2 = scmp.eq.s32.totalorder %s509_s18, 1  ;;  %p131_p3 = scmp.ne.s32.totalorder %s687_s13, %s683_s12 }
   0x8   : > { %s905_s20 = smov (%p30_p0, %s28_s20), 0  ;;  %p132_p5 = scmp.eq.s32.totalorder %s510_s19, 1 }
   0x9   : > { %p769_p4 = por %p126_p2, %p125_p1  ;;  %s110_s23 = ssub.s32 %s699_s16, %s905_s20 }
   0xa   : > { %p515_p6 = scmp.ge.s32.totalorder %s703_s17, 1  ;;  %p113_p7 = scmp.eq.s32.totalorder %s110_s23, 0 }
   0xb   : > { %p776_p8 = por %p132_p5, %p131_p3  ;;  %p176_p9 = scmp.lt.s32.totalorder %s703_s17, 3 }
   0xc   : > { %s782_s25 = scalar_select %p113_p7, %s691_s14, %s115_s21  }
   0xd   : > { %p177_p10 = pnand %p515_p6, %p176_p9 }
   0xe   : > { %s517_s28 = sshll.u32 (!%p177_p10), %s695_s15, 1  ;;  %s543_s8 = sshll.u32 (!%p177_p10), %s695_s15, 9 }
   0xf   : > { %180 = sbr.rel (%p177_p10) target bundleno = 268 (0x10c), region = 32  ;;  %p210_p11 = scmp.lt.s32.totalorder (!%p177_p10), %s517_s28, 3 }
  0x10   : > { %s846_s11 = scalar_lea.hbm (!%p177_p10), %s896_s3, %s543_s8  ;;  %s706_s19 = smov (!%p177_p10), [#allocation2]  }
  0x11   : > { %s631_s21 = sshll.u32 (!%p177_p10), %s706_s19, 4  ;;  %s632_s21 = int_to_ptr.vmem [resolvable:$false] %s631_s21 }
  0x12   : > { %s633_s23 = scalar_lea.vmem (!%p177_p10), %s632_s21, 1024 }
  0x14   : > { %v602_v0 = vld [vmem:[%s894_s1 + $0x74] ss:$8 sps:$4 sm:$0xff]   ;;  %v604_v1 = vld [vmem:[%s894_s1 + $0x70] ss:$8 sps:$4 sm:$0xff]   ;;  %v705_v2 = vmov 0   ;;  %s907_s28 = smov (!%p210_p11, %s517_s28), 3  ;;  %v249_v18 = vlaneseq }
  0x15   : > { %377 = vmatprep.mubr.bf16.mxu0 %v705_v2  ;;  %345 = vmatprep.subr.bf16.mxu0 %v602_v0  ;;  %v605_v3 = vld [vmem:[%s894_s1 + $0x64] ss:$8 sps:$4 sm:$0xff]   ;;  %v607_v4 = vld [vmem:[%s894_s1 + $0x60] ss:$8 sps:$4 sm:$0xff]   ;;  %v608_v5 = vld [vmem:[%s894_s1 + $0x54] ss:$8 sps:$4 sm:$0xff]  }
  0x16   : > { %346 = vmatpush1.bf16.msra.mxu0 %v604_v1  ;;  %s518_s10 = sshll.u32 %s907_s28, 2  ;;  %v610_v6 = vld [vmem:[%s894_s1 + $0x50] ss:$8 sps:$4 sm:$0xff]   ;;  %v611_v7 = vld [vmem:[%s894_s1 + $0x44] ss:$8 sps:$4 sm:$0xff]   ;;  %v250_v19 = vshrl.u32 %v249_v18, 7 }
  0x17   : > { %347 = vmatprep.subr.bf16.mxu0 %v605_v3  ;;  %s213_s27 = scalar_lea.vmem %s893_s0, %s518_s10  ;;  %v613_v8 = vld [vmem:[%s894_s1 + $0x40] ss:$8 sps:$4 sm:$0xff]   ;;  %v614_v9 = vld [vmem:[%s894_s1 + $0x34] ss:$8 sps:$4 sm:$0xff]   ;;  %v616_v10 = vld [vmem:[%s894_s1 + $0x30] ss:$8 sps:$4 sm:$0xff]  }
  0x18   : > { %v617_v11 = vld [vmem:[%s894_s1 + $0x24] ss:$8 sps:$4 sm:$0xff]   ;;  %v619_v12 = vld [vmem:[%s894_s1 + $0x20] ss:$8 sps:$4 sm:$0xff]   ;;  %v620_v13 = vld [vmem:[%s894_s1 + $0x14] ss:$8 sps:$4 sm:$0xff]  }
  0x19   : > { %v622_v14 = vld [vmem:[%s894_s1 + $0x10] ss:$8 sps:$4 sm:$0xff]   ;;  %v623_v15 = vld [vmem:[%s894_s1 + $0x4] ss:$8 sps:$4 sm:$0xff]   ;;  %v625_v16 = vld [vmem:[%s894_s1] ss:$8 sps:$4 sm:$0xff]  }
  0x1a   : > { %348 = vmatpush1.bf16.msra.mxu0 %v607_v4  ;;  %v626_v17 = vld [vmem:[%s213_s27] sm:$0xff]   ;;  %v251_v20 = vsub.s32 0, %v250_v19  ;;  %s206_s28 = sand.u32 1, %s687_s13   ;;  %v255_v22 = vsub.s32 1, %v250_v19 }
  0x1b   : > { %349 = vmatprep.subr.bf16.mxu0 %v608_v5  ;;  %v247_v21 = vld [vmem:[%s895_s2] sm:$0x3]  ;;  %s516_s6 = sshll.u32 %s206_s28, 5  ;;  %s848_s18 = scalar_lea.sflag [#allocation3], %s206_s28 }
  0x1c   : > { %v252_v23 = vrot.slane %v247_v21, %v251_v20  ;;  %v256_v24 = vrot.slane %v247_v21, %v255_v22  ;;  %s208_s7 = scalar_lea.vmem [#allocation2], %s516_s6 }
  0x1d   : > { %s409_s27 = sshll.u32 %s208_s7, 4  ;;  %s841_s27 = int_to_ptr.vmem [resolvable:$true] %s409_s27 }
  0x1e   : > { %350 = vmatpush1.bf16.msra.mxu0 %v610_v6  ;;  %s627_s15 = scalar_lea.vmem %s841_s27, 512  ;;  %p634_p1 = scmp.lt.s32.totalorder %s841_s27, %s632_s21 }
  0x1f   : > { %351 = vmatprep.subr.bf16.mxu0 %v611_v7  ;;  %p628_p12 = scmp.ne.s32.totalorder %s841_s27, %s627_s15  ;;  %p635_p2 = scmp.lt.s32.totalorder %s633_s23, %s627_s15 }
  0x21   : > { %p629_p13 = pnand %p628_p12, %p769_p4  ;;  %p636_p3 = por %p635_p2, %p634_p1 }
  0x22   : > { %352 = vmatpush1.bf16.msra.mxu0 %v613_v8 }
  0x23   : > { %353 = vmatprep.subr.bf16.mxu0 %v614_v9  ;;  %p630_p0 = pneg %p629_p13 }
  0x25   : > { %p637_p5 = pnand %p636_p3, %p630_p0 }
  0x26   : > { %354 = vmatpush1.bf16.msra.mxu0 %v616_v10 }
  0x27   : > { %355 = vmatprep.subr.bf16.mxu0 %v617_v11 }
  0x2a   : > { %356 = vmatpush1.bf16.msra.mxu0 %v619_v12 }
  0x2b   : > { %357 = vmatprep.subr.bf16.mxu0 %v620_v13 }
  0x2e   : > { %358 = vmatpush1.bf16.msra.mxu0 %v622_v14 }
  0x2f   : > { %359 = vmatprep.subr.bf16.mxu0 %v623_v15 }
  0x32   : > { %360 = vmatpush1.bf16.msra.mxu0 %v625_v16 }
  0x35   : > { %378 = vmatmul.mubr.bf16.vlgmr.msra.gmra.mxu0 %v626_v17 }
  0xf5   : > { %v379_v25 = vpop.f32.mrf.mxu0 }
  0xf6   : > { %v380_v26 = vadd.f32 %v379_v25, %v252_v23 }
  0xf7   : > { %v381_v27 = vpop.f32.mrf.mxu0 }
  0xf8   : > { %388 = vst [vmem:[%s208_s7] sm:$0xff] %v380_v26  ;;  %v382_v28 = vadd.f32 %v381_v27, %v256_v24 }
  0xf9   : > { %v383_v29 = vpop.f32.mrf.mxu0 }
  0xfa   : > { %389 = vst [vmem:[%s208_s7 + $0x8] sm:$0xff] %v382_v28  ;;  %v384_v30 = vadd.f32 %v383_v29, %v252_v23 }
  0xfb   : > { %v385_v31 = vpop.f32.mrf.mxu0 }
  0xfc   : > { %390 = vst [vmem:[%s208_s7 + $0x10] sm:$0xff] %v384_v30  ;;  %v386_v32 = vadd.f32 %v385_v31, %v256_v24 }
  0xfe   : > { %391 = vst [vmem:[%s208_s7 + $0x18] sm:$0xff] %v386_v32 }
  0xff   : > { %640 = shalt.err (!%p637_p5)
}
 0x100   : > { %s641_s26 = scalar_lea.hbm %s846_s11, 512  ;;  %s645_s28 = scalar_lea.hbm %s896_s3, 1024 }
 0x101   : > { %p642_p6 = scmp.ne.s32.totalorder %s846_s11, %s641_s26  ;;  %p646_p10 = scmp.lt.s32.totalorder %s846_s11, %s896_s3 }
 0x102   : > { %p647_p11 = scmp.lt.s32.totalorder %s645_s28, %s641_s26 }
 0x103   : > { %p643_p7 = pnand %p642_p6, %p769_p4 }
 0x104   : > { %p648_p12 = por %p647_p11, %p646_p10 }
 0x105   : > { %p644_p9 = pneg %p643_p7 }
 0x107   : > { %p649_p13 = pnand %p648_p12, %p644_p9 }
 0x109   : > { %652 = shalt.err (!%p649_p13)
}
 0x10a   : > { %s707_s6 = smov 256   ;;  %s708_s7 = smov 16  }
 0x10b   : > { %544 = dma.vmem_to_hbm [thread:$0]  (%p769_p4), %s841_s27, 512, %s846_s11, %s848_s18, %s707_s6, %s707_s6, %s708_s7  }
 0x10c PF: > { %p550_p0 = scmp.ge.s32.totalorder %s703_s17, 2  ;;  %s424_s8 = sand.u32 1, %s683_s12  }
 0x10d   : > { %s425_s9 = scalar_lea.sflag [#allocation3], %s424_s8 }
 0x10e   : > { %p547_p1 = pnand %p550_p0, %p776_p8 }
 0x110   : > { %p548_p2 = pneg %p547_p1 }
 0x112   : > { %678 = dma.done.wait (%p548_p2), %s425_s9, 512  }
 0x113   : > { %680 = vsyncadd (%p548_p2), %s425_s9, 4294966784  ;;  %s16_s17 = sadd.s32 1, %s703_s17   ;;  %s899_s12 = smov %s687_s13 }
 0x114   : > { %p13_p3 = scmp.ge.s32.totalorder %s16_s17, 4   ;;  %s900_s13 = smov %s691_s14 }
 0x115   : > { %s901_s14 = smov %s782_s25  ;;  %s902_s15 = smov %s699_s16 }
 0x116   : > { %s903_s16 = smov %s905_s20  ;;  %15 = sbr.rel (!%p13_p3) target bundleno = 4 (0x4), region = 73 }
 0x11b   :  { %430 = vsyncpa [#allocation3], 1 }
 0x11c   :  { %432 = vsyncpa [#allocation3 + $0x1], 1 }

</bundles_post_ra>
